<compile_context>
chip_gen: v6e
topology: v6e:2x2x1
jax: 0.10.0
libtpu: 0.0.40
codegen_flags: <defaults>
</compile_context>

<pallas_src>
import functools

import jax
import jax.numpy as jnp
from jax.experimental import pallas as pl
from jax.experimental.pallas import tpu as pltpu

_LANE = 128
_TM_MAX = 256


# ----------------------------------------------------------------------------
# Pallas kernel: fused (M,K)x(K,N) matmul + bias + activation (lane-dense)
# ----------------------------------------------------------------------------
def _mm_bias_act_kernel(a_ref, w_ref, b_ref, o_ref, *, act):
    y = jnp.dot(a_ref[...], w_ref[...], preferred_element_type=jnp.float32)
    y = y + b_ref[...]                       # (TM,TN) + (1,TN), f32 epilogue
    if act == "relu":
        y = jnp.maximum(y, 0.0)
    elif act == "tanh":
        y = jnp.tanh(y)
    elif act == "sigmoid":
        y = jax.nn.sigmoid(y)
    # act == "none": identity
    o_ref[...] = y


def _round_up(x, m):
    return ((x + m - 1) // m) * m


def _pad2d(x, rows, cols):
    r, c = x.shape
    if rows == r and cols == c:
        return x
    return jnp.pad(x, ((0, rows - r), (0, cols - c)))


def matmul_bias_act(a, w, bias, act):
    """a:(M,K) f32, w:(K,N) f32, bias:(N,) f32 -> (M,N) f32, fused activation."""
    M, K = a.shape
    N = w.shape[1]
    Kp = _round_up(K, _LANE)                 # K padded -> full-width MXU passes
    Np = _round_up(N, _LANE)                 # N padded -> lane-dense stores
    tn = _LANE
    tm = _TM_MAX if M >= _TM_MAX else _round_up(max(M, 1), 8)
    Mp = _round_up(M, tm)

    # bf16 MXU inputs (halves DMA bytes), f32 accumulation in-kernel.
    a_p = _pad2d(a.astype(jnp.float32), Mp, Kp).astype(jnp.bfloat16)
    w_p = _pad2d(w.astype(jnp.float32), Kp, Np).astype(jnp.bfloat16)
    b_p = jnp.pad(bias.astype(jnp.float32), (0, Np - N)).reshape(1, Np)

    grid = (Mp // tm, Np // tn)
    flops = 2 * Mp * Kp * Np
    trans = Mp * Np if act in ("tanh", "sigmoid") else 0
    bytes_accessed = Mp * Kp * 2 + Kp * Np * 2 + Np * 4 + Mp * Np * 4

    out = pl.pallas_call(
        functools.partial(_mm_bias_act_kernel, act=act),
        out_shape=jax.ShapeDtypeStruct((Mp, Np), jnp.float32),
        grid_spec=pltpu.PrefetchScalarGridSpec(
            num_scalar_prefetch=0,
            grid=grid,
            in_specs=[
                pl.BlockSpec((tm, Kp), lambda i, j: (i, 0)),   # A row-block
                pl.BlockSpec((Kp, tn), lambda i, j: (0, j)),   # W col-block
                pl.BlockSpec((1, tn), lambda i, j: (0, j)),    # bias slice
            ],
            out_specs=pl.BlockSpec((tm, tn), lambda i, j: (i, j)),
        ),
        compiler_params=pltpu.CompilerParams(
            dimension_semantics=("parallel", "parallel"),
            vmem_limit_bytes=32 * 1024 * 1024,
        ),
        cost_estimate=pl.CostEstimate(
            flops=flops, transcendentals=trans, bytes_accessed=bytes_accessed),
    )(a_p, w_p, b_p)
    return out[:M, :N]


# ----------------------------------------------------------------------------
# Plain-JAX glue: NHWC im2col (no transposes), zero-dilation for conv-transpose
# ----------------------------------------------------------------------------
def im2col_nhwc(x, k, stride, pad):
    """x:(B,H,W,C) -> (B*Ho*Wo, k*k*C) with columns ordered (dy, dx, c)."""
    B, H, W, C = x.shape
    xp = jnp.pad(x, ((0, 0), (pad, pad), (pad, pad), (0, 0)))
    Ho = (H + 2 * pad - k) // stride + 1
    Wo = (W + 2 * pad - k) // stride + 1
    taps = []
    for dy in range(k):
        for dx in range(k):
            taps.append(xp[:, dy:dy + stride * (Ho - 1) + 1:stride,
                           dx:dx + stride * (Wo - 1) + 1:stride, :])
    p = jnp.concatenate(taps, axis=-1)       # (B, Ho, Wo, k*k*C), channel-last
    return p.reshape(B * Ho * Wo, k * k * C), Ho, Wo


def dilate2d(x, s):
    if s == 1:
        return x
    B, H, W, C = x.shape
    out = jnp.zeros((B, (H - 1) * s + 1, (W - 1) * s + 1, C), x.dtype)
    return out.at[:, ::s, ::s, :].set(x)


def conv2d_fused(x, w_oihw, bias, *, stride, padding, act, bn, eps=1e-5):
    """NHWC Conv2d(k,stride,padding) [+ eval-mode BN folded] + activation."""
    B = x.shape[0]
    Cout, Cin, k, _ = w_oihw.shape
    if bn:
        # Eval-mode BN with default running stats (mean=0, var=1, g=1, b=0)
        # folded into the conv weights/bias -> no affine in the kernel.
        gamma = jnp.ones((Cout,), jnp.float32)
        beta = jnp.zeros((Cout,), jnp.float32)
        mean = jnp.zeros((Cout,), jnp.float32)
        var = jnp.ones((Cout,), jnp.float32)
        s = gamma / jnp.sqrt(var + eps)
        w_oihw = w_oihw * s[:, None, None, None]
        bias = (bias - mean) * s + beta
    patches, Ho, Wo = im2col_nhwc(x, k, stride, padding)
    w2 = w_oihw.transpose(2, 3, 1, 0).reshape(k * k * Cin, Cout)  # (dy,dx,c) rows
    y = matmul_bias_act(patches, w2, bias, act)                   # (B*Ho*Wo, Cout)
    return y.reshape(B, Ho, Wo, Cout)


def conv_transpose2d_fused(x, w_iohw, *, stride, padding, act, bn, eps=1e-5):
    """NHWC ConvTranspose2d(k,stride,padding,bias=False) [+ BN] + activation."""
    Cin, Cout, k, _ = w_iohw.shape
    w_conv = jnp.flip(w_iohw, axis=(2, 3)).transpose(1, 0, 2, 3)  # (Cout,Cin,k,k)
    xd = dilate2d(x, stride)
    zero_bias = jnp.zeros((Cout,), jnp.float32)
    return conv2d_fused(xd, w_conv, zero_bias, stride=1,
                        padding=k - 1 - padding, act=act, bn=bn, eps=eps)


# ----------------------------------------------------------------------------
# DCEncoder / DCGenerator / VAE forward
# ----------------------------------------------------------------------------
def encoder_forward(p, x_nchw, key, *, ngf, nz):
    x = x_nchw.transpose(0, 2, 3, 1)                       # NHWC once at entry
    h = conv2d_fused(x, p["e1_w"], p["e1_b"], stride=2, padding=1, act="relu", bn=True)
    h = conv2d_fused(h, p["e2_w"], p["e2_b"], stride=2, padding=1, act="relu", bn=True)
    h = conv2d_fused(h, p["e3_w"], p["e3_b"], stride=2, padding=1, act="relu", bn=True)
    h = conv2d_fused(h, p["e4_w"], p["e4_b"], stride=1, padding=1, act="relu", bn=True)
    # flatten in torch NCHW (c,y,x) order to match the Linear weight layout
    feat = h.transpose(0, 3, 1, 2).reshape(h.shape[0], ngf * 8 * 4 * 4)
    # mu and logvar in ONE lane-dense matmul (N = 2*nz, padded to 128)
    w_cat = jnp.concatenate([p["mu_w"].T, p["logvar_w"].T], axis=1)
    b_cat = jnp.concatenate([p["mu_b"], p["logvar_b"]])
    ml = matmul_bias_act(feat, w_cat, b_cat, "none")       # (B, 2*nz)
    mu, logvar = ml[:, :nz], ml[:, nz:]
    std = jnp.exp(0.5 * logvar)
    eps = jax.random.normal(key, std.shape, std.dtype)     # reparameterization
    z = mu + eps * std
    return z, mu, logvar


def decoder_forward(p, z, *, normalize=True):
    B, nz = z.shape
    h = z.reshape(B, 1, 1, nz)                             # NHWC view of (B,nz,1,1)
    h = conv_transpose2d_fused(h, p["d1_w"], stride=1, padding=0, act="relu", bn=True)
    h = conv_transpose2d_fused(h, p["d2_w"], stride=2, padding=1, act="relu", bn=True)
    h = conv_transpose2d_fused(h, p["d3_w"], stride=2, padding=1, act="relu", bn=True)
    final = "tanh" if normalize else "sigmoid"
    h = conv_transpose2d_fused(h, p["d4_w"], stride=2, padding=1, act=final, bn=False)
    return h.transpose(0, 3, 1, 2)                         # back to NCHW once


def vae_forward(params, x, key, *, ngf, nz, normalize=True):
    z, mu, logvar = encoder_forward(params, x, key, ngf=ngf, nz=nz)
    out = decoder_forward(params, z, normalize=normalize)
    return out, mu, logvar


def init_params(key, ngf, nz):
    ks = jax.random.split(key, 16)

    def w(k, shape, scale=0.05):
        return scale * jax.random.normal(k, shape, jnp.float32)

    return {
        # DCEncoder (torch layouts: conv (Cout,Cin,kh,kw), linear (out,in))
        "e1_w": w(ks[0], (ngf, 3, 3, 3)),          "e1_b": w(ks[1], (ngf,)),
        "e2_w": w(ks[2], (ngf * 2, ngf, 3, 3)),    "e2_b": w(ks[3], (ngf * 2,)),
        "e3_w": w(ks[4], (ngf * 4, ngf * 2, 3, 3)), "e3_b": w(ks[5], (ngf * 4,)),
        "e4_w": w(ks[6], (ngf * 8, ngf * 4, 3, 3)), "e4_b": w(ks[7], (ngf * 8,)),
        "mu_w": w(ks[8], (nz, ngf * 8 * 4 * 4)),   "mu_b": w(ks[9], (nz,)),
        "logvar_w": w(ks[10], (nz, ngf * 8 * 4 * 4)), "logvar_b": w(ks[11], (nz,)),
        # DCGenerator (torch conv-transpose layout: (Cin,Cout,kh,kw), bias=False)
        "d1_w": w(ks[12], (nz, ngf * 8, 4, 4)),
        "d2_w": w(ks[13], (ngf * 8, ngf * 4, 4, 4)),
        "d3_w": w(ks[14], (ngf * 4, ngf * 2, 4, 4)),
        "d4_w": w(ks[15], (ngf * 2, 3, 4, 4)),
    }


if __name__ == "__main__":
    ngf, nz, batch = 8, 16, 2
    key = jax.random.PRNGKey(0)
    pkey, xkey, ekey = jax.random.split(key, 3)
    params = init_params(pkey, ngf, nz)
    x = jax.random.normal(xkey, (batch, 3, 32, 32), jnp.float32)

    fwd = jax.jit(functools.partial(vae_forward, ngf=ngf, nz=nz, normalize=True))
    out, mu, logvar = jax.block_until_ready(fwd(params, x, ekey))

    assert out.shape == (batch, 3, 32, 32), out.shape
    assert mu.shape == (batch, nz) and logvar.shape == (batch, nz)
    assert bool(jnp.all(jnp.isfinite(out)))
    assert bool(jnp.all(jnp.isfinite(mu))) and bool(jnp.all(jnp.isfinite(logvar)))
    assert bool(jnp.all(jnp.abs(out) <= 1.0))      # tanh output range
    print("KERNEL_OK")
</pallas_src>

<mosaic_0001>
module attributes {stable_mosaic.version = 11 : i64} {
  func.func @_mm_bias_act_kernel(%arg0: i32, %arg1: i32, %arg2: memref<256x128xbf16, #tpu.memory_space<vmem>>, %arg3: memref<128x128xbf16, #tpu.memory_space<vmem>>, %arg4: memref<1x128xf32, #tpu.memory_space<vmem>>, %arg5: memref<256x128xf32, #tpu.memory_space<vmem>>) attributes {dimension_semantics = [#tpu.dimension_semantics<parallel>, #tpu.dimension_semantics<parallel>], iteration_bounds = array<i64: 2, 1>, scalar_prefetch = 0 : i64, scratch_operands = 0 : i64, tpu.core_type = #tpu.core_type<tc>, window_params = [{transform_indices = @transform_0, window_bounds = array<i64: 256, 128>}, {transform_indices = @transform_1, window_bounds = array<i64: 128, 128>}, {transform_indices = @transform_2, window_bounds = array<i64: 1, 128>}, {transform_indices = @transform_3, window_bounds = array<i64: 256, 128>}]} {
    %c0 = arith.constant 0 : index
    %c0_0 = arith.constant 0 : index
    %0 = vector.load %arg2[%c0, %c0_0] : memref<256x128xbf16, #tpu.memory_space<vmem>>, vector<256x128xbf16>
    %c0_1 = arith.constant 0 : index
    %c0_2 = arith.constant 0 : index
    %1 = vector.load %arg3[%c0_1, %c0_2] : memref<128x128xbf16, #tpu.memory_space<vmem>>, vector<128x128xbf16>
    %cst = arith.constant dense<0.000000e+00> : vector<256x128xf32>
    %2 = tpu.matmul %0, %1, %cst {dimension_numbers = #tpu.dot_dimension_numbers<[1], [0], [0], [1], [0, 0, 1, 1], [], []>} : vector<256x128xbf16>, vector<128x128xbf16>, vector<256x128xf32> -> vector<256x128xf32>
    %c0_3 = arith.constant 0 : index
    %c0_4 = arith.constant 0 : index
    %3 = vector.load %arg4[%c0_3, %c0_4] : memref<1x128xf32, #tpu.memory_space<vmem>>, vector<1x128xf32>
    %4 = vector.broadcast %3 : vector<1x128xf32> to vector<256x128xf32>
    %5 = arith.addf %2, %4 : vector<256x128xf32>
    %cst_5 = arith.constant 0.000000e+00 : f32
    %6 = vector.broadcast %cst_5 : f32 to vector<256x128xf32>
    %7 = arith.maximumf %5, %6 : vector<256x128xf32>
    %c0_6 = arith.constant 0 : index
    %c0_7 = arith.constant 0 : index
    %8 = vector.load %arg5[%c0_6, %c0_7] : memref<256x128xf32, #tpu.memory_space<vmem>>, vector<256x128xf32>
    tpu.vector_store %arg5[%c0_6, %c0_7], %7 {strides = array<i32>} : memref<256x128xf32, #tpu.memory_space<vmem>>, vector<256x128xf32>,
    return
  }
  func.func @transform_0(%arg0: i32, %arg1: i32) -> (i32, i32) {
    %c0_i32 = arith.constant 0 : i32
    %c0_i32_0 = arith.constant 0 : i32
    return %arg0, %c0_i32 : i32, i32
  }
  func.func @transform_1(%arg0: i32, %arg1: i32) -> (i32, i32) {
    %c0_i32 = arith.constant 0 : i32
    %c0_i32_0 = arith.constant 0 : i32
    return %c0_i32, %arg1 : i32, i32
  }
  func.func @transform_2(%arg0: i32, %arg1: i32) -> (i32, i32) {
    %c0_i32 = arith.constant 0 : i32
    %c0_i32_0 = arith.constant 0 : i32
    return %c0_i32, %arg1 : i32, i32
  }
  func.func @transform_3(%arg0: i32, %arg1: i32) -> (i32, i32) {
    %c0_i32 = arith.constant 0 : i32
    return %arg0, %arg1 : i32, i32
  }
}

module attributes {stable_mosaic.version = 11 : i64} {
  func.func @_mm_bias_act_kernel(%arg0: i32, %arg1: i32, %arg2: memref<128x128xbf16, #tpu.memory_space<vmem>>, %arg3: memref<128x128xbf16, #tpu.memory_space<vmem>>, %arg4: memref<1x128xf32, #tpu.memory_space<vmem>>, %arg5: memref<128x128xf32, #tpu.memory_space<vmem>>) attributes {dimension_semantics = [#tpu.dimension_semantics<parallel>, #tpu.dimension_semantics<parallel>], iteration_bounds = array<i64: 1, 1>, scalar_prefetch = 0 : i64, scratch_operands = 0 : i64, tpu.core_type = #tpu.core_type<tc>, window_params = [{transform_indices = @transform_0, window_bounds = array<i64: 128, 128>}, {transform_indices = @transform_1, window_bounds = array<i64: 128, 128>}, {transform_indices = @transform_2, window_bounds = array<i64: 1, 128>}, {transform_indices = @transform_3, window_bounds = array<i64: 128, 128>}]} {
    %c0 = arith.constant 0 : index
    %c0_0 = arith.constant 0 : index
    %0 = vector.load %arg2[%c0, %c0_0] : memref<128x128xbf16, #tpu.memory_space<vmem>>, vector<128x128xbf16>
    %c0_1 = arith.constant 0 : index
    %c0_2 = arith.constant 0 : index
    %1 = vector.load %arg3[%c0_1, %c0_2] : memref<128x128xbf16, #tpu.memory_space<vmem>>, vector<128x128xbf16>
    %cst = arith.constant dense<0.000000e+00> : vector<128x128xf32>
    %2 = tpu.matmul %0, %1, %cst {dimension_numbers = #tpu.dot_dimension_numbers<[1], [0], [0], [1], [0, 0, 1, 1], [], []>} : vector<128x128xbf16>, vector<128x128xbf16>, vector<128x128xf32> -> vector<128x128xf32>
    %c0_3 = arith.constant 0 : index
    %c0_4 = arith.constant 0 : index
    %3 = vector.load %arg4[%c0_3, %c0_4] : memref<1x128xf32, #tpu.memory_space<vmem>>, vector<1x128xf32>
    %4 = vector.broadcast %3 : vector<1x128xf32> to vector<128x128xf32>
    %5 = arith.addf %2, %4 : vector<128x128xf32>
    %cst_5 = arith.constant 0.000000e+00 : f32
    %6 = vector.broadcast %cst_5 : f32 to vector<128x128xf32>
    %7 = arith.maximumf %5, %6 : vector<128x128xf32>
    %c0_6 = arith.constant 0 : index
    %c0_7 = arith.constant 0 : index
    %8 = vector.load %arg5[%c0_6, %c0_7] : memref<128x128xf32, #tpu.memory_space<vmem>>, vector<128x128xf32>
    tpu.vector_store %arg5[%c0_6, %c0_7], %7 {strides = array<i32>} : memref<128x128xf32, #tpu.memory_space<vmem>>, vector<128x128xf32>,
    return
  }
  func.func @transform_0(%arg0: i32, %arg1: i32) -> (i32, i32) {
    %c0_i32 = arith.constant 0 : i32
    %c0_i32_0 = arith.constant 0 : i32
    return %arg0, %c0_i32 : i32, i32
  }
  func.func @transform_1(%arg0: i32, %arg1: i32) -> (i32, i32) {
    %c0_i32 = arith.constant 0 : i32
    %c0_i32_0 = arith.constant 0 : i32
    return %c0_i32, %arg1 : i32, i32
  }
  func.func @transform_2(%arg0: i32, %arg1: i32) -> (i32, i32) {
    %c0_i32 = arith.constant 0 : i32
    %c0_i32_0 = arith.constant 0 : i32
    return %c0_i32, %arg1 : i32, i32
  }
  func.func @transform_3(%arg0: i32, %arg1: i32) -> (i32, i32) {
    %c0_i32 = arith.constant 0 : i32
    return %arg0, %arg1 : i32, i32
  }
}

module attributes {stable_mosaic.version = 11 : i64} {
  func.func @_mm_bias_act_kernel(%arg0: i32, %arg1: i32, %arg2: memref<32x256xbf16, #tpu.memory_space<vmem>>, %arg3: memref<256x128xbf16, #tpu.memory_space<vmem>>, %arg4: memref<1x128xf32, #tpu.memory_space<vmem>>, %arg5: memref<32x128xf32, #tpu.memory_space<vmem>>) attributes {dimension_semantics = [#tpu.dimension_semantics<parallel>, #tpu.dimension_semantics<parallel>], iteration_bounds = array<i64: 1, 1>, scalar_prefetch = 0 : i64, scratch_operands = 0 : i64, tpu.core_type = #tpu.core_type<tc>, window_params = [{transform_indices = @transform_0, window_bounds = array<i64: 32, 256>}, {transform_indices = @transform_1, window_bounds = array<i64: 256, 128>}, {transform_indices = @transform_2, window_bounds = array<i64: 1, 128>}, {transform_indices = @transform_3, window_bounds = array<i64: 32, 128>}]} {
    %c0 = arith.constant 0 : index
    %c0_0 = arith.constant 0 : index
    %0 = vector.load %arg2[%c0, %c0_0] : memref<32x256xbf16, #tpu.memory_space<vmem>>, vector<32x256xbf16>
    %c0_1 = arith.constant 0 : index
    %c0_2 = arith.constant 0 : index
    %1 = vector.load %arg3[%c0_1, %c0_2] : memref<256x128xbf16, #tpu.memory_space<vmem>>, vector<256x128xbf16>
    %cst = arith.constant dense<0.000000e+00> : vector<32x128xf32>
    %2 = tpu.matmul %0, %1, %cst {dimension_numbers = #tpu.dot_dimension_numbers<[1], [0], [0], [1], [0, 0, 1, 1], [], []>} : vector<32x256xbf16>, vector<256x128xbf16>, vector<32x128xf32> -> vector<32x128xf32>
    %c0_3 = arith.constant 0 : index
    %c0_4 = arith.constant 0 : index
    %3 = vector.load %arg4[%c0_3, %c0_4] : memref<1x128xf32, #tpu.memory_space<vmem>>, vector<1x128xf32>
    %4 = vector.broadcast %3 : vector<1x128xf32> to vector<32x128xf32>
    %5 = arith.addf %2, %4 : vector<32x128xf32>
    %cst_5 = arith.constant 0.000000e+00 : f32
    %6 = vector.broadcast %cst_5 : f32 to vector<32x128xf32>
    %7 = arith.maximumf %5, %6 : vector<32x128xf32>
    %c0_6 = arith.constant 0 : index
    %c0_7 = arith.constant 0 : index
    %8 = vector.load %arg5[%c0_6, %c0_7] : memref<32x128xf32, #tpu.memory_space<vmem>>, vector<32x128xf32>
    tpu.vector_store %arg5[%c0_6, %c0_7], %7 {strides = array<i32>} : memref<32x128xf32, #tpu.memory_space<vmem>>, vector<32x128xf32>,
    return
  }
  func.func @transform_0(%arg0: i32, %arg1: i32) -> (i32, i32) {
    %c0_i32 = arith.constant 0 : i32
    %c0_i32_0 = arith.constant 0 : i32
    return %arg0, %c0_i32 : i32, i32
  }
  func.func @transform_1(%arg0: i32, %arg1: i32) -> (i32, i32) {
    %c0_i32 = arith.constant 0 : i32
    %c0_i32_0 = arith.constant 0 : i32
    return %c0_i32, %arg1 : i32, i32
  }
  func.func @transform_2(%arg0: i32, %arg1: i32) -> (i32, i32) {
    %c0_i32 = arith.constant 0 : i32
    %c0_i32_0 = arith.constant 0 : i32
    return %c0_i32, %arg1 : i32, i32
  }
  func.func @transform_3(%arg0: i32, %arg1: i32) -> (i32, i32) {
    %c0_i32 = arith.constant 0 : i32
    return %arg0, %arg1 : i32, i32
  }
}

module attributes {stable_mosaic.version = 11 : i64} {
  func.func @_mm_bias_act_kernel(%arg0: i32, %arg1: i32, %arg2: memref<32x384xbf16, #tpu.memory_space<vmem>>, %arg3: memref<384x128xbf16, #tpu.memory_space<vmem>>, %arg4: memref<1x128xf32, #tpu.memory_space<vmem>>, %arg5: memref<32x128xf32, #tpu.memory_space<vmem>>) attributes {dimension_semantics = [#tpu.dimension_semantics<parallel>, #tpu.dimension_semantics<parallel>], iteration_bounds = array<i64: 1, 1>, scalar_prefetch = 0 : i64, scratch_operands = 0 : i64, tpu.core_type = #tpu.core_type<tc>, window_params = [{transform_indices = @transform_0, window_bounds = array<i64: 32, 384>}, {transform_indices = @transform_1, window_bounds = array<i64: 384, 128>}, {transform_indices = @transform_2, window_bounds = array<i64: 1, 128>}, {transform_indices = @transform_3, window_bounds = array<i64: 32, 128>}]} {
    %c0 = arith.constant 0 : index
    %c0_0 = arith.constant 0 : index
    %0 = vector.load %arg2[%c0, %c0_0] : memref<32x384xbf16, #tpu.memory_space<vmem>>, vector<32x384xbf16>
    %c0_1 = arith.constant 0 : index
    %c0_2 = arith.constant 0 : index
    %1 = vector.load %arg3[%c0_1, %c0_2] : memref<384x128xbf16, #tpu.memory_space<vmem>>, vector<384x128xbf16>
    %cst = arith.constant dense<0.000000e+00> : vector<32x128xf32>
    %2 = tpu.matmul %0, %1, %cst {dimension_numbers = #tpu.dot_dimension_numbers<[1], [0], [0], [1], [0, 0, 1, 1], [], []>} : vector<32x384xbf16>, vector<384x128xbf16>, vector<32x128xf32> -> vector<32x128xf32>
    %c0_3 = arith.constant 0 : index
    %c0_4 = arith.constant 0 : index
    %3 = vector.load %arg4[%c0_3, %c0_4] : memref<1x128xf32, #tpu.memory_space<vmem>>, vector<1x128xf32>
    %4 = vector.broadcast %3 : vector<1x128xf32> to vector<32x128xf32>
    %5 = arith.addf %2, %4 : vector<32x128xf32>
    %cst_5 = arith.constant 0.000000e+00 : f32
    %6 = vector.broadcast %cst_5 : f32 to vector<32x128xf32>
    %7 = arith.maximumf %5, %6 : vector<32x128xf32>
    %c0_6 = arith.constant 0 : index
    %c0_7 = arith.constant 0 : index
    %8 = vector.load %arg5[%c0_6, %c0_7] : memref<32x128xf32, #tpu.memory_space<vmem>>, vector<32x128xf32>
    tpu.vector_store %arg5[%c0_6, %c0_7], %7 {strides = array<i32>} : memref<32x128xf32, #tpu.memory_space<vmem>>, vector<32x128xf32>,
    return
  }
  func.func @transform_0(%arg0: i32, %arg1: i32) -> (i32, i32) {
    %c0_i32 = arith.constant 0 : i32
    %c0_i32_0 = arith.constant 0 : i32
    return %arg0, %c0_i32 : i32, i32
  }
  func.func @transform_1(%arg0: i32, %arg1: i32) -> (i32, i32) {
    %c0_i32 = arith.constant 0 : i32
    %c0_i32_0 = arith.constant 0 : i32
    return %c0_i32, %arg1 : i32, i32
  }
  func.func @transform_2(%arg0: i32, %arg1: i32) -> (i32, i32) {
    %c0_i32 = arith.constant 0 : i32
    %c0_i32_0 = arith.constant 0 : i32
    return %c0_i32, %arg1 : i32, i32
  }
  func.func @transform_3(%arg0: i32, %arg1: i32) -> (i32, i32) {
    %c0_i32 = arith.constant 0 : i32
    return %arg0, %arg1 : i32, i32
  }
}

module attributes {stable_mosaic.version = 11 : i64} {
  func.func @_mm_bias_act_kernel(%arg0: i32, %arg1: i32, %arg2: memref<8x1024xbf16, #tpu.memory_space<vmem>>, %arg3: memref<1024x128xbf16, #tpu.memory_space<vmem>>, %arg4: memref<1x128xf32, #tpu.memory_space<vmem>>, %arg5: memref<8x128xf32, #tpu.memory_space<vmem>>) attributes {dimension_semantics = [#tpu.dimension_semantics<parallel>, #tpu.dimension_semantics<parallel>], iteration_bounds = array<i64: 1, 1>, scalar_prefetch = 0 : i64, scratch_operands = 0 : i64, tpu.core_type = #tpu.core_type<tc>, window_params = [{transform_indices = @transform_0, window_bounds = array<i64: 8, 1024>}, {transform_indices = @transform_1, window_bounds = array<i64: 1024, 128>}, {transform_indices = @transform_2, window_bounds = array<i64: 1, 128>}, {transform_indices = @transform_3, window_bounds = array<i64: 8, 128>}]} {
    %c0 = arith.constant 0 : index
    %c0_0 = arith.constant 0 : index
    %0 = vector.load %arg2[%c0, %c0_0] : memref<8x1024xbf16, #tpu.memory_space<vmem>>, vector<8x1024xbf16>
    %c0_1 = arith.constant 0 : index
    %c0_2 = arith.constant 0 : index
    %1 = vector.load %arg3[%c0_1, %c0_2] : memref<1024x128xbf16, #tpu.memory_space<vmem>>, vector<1024x128xbf16>
    %cst = arith.constant dense<0.000000e+00> : vector<8x128xf32>
    %2 = tpu.matmul %0, %1, %cst {dimension_numbers = #tpu.dot_dimension_numbers<[1], [0], [0], [1], [0, 0, 1, 1], [], []>} : vector<8x1024xbf16>, vector<1024x128xbf16>, vector<8x128xf32> -> vector<8x128xf32>
    %c0_3 = arith.constant 0 : index
    %c0_4 = arith.constant 0 : index
    %3 = vector.load %arg4[%c0_3, %c0_4] : memref<1x128xf32, #tpu.memory_space<vmem>>, vector<1x128xf32>
    %4 = vector.broadcast %3 : vector<1x128xf32> to vector<8x128xf32>
    %5 = arith.addf %2, %4 : vector<8x128xf32>
    %c0_5 = arith.constant 0 : index
    %c0_6 = arith.constant 0 : index
    %6 = vector.load %arg5[%c0_5, %c0_6] : memref<8x128xf32, #tpu.memory_space<vmem>>, vector<8x128xf32>
    tpu.vector_store %arg5[%c0_5, %c0_6], %5 {strides = array<i32>} : memref<8x128xf32, #tpu.memory_space<vmem>>, vector<8x128xf32>,
    return
  }
  func.func @transform_0(%arg0: i32, %arg1: i32) -> (i32, i32) {
    %c0_i32 = arith.constant 0 : i32
    %c0_i32_0 = arith.constant 0 : i32
    return %arg0, %c0_i32 : i32, i32
  }
  func.func @transform_1(%arg0: i32, %arg1: i32) -> (i32, i32) {
    %c0_i32 = arith.constant 0 : i32
    %c0_i32_0 = arith.constant 0 : i32
    return %c0_i32, %arg1 : i32, i32
  }
  func.func @transform_2(%arg0: i32, %arg1: i32) -> (i32, i32) {
    %c0_i32 = arith.constant 0 : i32
    %c0_i32_0 = arith.constant 0 : i32
    return %c0_i32, %arg1 : i32, i32
  }
  func.func @transform_3(%arg0: i32, %arg1: i32) -> (i32, i32) {
    %c0_i32 = arith.constant 0 : i32
    return %arg0, %arg1 : i32, i32
  }
}

module attributes {stable_mosaic.version = 11 : i64} {
  func.func @_mm_bias_act_kernel(%arg0: i32, %arg1: i32, %arg2: memref<128x1024xbf16, #tpu.memory_space<vmem>>, %arg3: memref<1024x128xbf16, #tpu.memory_space<vmem>>, %arg4: memref<1x128xf32, #tpu.memory_space<vmem>>, %arg5: memref<128x128xf32, #tpu.memory_space<vmem>>) attributes {dimension_semantics = [#tpu.dimension_semantics<parallel>, #tpu.dimension_semantics<parallel>], iteration_bounds = array<i64: 1, 1>, scalar_prefetch = 0 : i64, scratch_operands = 0 : i64, tpu.core_type = #tpu.core_type<tc>, window_params = [{transform_indices = @transform_0, window_bounds = array<i64: 128, 1024>}, {transform_indices = @transform_1, window_bounds = array<i64: 1024, 128>}, {transform_indices = @transform_2, window_bounds = array<i64: 1, 128>}, {transform_indices = @transform_3, window_bounds = array<i64: 128, 128>}]} {
    %c0 = arith.constant 0 : index
    %c0_0 = arith.constant 0 : index
    %0 = vector.load %arg2[%c0, %c0_0] : memref<128x1024xbf16, #tpu.memory_space<vmem>>, vector<128x1024xbf16>
    %c0_1 = arith.constant 0 : index
    %c0_2 = arith.constant 0 : index
    %1 = vector.load %arg3[%c0_1, %c0_2] : memref<1024x128xbf16, #tpu.memory_space<vmem>>, vector<1024x128xbf16>
    %cst = arith.constant dense<0.000000e+00> : vector<128x128xf32>
    %2 = tpu.matmul %0, %1, %cst {dimension_numbers = #tpu.dot_dimension_numbers<[1], [0], [0], [1], [0, 0, 1, 1], [], []>} : vector<128x1024xbf16>, vector<1024x128xbf16>, vector<128x128xf32> -> vector<128x128xf32>
    %c0_3 = arith.constant 0 : index
    %c0_4 = arith.constant 0 : index
    %3 = vector.load %arg4[%c0_3, %c0_4] : memref<1x128xf32, #tpu.memory_space<vmem>>, vector<1x128xf32>
    %4 = vector.broadcast %3 : vector<1x128xf32> to vector<128x128xf32>
    %5 = arith.addf %2, %4 : vector<128x128xf32>
    %cst_5 = arith.constant 0.000000e+00 : f32
    %6 = vector.broadcast %cst_5 : f32 to vector<128x128xf32>
    %7 = arith.maximumf %5, %6 : vector<128x128xf32>
    %c0_6 = arith.constant 0 : index
    %c0_7 = arith.constant 0 : index
    %8 = vector.load %arg5[%c0_6, %c0_7] : memref<128x128xf32, #tpu.memory_space<vmem>>, vector<128x128xf32>
    tpu.vector_store %arg5[%c0_6, %c0_7], %7 {strides = array<i32>} : memref<128x128xf32, #tpu.memory_space<vmem>>, vector<128x128xf32>,
    return
  }
  func.func @transform_0(%arg0: i32, %arg1: i32) -> (i32, i32) {
    %c0_i32 = arith.constant 0 : i32
    %c0_i32_0 = arith.constant 0 : i32
    return %arg0, %c0_i32 : i32, i32
  }
  func.func @transform_1(%arg0: i32, %arg1: i32) -> (i32, i32) {
    %c0_i32 = arith.constant 0 : i32
    %c0_i32_0 = arith.constant 0 : i32
    return %c0_i32, %arg1 : i32, i32
  }
  func.func @transform_2(%arg0: i32, %arg1: i32) -> (i32, i32) {
    %c0_i32 = arith.constant 0 : i32
    %c0_i32_0 = arith.constant 0 : i32
    return %c0_i32, %arg1 : i32, i32
  }
  func.func @transform_3(%arg0: i32, %arg1: i32) -> (i32, i32) {
    %c0_i32 = arith.constant 0 : i32
    return %arg0, %arg1 : i32, i32
  }
}

module attributes {stable_mosaic.version = 11 : i64} {
  func.func @_mm_bias_act_kernel(%arg0: i32, %arg1: i32, %arg2: memref<256x512xbf16, #tpu.memory_space<vmem>>, %arg3: memref<512x128xbf16, #tpu.memory_space<vmem>>, %arg4: memref<1x128xf32, #tpu.memory_space<vmem>>, %arg5: memref<256x128xf32, #tpu.memory_space<vmem>>) attributes {dimension_semantics = [#tpu.dimension_semantics<parallel>, #tpu.dimension_semantics<parallel>], iteration_bounds = array<i64: 2, 1>, scalar_prefetch = 0 : i64, scratch_operands = 0 : i64, tpu.core_type = #tpu.core_type<tc>, window_params = [{transform_indices = @transform_0, window_bounds = array<i64: 256, 512>}, {transform_indices = @transform_1, window_bounds = array<i64: 512, 128>}, {transform_indices = @transform_2, window_bounds = array<i64: 1, 128>}, {transform_indices = @transform_3, window_bounds = array<i64: 256, 128>}]} {
    %c0 = arith.constant 0 : index
    %c0_0 = arith.constant 0 : index
    %0 = vector.load %arg2[%c0, %c0_0] : memref<256x512xbf16, #tpu.memory_space<vmem>>, vector<256x512xbf16>
    %c0_1 = arith.constant 0 : index
    %c0_2 = arith.constant 0 : index
    %1 = vector.load %arg3[%c0_1, %c0_2] : memref<512x128xbf16, #tpu.memory_space<vmem>>, vector<512x128xbf16>
    %cst = arith.constant dense<0.000000e+00> : vector<256x128xf32>
    %2 = tpu.matmul %0, %1, %cst {dimension_numbers = #tpu.dot_dimension_numbers<[1], [0], [0], [1], [0, 0, 1, 1], [], []>} : vector<256x512xbf16>, vector<512x128xbf16>, vector<256x128xf32> -> vector<256x128xf32>
    %c0_3 = arith.constant 0 : index
    %c0_4 = arith.constant 0 : index
    %3 = vector.load %arg4[%c0_3, %c0_4] : memref<1x128xf32, #tpu.memory_space<vmem>>, vector<1x128xf32>
    %4 = vector.broadcast %3 : vector<1x128xf32> to vector<256x128xf32>
    %5 = arith.addf %2, %4 : vector<256x128xf32>
    %cst_5 = arith.constant 0.000000e+00 : f32
    %6 = vector.broadcast %cst_5 : f32 to vector<256x128xf32>
    %7 = arith.maximumf %5, %6 : vector<256x128xf32>
    %c0_6 = arith.constant 0 : index
    %c0_7 = arith.constant 0 : index
    %8 = vector.load %arg5[%c0_6, %c0_7] : memref<256x128xf32, #tpu.memory_space<vmem>>, vector<256x128xf32>
    tpu.vector_store %arg5[%c0_6, %c0_7], %7 {strides = array<i32>} : memref<256x128xf32, #tpu.memory_space<vmem>>, vector<256x128xf32>,
    return
  }
  func.func @transform_0(%arg0: i32, %arg1: i32) -> (i32, i32) {
    %c0_i32 = arith.constant 0 : i32
    %c0_i32_0 = arith.constant 0 : i32
    return %arg0, %c0_i32 : i32, i32
  }
  func.func @transform_1(%arg0: i32, %arg1: i32) -> (i32, i32) {
    %c0_i32 = arith.constant 0 : i32
    %c0_i32_0 = arith.constant 0 : i32
    return %c0_i32, %arg1 : i32, i32
  }
  func.func @transform_2(%arg0: i32, %arg1: i32) -> (i32, i32) {
    %c0_i32 = arith.constant 0 : i32
    %c0_i32_0 = arith.constant 0 : i32
    return %c0_i32, %arg1 : i32, i32
  }
  func.func @transform_3(%arg0: i32, %arg1: i32) -> (i32, i32) {
    %c0_i32 = arith.constant 0 : i32
    return %arg0, %arg1 : i32, i32
  }
}

module attributes {stable_mosaic.version = 11 : i64} {
  func.func @_mm_bias_act_kernel(%arg0: i32, %arg1: i32, %arg2: memref<256x256xbf16, #tpu.memory_space<vmem>>, %arg3: memref<256x128xbf16, #tpu.memory_space<vmem>>, %arg4: memref<1x128xf32, #tpu.memory_space<vmem>>, %arg5: memref<256x128xf32, #tpu.memory_space<vmem>>) attributes {dimension_semantics = [#tpu.dimension_semantics<parallel>, #tpu.dimension_semantics<parallel>], iteration_bounds = array<i64: 8, 1>, scalar_prefetch = 0 : i64, scratch_operands = 0 : i64, tpu.core_type = #tpu.core_type<tc>, window_params = [{transform_indices = @transform_0, window_bounds = array<i64: 256, 256>}, {transform_indices = @transform_1, window_bounds = array<i64: 256, 128>}, {transform_indices = @transform_2, window_bounds = array<i64: 1, 128>}, {transform_indices = @transform_3, window_bounds = array<i64: 256, 128>}]} {
    %c0 = arith.constant 0 : index
    %c0_0 = arith.constant 0 : index
    %0 = vector.load %arg2[%c0, %c0_0] : memref<256x256xbf16, #tpu.memory_space<vmem>>, vector<256x256xbf16>
    %c0_1 = arith.constant 0 : index
    %c0_2 = arith.constant 0 : index
    %1 = vector.load %arg3[%c0_1, %c0_2] : memref<256x128xbf16, #tpu.memory_space<vmem>>, vector<256x128xbf16>
    %cst = arith.constant dense<0.000000e+00> : vector<256x128xf32>
    %2 = tpu.matmul %0, %1, %cst {dimension_numbers = #tpu.dot_dimension_numbers<[1], [0], [0], [1], [0, 0, 1, 1], [], []>} : vector<256x256xbf16>, vector<256x128xbf16>, vector<256x128xf32> -> vector<256x128xf32>
    %c0_3 = arith.constant 0 : index
    %c0_4 = arith.constant 0 : index
    %3 = vector.load %arg4[%c0_3, %c0_4] : memref<1x128xf32, #tpu.memory_space<vmem>>, vector<1x128xf32>
    %4 = vector.broadcast %3 : vector<1x128xf32> to vector<256x128xf32>
    %5 = arith.addf %2, %4 : vector<256x128xf32>
    %6 = math.tanh %5 : vector<256x128xf32>
    %c0_5 = arith.constant 0 : index
    %c0_6 = arith.constant 0 : index
    %7 = vector.load %arg5[%c0_5, %c0_6] : memref<256x128xf32, #tpu.memory_space<vmem>>, vector<256x128xf32>
    tpu.vector_store %arg5[%c0_5, %c0_6], %6 {strides = array<i32>} : memref<256x128xf32, #tpu.memory_space<vmem>>, vector<256x128xf32>,
    return
  }
  func.func @transform_0(%arg0: i32, %arg1: i32) -> (i32, i32) {
    %c0_i32 = arith.constant 0 : i32
    %c0_i32_0 = arith.constant 0 : i32
    return %arg0, %c0_i32 : i32, i32
  }
  func.func @transform_1(%arg0: i32, %arg1: i32) -> (i32, i32) {
    %c0_i32 = arith.constant 0 : i32
    %c0_i32_0 = arith.constant 0 : i32
    return %c0_i32, %arg1 : i32, i32
  }
  func.func @transform_2(%arg0: i32, %arg1: i32) -> (i32, i32) {
    %c0_i32 = arith.constant 0 : i32
    %c0_i32_0 = arith.constant 0 : i32
    return %c0_i32, %arg1 : i32, i32
  }
  func.func @transform_3(%arg0: i32, %arg1: i32) -> (i32, i32) {
    %c0_i32 = arith.constant 0 : i32
    return %arg0, %arg1 : i32, i32
  }
}

</mosaic_0001>

<bundles_post_ra>
// kernel: vae_forward.9
= control target key start
LH: loop header
LB: loop body
LE: loop exit
PB: predicated region body
PF: predicated region fallthrough
CT: control target
= control target key end

     0   :  { %s970_s12 = smov 0   ;;  %s972_s13 = smov 0   ;;  %s1120_s0 = inlined_call_operand.vmem [shape: bf16[512,128], index: 0, kind: input, shape index: {}]   ;;  %s1121_s1 = inlined_call_operand.vmem [shape: bf16[128,128], index: 1, kind: input, shape index: {}]   ;;  %s1122_s2 = inlined_call_operand.vmem [shape: f32[1,128], index: 2, kind: input, shape index: {}]   ;;  %s1123_s3 = inlined_call_operand.vmem [shape: f32[512,128], index: 3, kind: output, shape index: {}]  }
   0x1   :  { %s974_s14 = smov 0  }
   0x2 LB: > { %s25_s15 = sadd.s32 1, %s944_s13  ;;  %p758_p0 = scmp.ge.s32.totalorder %s948_s14, 1  ;;  %s948_s14 = sphi %s974_s14, %s13_s14   ;;  %s944_s13 = sphi %s972_s13, %s1125_s13   ;;  %s940_s12 = sphi %s970_s12, %s1124_s12  }
   0x3   : > { %p27_p1 = scmp.ge.s32.totalorder %s25_s15, 2  ;;  %p169_p2 = scmp.lt.s32.totalorder %s948_s14, 3 }
   0x5   : > { %s1127_s15 = smov (%p27_p1, %s25_s15), 0  ;;  %p170_p3 = pnand %p758_p0, %p169_p2 }
   0x6   : > { %s759_s18 = sshll.u32 (!%p170_p3), %s940_s12, 5 }
   0x7   : > { %173 = sbr.rel (%p170_p3) target bundleno = 273 (0x111), region = 32  ;;  %p204_p4 = scmp.lt.s32.totalorder (!%p170_p3), %s759_s18, 63 }
   0xc   : > { %v902_v0 = vld [vmem:[%s1121_s1 + $0x38] sm:$0xff]   ;;  %v903_v1 = vld [vmem:[%s1121_s1 + $0x30] sm:$0xff]   ;;  %s1129_s18 = smov (!%p204_p4, %s759_s18), 63  ;;  %v904_v2 = vld [vmem:[%s1121_s1 + $0x28] sm:$0xff]  }
   0xd   : > { %814 = vmatprep.subr.bf16.mxu0 %v902_v0  ;;  %862 = vmatprep.subr.bf16.mxu1 %v902_v0  ;;  %s760_s23 = sshll.u32 %s1129_s18, 2  ;;  %v905_v3 = vld [vmem:[%s1121_s1 + $0x20] sm:$0xff]   ;;  %v906_v6 = vld [vmem:[%s1121_s1 + $0x18] sm:$0xff]   ;;  %v907_v7 = vld [vmem:[%s1121_s1 + $0x10] sm:$0xff]   ;;  %s762_s12 = sshll.u32 %s1129_s18, 3 }
   0xe   : > { %815 = vmatpush3.bf16.msra.mxu0 %v902_v0  ;;  %870 = vmatpush3.bf16.msra.mxu1 %v902_v0  ;;  %s1003_s26 = scalar_lea.vmem %s1120_s0, %s760_s23  ;;  %v908_v8 = vld [vmem:[%s1121_s1 + $0x8] sm:$0xff]   ;;  %v909_v9 = vld [vmem:[%s1121_s1] sm:$0xff]   ;;  %s1047_s19 = scalar_lea.vmem %s1123_s3, %s762_s12 }
   0xf   : > { %816 = vmatprep.subr.bf16.mxu0 %v903_v1  ;;  %863 = vmatprep.subr.bf16.mxu1 %v903_v1  ;;  %v910_v4 = vld [vmem:[%s1003_s26] sm:$0xff]   ;;  %v912_v10 = vld [vmem:[%s1003_s26 + $0x8] sm:$0xff]   ;;  %v914_v12 = vld [vmem:[%s1003_s26 + $0x10] sm:$0xff]  }
  0x10   : > { %v911_v5 = vld [vmem:[%s1003_s26 + $0x40] sm:$0xff]   ;;  %830 = vmatprep.mubr.bf16.mxu0 %v910_v4  ;;  %v913_v11 = vld [vmem:[%s1003_s26 + $0x48] sm:$0xff]   ;;  %v915_v13 = vld [vmem:[%s1003_s26 + $0x50] sm:$0xff]  }
  0x11   : > { %846 = vmatprep.mubr.bf16.mxu1 %v911_v5  ;;  %v916_v14 = vld [vmem:[%s1003_s26 + $0x18] sm:$0xff]   ;;  %v918_v16 = vld [vmem:[%s1003_s26 + $0x20] sm:$0xff]   ;;  %v920_v18 = vld [vmem:[%s1003_s26 + $0x28] sm:$0xff]  }
  0x12   : > { %817 = vmatpush3.bf16.msra.mxu0 %v903_v1  ;;  %871 = vmatpush3.bf16.msra.mxu1 %v903_v1  ;;  %v917_v15 = vld [vmem:[%s1003_s26 + $0x58] sm:$0xff]   ;;  %v919_v17 = vld [vmem:[%s1003_s26 + $0x60] sm:$0xff]   ;;  %v921_v19 = vld [vmem:[%s1003_s26 + $0x68] sm:$0xff]  }
  0x13   : > { %818 = vmatprep.subr.bf16.mxu0 %v904_v2  ;;  %864 = vmatprep.subr.bf16.mxu1 %v904_v2  ;;  %v922_v20 = vld [vmem:[%s1003_s26 + $0x30] sm:$0xff]   ;;  %v924_v22 = vld [vmem:[%s1003_s26 + $0x38] sm:$0xff]   ;;  %v1039_v24 = vld [vmem:[%s1122_s2] ss:$0 sm:$0xff] }
  0x14   : > { %v923_v21 = vld [vmem:[%s1003_s26 + $0x70] sm:$0xff]   ;;  %v925_v23 = vld [vmem:[%s1003_s26 + $0x78] sm:$0xff]  }
  0x16   : > { %819 = vmatpush3.bf16.msra.mxu0 %v904_v2  ;;  %872 = vmatpush3.bf16.msra.mxu1 %v904_v2 }
  0x17   : > { %820 = vmatprep.subr.bf16.mxu0 %v905_v3  ;;  %865 = vmatprep.subr.bf16.mxu1 %v905_v3 }
  0x1a   : > { %821 = vmatpush3.bf16.msra.mxu0 %v905_v3  ;;  %873 = vmatpush3.bf16.msra.mxu1 %v905_v3 }
  0x1b   : > { %822 = vmatprep.subr.bf16.mxu0 %v906_v6  ;;  %866 = vmatprep.subr.bf16.mxu1 %v906_v6 }
  0x1e   : > { %823 = vmatpush3.bf16.msra.mxu0 %v906_v6  ;;  %874 = vmatpush3.bf16.msra.mxu1 %v906_v6 }
  0x1f   : > { %824 = vmatprep.subr.bf16.mxu0 %v907_v7  ;;  %867 = vmatprep.subr.bf16.mxu1 %v907_v7 }
  0x22   : > { %825 = vmatpush3.bf16.msra.mxu0 %v907_v7  ;;  %875 = vmatpush3.bf16.msra.mxu1 %v907_v7 }
  0x23   : > { %826 = vmatprep.subr.bf16.mxu0 %v908_v8  ;;  %868 = vmatprep.subr.bf16.mxu1 %v908_v8 }
  0x26   : > { %827 = vmatpush3.bf16.msra.mxu0 %v908_v8  ;;  %876 = vmatpush3.bf16.msra.mxu1 %v908_v8 }
  0x27   : > { %828 = vmatprep.subr.bf16.mxu0 %v909_v9  ;;  %869 = vmatprep.subr.bf16.mxu1 %v909_v9 }
  0x2a   : > { %829 = vmatpush3.bf16.msra.mxu0 %v909_v9  ;;  %877 = vmatpush3.bf16.msra.mxu1 %v909_v9 }
  0x2d   : > { %831 = vmatmul.mubr.bf16.vlgmr.msra.gmra.mxu0 %v912_v10  ;;  %847 = vmatmul.mubr.bf16.vlgmr.msra.gmra.mxu1 %v913_v11 }
  0x2e   : > { %834 = vmatprep.mubr.bf16.mxu0 %v914_v12  ;;  %850 = vmatprep.mubr.bf16.mxu1 %v915_v13 }
  0x35   : > { %835 = vmatmul.mubr.bf16.gmra.mxu0 %v916_v14  ;;  %851 = vmatmul.mubr.bf16.gmra.mxu1 %v917_v15 }
  0x36   : > { %838 = vmatprep.mubr.bf16.mxu0 %v918_v16  ;;  %854 = vmatprep.mubr.bf16.mxu1 %v919_v17 }
  0x3d   : > { %839 = vmatmul.mubr.bf16.gmra.mxu0 %v920_v18  ;;  %855 = vmatmul.mubr.bf16.gmra.mxu1 %v921_v19 }
  0x3e   : > { %842 = vmatprep.mubr.bf16.mxu0 %v922_v20  ;;  %858 = vmatprep.mubr.bf16.mxu1 %v923_v21 }
  0x45   : > { %843 = vmatmul.mubr.bf16.gmra.mxu0 %v924_v22  ;;  %859 = vmatmul.mubr.bf16.gmra.mxu1 %v925_v23 }
  0xed   : > { %v832_v25 = vpop.f32.mrf.mxu0  ;;  %v848_v26 = vpop.f32.mrf.mxu1 }
  0xee   : > { %v468_v27 = vadd.f32 %v832_v25, %v1039_v24  ;;  %v532_v28 = vadd.f32 %v848_v26, %v1039_v24 }
  0xef   : > { %v459_v29 = vpop.f32.mrf.mxu0  ;;  %v523_v30 = vpop.f32.mrf.mxu1 }
  0xf0   : > { %v588_v31 = vmax.f32 %v468_v27, 0.0  ;;  %v604_v32 = vmax.f32 %v532_v28, 0.0  ;;  %v460_v33 = vadd.f32 %v1039_v24, %v459_v29  ;;  %v524_v34 = vadd.f32 %v1039_v24, %v523_v30 }
  0xf1   : > { %v833_v35 = vpop.f32.mrf.mxu0  ;;  %v849_v36 = vpop.f32.mrf.mxu1 }
  0xf2   : > { %620 = vst [vmem:[%s1047_s19 + $0x10] sm:$0xff] %v588_v31  ;;  %636 = vst [vmem:[%s1047_s19 + $0x90] sm:$0xff] %v604_v32  ;;  %v586_v37 = vmax.f32 %v460_v33, 0.0  ;;  %v602_v38 = vmax.f32 %v524_v34, 0.0  ;;  %v471_v39 = vadd.f32 %v833_v35, %v1039_v24  ;;  %v535_v40 = vadd.f32 %v849_v36, %v1039_v24 }
  0xf3   : > { %v462_v41 = vpop.f32.mrf.mxu0  ;;  %v526_v42 = vpop.f32.mrf.mxu1 }
  0xf4   : > { %618 = vst [vmem:[%s1047_s19] sm:$0xff] %v586_v37  ;;  %634 = vst [vmem:[%s1047_s19 + $0x80] sm:$0xff] %v602_v38  ;;  %v589_v43 = vmax.f32 %v471_v39, 0.0  ;;  %v605_v44 = vmax.f32 %v535_v40, 0.0  ;;  %v463_v45 = vadd.f32 %v1039_v24, %v462_v41  ;;  %v527_v46 = vadd.f32 %v1039_v24, %v526_v42 }
  0xf5   : > { %v836_v47 = vpop.f32.mrf.mxu0  ;;  %v852_v48 = vpop.f32.mrf.mxu1 }
  0xf6   : > { %621 = vst [vmem:[%s1047_s19 + $0x18] sm:$0xff] %v589_v43  ;;  %637 = vst [vmem:[%s1047_s19 + $0x98] sm:$0xff] %v605_v44  ;;  %v587_v49 = vmax.f32 %v463_v45, 0.0  ;;  %v603_v50 = vmax.f32 %v527_v46, 0.0  ;;  %v484_v51 = vadd.f32 %v836_v47, %v1039_v24  ;;  %v548_v52 = vadd.f32 %v852_v48, %v1039_v24 }
  0xf7   : > { %v475_v53 = vpop.f32.mrf.mxu0  ;;  %v539_v54 = vpop.f32.mrf.mxu1 }
  0xf8   : > { %619 = vst [vmem:[%s1047_s19 + $0x8] sm:$0xff] %v587_v49  ;;  %635 = vst [vmem:[%s1047_s19 + $0x88] sm:$0xff] %v603_v50  ;;  %v592_v55 = vmax.f32 %v484_v51, 0.0  ;;  %v608_v56 = vmax.f32 %v548_v52, 0.0  ;;  %v476_v57 = vadd.f32 %v1039_v24, %v475_v53  ;;  %v540_v58 = vadd.f32 %v1039_v24, %v539_v54 }
  0xf9   : > { %v837_v59 = vpop.f32.mrf.mxu0  ;;  %v853_v60 = vpop.f32.mrf.mxu1 }
  0xfa   : > { %624 = vst [vmem:[%s1047_s19 + $0x30] sm:$0xff] %v592_v55  ;;  %640 = vst [vmem:[%s1047_s19 + $0xb0] sm:$0xff] %v608_v56  ;;  %v590_v61 = vmax.f32 %v476_v57, 0.0  ;;  %v606_v62 = vmax.f32 %v540_v58, 0.0  ;;  %v487_v63 = vadd.f32 %v837_v59, %v1039_v24  ;;  %v551_v0 = vadd.f32 %v853_v60, %v1039_v24 }
  0xfb   : > { %v478_v1 = vpop.f32.mrf.mxu0  ;;  %v542_v2 = vpop.f32.mrf.mxu1 }
  0xfc   : > { %622 = vst [vmem:[%s1047_s19 + $0x20] sm:$0xff] %v590_v61  ;;  %638 = vst [vmem:[%s1047_s19 + $0xa0] sm:$0xff] %v606_v62  ;;  %v593_v3 = vmax.f32 %v487_v63, 0.0  ;;  %v609_v4 = vmax.f32 %v551_v0, 0.0  ;;  %v479_v5 = vadd.f32 %v1039_v24, %v478_v1  ;;  %v543_v6 = vadd.f32 %v1039_v24, %v542_v2 }
  0xfd   : > { %v840_v7 = vpop.f32.mrf.mxu0  ;;  %v856_v8 = vpop.f32.mrf.mxu1 }
  0xfe   : > { %625 = vst [vmem:[%s1047_s19 + $0x38] sm:$0xff] %v593_v3  ;;  %641 = vst [vmem:[%s1047_s19 + $0xb8] sm:$0xff] %v609_v4  ;;  %v591_v9 = vmax.f32 %v479_v5, 0.0  ;;  %v607_v10 = vmax.f32 %v543_v6, 0.0  ;;  %v500_v11 = vadd.f32 %v840_v7, %v1039_v24  ;;  %v564_v12 = vadd.f32 %v856_v8, %v1039_v24 }
  0xff   : > { %v491_v13 = vpop.f32.mrf.mxu0  ;;  %v555_v14 = vpop.f32.mrf.mxu1 }
 0x100   : > { %623 = vst [vmem:[%s1047_s19 + $0x28] sm:$0xff] %v591_v9  ;;  %639 = vst [vmem:[%s1047_s19 + $0xa8] sm:$0xff] %v607_v10  ;;  %v596_v15 = vmax.f32 %v500_v11, 0.0  ;;  %v612_v16 = vmax.f32 %v564_v12, 0.0  ;;  %v492_v17 = vadd.f32 %v1039_v24, %v491_v13  ;;  %v556_v18 = vadd.f32 %v1039_v24, %v555_v14 }
 0x101   : > { %v841_v19 = vpop.f32.mrf.mxu0  ;;  %v857_v20 = vpop.f32.mrf.mxu1 }
 0x102   : > { %628 = vst [vmem:[%s1047_s19 + $0x50] sm:$0xff] %v596_v15  ;;  %644 = vst [vmem:[%s1047_s19 + $0xd0] sm:$0xff] %v612_v16  ;;  %v594_v21 = vmax.f32 %v492_v17, 0.0  ;;  %v610_v22 = vmax.f32 %v556_v18, 0.0  ;;  %v503_v23 = vadd.f32 %v841_v19, %v1039_v24  ;;  %v567_v25 = vadd.f32 %v857_v20, %v1039_v24 }
 0x103   : > { %v494_v26 = vpop.f32.mrf.mxu0  ;;  %v558_v27 = vpop.f32.mrf.mxu1 }
 0x104   : > { %626 = vst [vmem:[%s1047_s19 + $0x40] sm:$0xff] %v594_v21  ;;  %642 = vst [vmem:[%s1047_s19 + $0xc0] sm:$0xff] %v610_v22  ;;  %v597_v28 = vmax.f32 %v503_v23, 0.0  ;;  %v613_v29 = vmax.f32 %v567_v25, 0.0  ;;  %v495_v30 = vadd.f32 %v1039_v24, %v494_v26  ;;  %v559_v31 = vadd.f32 %v1039_v24, %v558_v27 }
 0x105   : > { %v844_v32 = vpop.f32.mrf.mxu0  ;;  %v860_v33 = vpop.f32.mrf.mxu1 }
 0x106   : > { %629 = vst [vmem:[%s1047_s19 + $0x58] sm:$0xff] %v597_v28  ;;  %645 = vst [vmem:[%s1047_s19 + $0xd8] sm:$0xff] %v613_v29  ;;  %v595_v34 = vmax.f32 %v495_v30, 0.0  ;;  %v611_v35 = vmax.f32 %v559_v31, 0.0  ;;  %v516_v36 = vadd.f32 %v844_v32, %v1039_v24  ;;  %v580_v37 = vadd.f32 %v860_v33, %v1039_v24 }
 0x107   : > { %v507_v38 = vpop.f32.mrf.mxu0  ;;  %v571_v39 = vpop.f32.mrf.mxu1 }
 0x108   : > { %627 = vst [vmem:[%s1047_s19 + $0x48] sm:$0xff] %v595_v34  ;;  %643 = vst [vmem:[%s1047_s19 + $0xc8] sm:$0xff] %v611_v35  ;;  %v600_v40 = vmax.f32 %v516_v36, 0.0  ;;  %v616_v41 = vmax.f32 %v580_v37, 0.0  ;;  %v508_v42 = vadd.f32 %v1039_v24, %v507_v38  ;;  %v572_v43 = vadd.f32 %v1039_v24, %v571_v39 }
 0x109   : > { %v845_v44 = vpop.f32.mrf.mxu0  ;;  %v861_v45 = vpop.f32.mrf.mxu1 }
 0x10a   : > { %632 = vst [vmem:[%s1047_s19 + $0x70] sm:$0xff] %v600_v40  ;;  %648 = vst [vmem:[%s1047_s19 + $0xf0] sm:$0xff] %v616_v41  ;;  %v598_v46 = vmax.f32 %v508_v42, 0.0  ;;  %v614_v47 = vmax.f32 %v572_v43, 0.0  ;;  %v519_v48 = vadd.f32 %v845_v44, %v1039_v24  ;;  %v583_v49 = vadd.f32 %v861_v45, %v1039_v24 }
 0x10b   : > { %v510_v50 = vpop.f32.mrf.mxu0  ;;  %v574_v51 = vpop.f32.mrf.mxu1 }
 0x10c   : > { %630 = vst [vmem:[%s1047_s19 + $0x60] sm:$0xff] %v598_v46  ;;  %646 = vst [vmem:[%s1047_s19 + $0xe0] sm:$0xff] %v614_v47  ;;  %v601_v52 = vmax.f32 %v519_v48, 0.0  ;;  %v617_v53 = vmax.f32 %v583_v49, 0.0  ;;  %v511_v54 = vadd.f32 %v1039_v24, %v510_v50  ;;  %v575_v55 = vadd.f32 %v1039_v24, %v574_v51 }
 0x10e   : > { %633 = vst [vmem:[%s1047_s19 + $0x78] sm:$0xff] %v601_v52  ;;  %649 = vst [vmem:[%s1047_s19 + $0xf8] sm:$0xff] %v617_v53  ;;  %v599_v56 = vmax.f32 %v511_v54, 0.0  ;;  %v615_v57 = vmax.f32 %v575_v55, 0.0 }
 0x110   : > { %631 = vst [vmem:[%s1047_s19 + $0x68] sm:$0xff] %v599_v56  ;;  %647 = vst [vmem:[%s1047_s19 + $0xe8] sm:$0xff] %v615_v57 }
 0x111 PF: > { %s13_s14 = sadd.s32 1, %s948_s14   ;;  %s1124_s12 = smov %s944_s13 }
 0x112   : > { %p10_p5 = scmp.ge.s32.totalorder %s13_s14, 4   ;;  %s1125_s13 = smov %s1127_s15 }
 0x114   :  { %12 = sbr.rel (!%p10_p5) target bundleno = 2 (0x2), region = 68 }

// kernel: vae_forward.10
= control target key start
LH: loop header
LB: loop body
LE: loop exit
PB: predicated region body
PF: predicated region fallthrough
CT: control target
= control target key end

     0   :  { %s499_s1 = inlined_call_operand.vmem [shape: bf16[128,128], index: 1, kind: input, shape index: {}]   ;;  %s500_s0 = inlined_call_operand.vmem [shape: bf16[128,128], index: 0, kind: input, shape index: {}]   ;;  %s501_s2 = inlined_call_operand.vmem [shape: f32[1,128], index: 2, kind: input, shape index: {}]   ;;  %s502_s3 = inlined_call_operand.vmem [shape: f32[128,128], index: 3, kind: output, shape index: {}]  }
   0x1   :  { %v364_v0 = vld [vmem:[%s499_s1 + $0x38] sm:$0xff]   ;;  %v365_v1 = vld [vmem:[%s499_s1 + $0x30] sm:$0xff]   ;;  %v366_v2 = vld [vmem:[%s499_s1 + $0x28] sm:$0xff]  }
   0x2   :  { %316 = vmatprep.subr.bf16.mxu0 %v364_v0  ;;  %348 = vmatprep.subr.bf16.mxu1 %v364_v0  ;;  %v367_v3 = vld [vmem:[%s499_s1 + $0x20] sm:$0xff]   ;;  %v368_v6 = vld [vmem:[%s499_s1 + $0x18] sm:$0xff]   ;;  %v369_v7 = vld [vmem:[%s499_s1 + $0x10] sm:$0xff]  }
   0x3   :  { %317 = vmatpush3.bf16.msra.mxu0 %v364_v0  ;;  %356 = vmatpush3.bf16.msra.mxu1 %v364_v0  ;;  %v372_v4 = vld [vmem:[%s500_s0] sm:$0xff]   ;;  %v370_v8 = vld [vmem:[%s499_s1 + $0x8] sm:$0xff]   ;;  %v376_v12 = vld [vmem:[%s500_s0 + $0x10] sm:$0xff]  }
   0x4   :  { %318 = vmatprep.subr.bf16.mxu0 %v365_v1  ;;  %349 = vmatprep.subr.bf16.mxu1 %v365_v1  ;;  %v373_v5 = vld [vmem:[%s500_s0 + $0x20] sm:$0xff]   ;;  %v374_v10 = vld [vmem:[%s500_s0 + $0x8] sm:$0xff]   ;;  %v377_v13 = vld [vmem:[%s500_s0 + $0x30] sm:$0xff]  }
   0x5   :  { %332 = vmatprep.mubr.bf16.mxu0 %v372_v4  ;;  %340 = vmatprep.mubr.bf16.mxu1 %v373_v5  ;;  %v371_v9 = vld [vmem:[%s499_s1] sm:$0xff]   ;;  %v375_v11 = vld [vmem:[%s500_s0 + $0x28] sm:$0xff]   ;;  %v378_v14 = vld [vmem:[%s500_s0 + $0x18] sm:$0xff]  }
   0x6   :  { %v379_v15 = vld [vmem:[%s500_s0 + $0x38] sm:$0xff]   ;;  %v283_v16 = vld [vmem:[%s501_s2] ss:$0 sm:$0xff] }
   0x7   :  { %319 = vmatpush3.bf16.msra.mxu0 %v365_v1  ;;  %357 = vmatpush3.bf16.msra.mxu1 %v365_v1 }
   0x8   :  { %320 = vmatprep.subr.bf16.mxu0 %v366_v2  ;;  %350 = vmatprep.subr.bf16.mxu1 %v366_v2 }
   0xb   :  { %321 = vmatpush3.bf16.msra.mxu0 %v366_v2  ;;  %358 = vmatpush3.bf16.msra.mxu1 %v366_v2 }
   0xc   :  { %322 = vmatprep.subr.bf16.mxu0 %v367_v3  ;;  %351 = vmatprep.subr.bf16.mxu1 %v367_v3 }
   0xf   :  { %323 = vmatpush3.bf16.msra.mxu0 %v367_v3  ;;  %359 = vmatpush3.bf16.msra.mxu1 %v367_v3 }
  0x10   :  { %324 = vmatprep.subr.bf16.mxu0 %v368_v6  ;;  %352 = vmatprep.subr.bf16.mxu1 %v368_v6 }
  0x13   :  { %325 = vmatpush3.bf16.msra.mxu0 %v368_v6  ;;  %360 = vmatpush3.bf16.msra.mxu1 %v368_v6 }
  0x14   :  { %326 = vmatprep.subr.bf16.mxu0 %v369_v7  ;;  %353 = vmatprep.subr.bf16.mxu1 %v369_v7 }
  0x17   :  { %327 = vmatpush3.bf16.msra.mxu0 %v369_v7  ;;  %361 = vmatpush3.bf16.msra.mxu1 %v369_v7 }
  0x18   :  { %328 = vmatprep.subr.bf16.mxu0 %v370_v8  ;;  %354 = vmatprep.subr.bf16.mxu1 %v370_v8 }
  0x1b   :  { %329 = vmatpush3.bf16.msra.mxu0 %v370_v8  ;;  %362 = vmatpush3.bf16.msra.mxu1 %v370_v8 }
  0x1c   :  { %330 = vmatprep.subr.bf16.mxu0 %v371_v9  ;;  %355 = vmatprep.subr.bf16.mxu1 %v371_v9 }
  0x1f   :  { %331 = vmatpush3.bf16.msra.mxu0 %v371_v9  ;;  %363 = vmatpush3.bf16.msra.mxu1 %v371_v9 }
  0x22   :  { %333 = vmatmul.mubr.bf16.vlgmr.msra.gmra.mxu0 %v374_v10  ;;  %341 = vmatmul.mubr.bf16.vlgmr.msra.gmra.mxu1 %v375_v11 }
  0x23   :  { %336 = vmatprep.mubr.bf16.mxu0 %v376_v12  ;;  %344 = vmatprep.mubr.bf16.mxu1 %v377_v13 }
  0x2a   :  { %337 = vmatmul.mubr.bf16.gmra.mxu0 %v378_v14  ;;  %345 = vmatmul.mubr.bf16.gmra.mxu1 %v379_v15 }
  0xe2   :  { %v334_v17 = vpop.f32.mrf.mxu0  ;;  %v342_v18 = vpop.f32.mrf.mxu1 }
  0xe3   :  { %v193_v19 = vadd.f32 %v334_v17, %v283_v16  ;;  %v225_v20 = vadd.f32 %v342_v18, %v283_v16 }
  0xe4   :  { %v184_v21 = vpop.f32.mrf.mxu0  ;;  %v216_v22 = vpop.f32.mrf.mxu1 }
  0xe5   :  { %v249_v23 = vmax.f32 %v193_v19, 0.0  ;;  %v257_v24 = vmax.f32 %v225_v20, 0.0  ;;  %v185_v25 = vadd.f32 %v283_v16, %v184_v21  ;;  %v217_v26 = vadd.f32 %v283_v16, %v216_v22 }
  0xe6   :  { %v335_v27 = vpop.f32.mrf.mxu0  ;;  %v343_v28 = vpop.f32.mrf.mxu1 }
  0xe7   :  { %265 = vst [vmem:[%s502_s3 + $0x10] sm:$0xff] %v249_v23  ;;  %273 = vst [vmem:[%s502_s3 + $0x50] sm:$0xff] %v257_v24  ;;  %v247_v29 = vmax.f32 %v185_v25, 0.0  ;;  %v255_v30 = vmax.f32 %v217_v26, 0.0  ;;  %v196_v31 = vadd.f32 %v335_v27, %v283_v16  ;;  %v228_v32 = vadd.f32 %v343_v28, %v283_v16 }
  0xe8   :  { %v187_v33 = vpop.f32.mrf.mxu0  ;;  %v219_v34 = vpop.f32.mrf.mxu1 }
  0xe9   :  { %263 = vst [vmem:[%s502_s3] sm:$0xff] %v247_v29  ;;  %271 = vst [vmem:[%s502_s3 + $0x40] sm:$0xff] %v255_v30  ;;  %v250_v35 = vmax.f32 %v196_v31, 0.0  ;;  %v258_v36 = vmax.f32 %v228_v32, 0.0  ;;  %v188_v37 = vadd.f32 %v283_v16, %v187_v33  ;;  %v220_v38 = vadd.f32 %v283_v16, %v219_v34 }
  0xea   :  { %v338_v39 = vpop.f32.mrf.mxu0  ;;  %v346_v40 = vpop.f32.mrf.mxu1 }
  0xeb   :  { %266 = vst [vmem:[%s502_s3 + $0x18] sm:$0xff] %v250_v35  ;;  %274 = vst [vmem:[%s502_s3 + $0x58] sm:$0xff] %v258_v36  ;;  %v248_v41 = vmax.f32 %v188_v37, 0.0  ;;  %v256_v42 = vmax.f32 %v220_v38, 0.0  ;;  %v209_v43 = vadd.f32 %v338_v39, %v283_v16  ;;  %v241_v44 = vadd.f32 %v346_v40, %v283_v16 }
  0xec   :  { %v200_v45 = vpop.f32.mrf.mxu0  ;;  %v232_v46 = vpop.f32.mrf.mxu1 }
  0xed   :  { %264 = vst [vmem:[%s502_s3 + $0x8] sm:$0xff] %v248_v41  ;;  %272 = vst [vmem:[%s502_s3 + $0x48] sm:$0xff] %v256_v42  ;;  %v253_v47 = vmax.f32 %v209_v43, 0.0  ;;  %v261_v48 = vmax.f32 %v241_v44, 0.0  ;;  %v201_v49 = vadd.f32 %v283_v16, %v200_v45  ;;  %v233_v50 = vadd.f32 %v283_v16, %v232_v46 }
  0xee   :  { %v339_v51 = vpop.f32.mrf.mxu0  ;;  %v347_v52 = vpop.f32.mrf.mxu1 }
  0xef   :  { %269 = vst [vmem:[%s502_s3 + $0x30] sm:$0xff] %v253_v47  ;;  %277 = vst [vmem:[%s502_s3 + $0x70] sm:$0xff] %v261_v48  ;;  %v251_v53 = vmax.f32 %v201_v49, 0.0  ;;  %v259_v54 = vmax.f32 %v233_v50, 0.0  ;;  %v212_v55 = vadd.f32 %v339_v51, %v283_v16  ;;  %v244_v56 = vadd.f32 %v347_v52, %v283_v16 }
  0xf0   :  { %v203_v57 = vpop.f32.mrf.mxu0  ;;  %v235_v58 = vpop.f32.mrf.mxu1 }
  0xf1   :  { %267 = vst [vmem:[%s502_s3 + $0x20] sm:$0xff] %v251_v53  ;;  %275 = vst [vmem:[%s502_s3 + $0x60] sm:$0xff] %v259_v54  ;;  %v254_v59 = vmax.f32 %v212_v55, 0.0  ;;  %v262_v60 = vmax.f32 %v244_v56, 0.0  ;;  %v204_v61 = vadd.f32 %v283_v16, %v203_v57  ;;  %v236_v62 = vadd.f32 %v283_v16, %v235_v58 }
  0xf3   :  { %270 = vst [vmem:[%s502_s3 + $0x38] sm:$0xff] %v254_v59  ;;  %278 = vst [vmem:[%s502_s3 + $0x78] sm:$0xff] %v262_v60  ;;  %v252_v63 = vmax.f32 %v204_v61, 0.0  ;;  %v260_v0 = vmax.f32 %v236_v62, 0.0 }
  0xf5   :  { %268 = vst [vmem:[%s502_s3 + $0x28] sm:$0xff] %v252_v63  ;;  %276 = vst [vmem:[%s502_s3 + $0x68] sm:$0xff] %v260_v0 }

// kernel: vae_forward.11
= control target key start
LH: loop header
LB: loop body
LE: loop exit
PB: predicated region body
PF: predicated region fallthrough
CT: control target
= control target key end

     0   :  { %s417_s1 = inlined_call_operand.vmem [shape: bf16[256,128], index: 1, kind: input, shape index: {}]   ;;  %s418_s0 = inlined_call_operand.vmem [shape: bf16[32,256], index: 0, kind: input, shape index: {}]   ;;  %s419_s2 = inlined_call_operand.vmem [shape: f32[1,128], index: 2, kind: input, shape index: {}]   ;;  %s420_s3 = inlined_call_operand.vmem [shape: f32[32,128], index: 3, kind: output, shape index: {}]  }
   0x1   :  { %v300_v0 = vld [vmem:[%s417_s1 + $0x78] sm:$0xff]   ;;  %v302_v2 = vld [vmem:[%s417_s1 + $0x70] sm:$0xff]   ;;  %v304_v4 = vld [vmem:[%s417_s1 + $0x68] sm:$0xff]  }
   0x2   :  { %v301_v1 = vld [vmem:[%s417_s1 + $0x38] sm:$0xff]   ;;  %256 = vmatprep.subr.bf16.mxu0 %v300_v0  ;;  %284 = vmatprep.subr.bf16.mxu1 %v300_v0  ;;  %v303_v3 = vld [vmem:[%s417_s1 + $0x30] sm:$0xff]   ;;  %v305_v5 = vld [vmem:[%s417_s1 + $0x28] sm:$0xff]  }
   0x3   :  { %257 = vmatpush3.bf16.msra.mxu0 %v301_v1  ;;  %292 = vmatpush3.bf16.msra.mxu1 %v301_v1  ;;  %v306_v6 = vld [vmem:[%s417_s1 + $0x60] sm:$0xff]   ;;  %v308_v8 = vld [vmem:[%s417_s1 + $0x58] sm:$0xff]   ;;  %v310_v10 = vld [vmem:[%s417_s1 + $0x50] sm:$0xff]  }
   0x4   :  { %258 = vmatprep.subr.bf16.mxu0 %v302_v2  ;;  %285 = vmatprep.subr.bf16.mxu1 %v302_v2  ;;  %v307_v7 = vld [vmem:[%s417_s1 + $0x20] sm:$0xff]   ;;  %v309_v9 = vld [vmem:[%s417_s1 + $0x18] sm:$0xff]   ;;  %v311_v13 = vld [vmem:[%s417_s1 + $0x10] sm:$0xff]  }
   0x5   :  { %v318_v11 = vld [vmem:[%s418_s0 + $0x4] ss:$8 sps:$4 sm:$0xff]   ;;  %v321_v12 = vld [vmem:[%s418_s0 + $0x14] ss:$8 sps:$4 sm:$0xff]   ;;  %v316_v18 = vld [vmem:[%s418_s0] ss:$8 sps:$4 sm:$0xff]  }
   0x6   :  { %v312_v14 = vld [vmem:[%s417_s1 + $0x48] sm:$0xff]   ;;  %206 = vmatprep.mubr.bf16.mxu0 %v318_v11  ;;  %214 = vmatprep.mubr.bf16.mxu1 %v321_v12  ;;  %v314_v16 = vld [vmem:[%s417_s1 + $0x40] sm:$0xff]   ;;  %v319_v19 = vld [vmem:[%s418_s0 + $0x10] ss:$8 sps:$4 sm:$0xff]  }
   0x7   :  { %259 = vmatpush3.bf16.msra.mxu0 %v303_v3  ;;  %293 = vmatpush3.bf16.msra.mxu1 %v303_v3  ;;  %v313_v15 = vld [vmem:[%s417_s1 + $0x8] sm:$0xff]   ;;  %v315_v17 = vld [vmem:[%s417_s1] sm:$0xff]  }
   0x8   :  { %260 = vmatprep.subr.bf16.mxu0 %v304_v4  ;;  %286 = vmatprep.subr.bf16.mxu1 %v304_v4  ;;  %v235_v22 = vld [vmem:[%s419_s2] ss:$0 sm:$0xff] }
   0xb   :  { %261 = vmatpush3.bf16.msra.mxu0 %v305_v5  ;;  %294 = vmatpush3.bf16.msra.mxu1 %v305_v5 }
   0xc   :  { %262 = vmatprep.subr.bf16.mxu0 %v306_v6  ;;  %287 = vmatprep.subr.bf16.mxu1 %v306_v6 }
   0xf   :  { %263 = vmatpush3.bf16.msra.mxu0 %v307_v7  ;;  %295 = vmatpush3.bf16.msra.mxu1 %v307_v7 }
  0x10   :  { %264 = vmatprep.subr.bf16.mxu0 %v308_v8  ;;  %288 = vmatprep.subr.bf16.mxu1 %v308_v8 }
  0x13   :  { %265 = vmatpush3.bf16.msra.mxu0 %v309_v9  ;;  %296 = vmatpush3.bf16.msra.mxu1 %v309_v9 }
  0x14   :  { %266 = vmatprep.subr.bf16.mxu0 %v310_v10  ;;  %289 = vmatprep.subr.bf16.mxu1 %v310_v10 }
  0x17   :  { %267 = vmatpush3.bf16.msra.mxu0 %v311_v13  ;;  %297 = vmatpush3.bf16.msra.mxu1 %v311_v13 }
  0x18   :  { %268 = vmatprep.subr.bf16.mxu0 %v312_v14  ;;  %290 = vmatprep.subr.bf16.mxu1 %v312_v14 }
  0x1b   :  { %269 = vmatpush3.bf16.msra.mxu0 %v313_v15  ;;  %298 = vmatpush3.bf16.msra.mxu1 %v313_v15 }
  0x1c   :  { %270 = vmatprep.subr.bf16.mxu0 %v314_v16  ;;  %291 = vmatprep.subr.bf16.mxu1 %v314_v16 }
  0x1f   :  { %271 = vmatpush3.bf16.msra.mxu0 %v315_v17  ;;  %299 = vmatpush3.bf16.msra.mxu1 %v315_v17 }
  0x22   :  { %207 = vmatmul.mubr.bf16.vlgmr.msra.gmra.mxu0 %v316_v18  ;;  %215 = vmatmul.mubr.bf16.vlgmr.msra.gmra.mxu1 %v319_v19 }
  0xe2   :  { %v272_v20 = vpop.f32.mrf.mxu0  ;;  %v278_v21 = vpop.f32.mrf.mxu1 }
  0xe4   :  { %v273_v23 = vpop.f32.mrf.mxu0  ;;  %v279_v24 = vpop.f32.mrf.mxu1 }
  0xe5   :  { %v274_v25 = vadd.f32 %v273_v23, %v272_v20  ;;  %v280_v26 = vadd.f32 %v279_v24, %v278_v21 }
  0xe6   :  { %v275_v27 = vpop.f32.mrf.mxu0  ;;  %v281_v28 = vpop.f32.mrf.mxu1 }
  0xe7   :  { %v209_v29 = vadd.f32 %v274_v25, %v235_v22  ;;  %v217_v30 = vadd.f32 %v280_v26, %v235_v22 }
  0xe8   :  { %v276_v31 = vpop.f32.mrf.mxu0  ;;  %v282_v32 = vpop.f32.mrf.mxu1 }
  0xe9   :  { %v223_v33 = vmax.f32 %v209_v29, 0.0  ;;  %v225_v34 = vmax.f32 %v217_v30, 0.0  ;;  %v277_v35 = vadd.f32 %v276_v31, %v275_v27  ;;  %v283_v36 = vadd.f32 %v282_v32, %v281_v28 }
  0xeb   :  { %227 = vst [vmem:[%s420_s3] sm:$0xff] %v223_v33  ;;  %229 = vst [vmem:[%s420_s3 + $0x10] sm:$0xff] %v225_v34  ;;  %v212_v37 = vadd.f32 %v277_v35, %v235_v22  ;;  %v220_v38 = vadd.f32 %v283_v36, %v235_v22 }
  0xed   :  { %v224_v39 = vmax.f32 %v212_v37, 0.0  ;;  %v226_v40 = vmax.f32 %v220_v38, 0.0 }
  0xef   :  { %228 = vst [vmem:[%s420_s3 + $0x8] sm:$0xff] %v224_v39  ;;  %230 = vst [vmem:[%s420_s3 + $0x18] sm:$0xff] %v226_v40 }

// kernel: vae_forward.12
= control target key start
LH: loop header
LB: loop body
LE: loop exit
PB: predicated region body
PF: predicated region fallthrough
CT: control target
= control target key end

     0   :  { %s610_s1 = inlined_call_operand.vmem [shape: bf16[384,128], index: 1, kind: input, shape index: {}]   ;;  %s611_s0 = inlined_call_operand.vmem [shape: bf16[32,384], index: 0, kind: input, shape index: {}]   ;;  %s612_s2 = inlined_call_operand.vmem [shape: f32[1,128], index: 2, kind: input, shape index: {}]   ;;  %s613_s3 = inlined_call_operand.vmem [shape: f32[32,128], index: 3, kind: output, shape index: {}]  }
   0x1   :  { %v453_v0 = vld [vmem:[%s610_s1 + $0x78] sm:$0xff]   ;;  %v455_v2 = vld [vmem:[%s610_s1 + $0x70] sm:$0xff]   ;;  %v458_v5 = vld [vmem:[%s610_s1 + $0x68] sm:$0xff]  }
   0x2   :  { %v454_v1 = vld [vmem:[%s610_s1 + $0x38] sm:$0xff]   ;;  %395 = vmatprep.subr.bf16.mxu0 %v453_v0  ;;  %v457_v4 = vld [vmem:[%s610_s1 + $0x30] sm:$0xff]   ;;  %v460_v7 = vld [vmem:[%s610_s1 + $0x28] sm:$0xff]  }
   0x3   :  { %396 = vmatpush3.bf16.msra.mxu0 %v454_v1  ;;  %v456_v3 = vld [vmem:[%s610_s1 + $0xb8] sm:$0xff]   ;;  %v459_v6 = vld [vmem:[%s610_s1 + $0xb0] sm:$0xff]   ;;  %v461_v8 = vld [vmem:[%s610_s1 + $0x60] sm:$0xff]  }
   0x4   :  { %397 = vmatprep.subr.bf16.mxu0 %v455_v2  ;;  %433 = vmatprep.subr.bf16.mxu1 %v456_v3  ;;  %v462_v9 = vld [vmem:[%s610_s1 + $0xa8] sm:$0xff]   ;;  %v463_v10 = vld [vmem:[%s610_s1 + $0x20] sm:$0xff]   ;;  %v464_v11 = vld [vmem:[%s610_s1 + $0x58] sm:$0xff]  }
   0x5   :  { %434 = vmatpush3.bf16.msra.mxu1 %v456_v3  ;;  %v465_v12 = vld [vmem:[%s610_s1 + $0xa0] sm:$0xff]   ;;  %v466_v13 = vld [vmem:[%s610_s1 + $0x18] sm:$0xff]   ;;  %v467_v15 = vld [vmem:[%s610_s1 + $0x50] sm:$0xff]  }
   0x6   :  { %435 = vmatprep.subr.bf16.mxu1 %v459_v6  ;;  %v468_v14 = vld [vmem:[%s610_s1 + $0x98] sm:$0xff]   ;;  %v469_v16 = vld [vmem:[%s610_s1 + $0x10] sm:$0xff]   ;;  %v470_v18 = vld [vmem:[%s610_s1 + $0x48] sm:$0xff]  }
   0x7   :  { %398 = vmatpush3.bf16.msra.mxu0 %v457_v4  ;;  %v471_v17 = vld [vmem:[%s610_s1 + $0x90] sm:$0xff]   ;;  %v472_v19 = vld [vmem:[%s610_s1 + $0x8] sm:$0xff]   ;;  %v473_v20 = vld [vmem:[%s610_s1 + $0x40] sm:$0xff]  }
   0x8   :  { %399 = vmatprep.subr.bf16.mxu0 %v458_v5  ;;  %v474_v21 = vld [vmem:[%s610_s1 + $0x88] sm:$0xff]   ;;  %v478_v22 = vld [vmem:[%s611_s0 + $0x4] ss:$12 sps:$4 sm:$0xff]   ;;  %v364_v32 = vld [vmem:[%s612_s2] ss:$0 sm:$0xff] }
   0x9   :  { %436 = vmatpush3.bf16.msra.mxu1 %v459_v6  ;;  %v475_v23 = vld [vmem:[%s610_s1] sm:$0xff]   ;;  %286 = vmatprep.mubr.bf16.mxu0 %v478_v22  ;;  %v480_v24 = vld [vmem:[%s611_s0 + $0x8] ss:$12 sps:$4 sm:$0xff]  }
   0xa   :  { %437 = vmatprep.subr.bf16.mxu1 %v462_v9  ;;  %v479_v25 = vld [vmem:[%s610_s1 + $0x80] sm:$0xff]   ;;  %449 = vmatprep.mubr.bf16.mxu1 %v480_v24  ;;  %v482_v27 = vld [vmem:[%s611_s0 + $0x1c] ss:$12 sps:$4 sm:$0xff]  }
   0xb   :  { %400 = vmatpush3.bf16.msra.mxu0 %v460_v7  ;;  %v476_v26 = vld [vmem:[%s611_s0] ss:$12 sps:$4 sm:$0xff]   ;;  %v484_v29 = vld [vmem:[%s611_s0 + $0x18] ss:$12 sps:$4 sm:$0xff]  }
   0xc   :  { %401 = vmatprep.subr.bf16.mxu0 %v461_v8  ;;  %v481_v28 = vld [vmem:[%s611_s0 + $0x20] ss:$12 sps:$4 sm:$0xff]  }
   0xd   :  { %438 = vmatpush3.bf16.msra.mxu1 %v462_v9 }
   0xe   :  { %439 = vmatprep.subr.bf16.mxu1 %v465_v12 }
   0xf   :  { %402 = vmatpush3.bf16.msra.mxu0 %v463_v10 }
  0x10   :  { %403 = vmatprep.subr.bf16.mxu0 %v464_v11 }
  0x11   :  { %440 = vmatpush3.bf16.msra.mxu1 %v465_v12 }
  0x12   :  { %441 = vmatprep.subr.bf16.mxu1 %v468_v14 }
  0x13   :  { %404 = vmatpush3.bf16.msra.mxu0 %v466_v13 }
  0x14   :  { %405 = vmatprep.subr.bf16.mxu0 %v467_v15 }
  0x15   :  { %442 = vmatpush3.bf16.msra.mxu1 %v468_v14 }
  0x16   :  { %443 = vmatprep.subr.bf16.mxu1 %v471_v17 }
  0x17   :  { %406 = vmatpush3.bf16.msra.mxu0 %v469_v16 }
  0x18   :  { %407 = vmatprep.subr.bf16.mxu0 %v470_v18 }
  0x19   :  { %444 = vmatpush3.bf16.msra.mxu1 %v471_v17 }
  0x1a   :  { %445 = vmatprep.subr.bf16.mxu1 %v474_v21 }
  0x1b   :  { %408 = vmatpush3.bf16.msra.mxu0 %v472_v19 }
  0x1c   :  { %409 = vmatprep.subr.bf16.mxu0 %v473_v20 }
  0x1d   :  { %446 = vmatpush3.bf16.msra.mxu1 %v474_v21 }
  0x1e   :  { %447 = vmatprep.subr.bf16.mxu1 %v479_v25 }
  0x1f   :  { %410 = vmatpush3.bf16.msra.mxu0 %v475_v23 }
  0x21   :  { %448 = vmatpush3.bf16.msra.mxu1 %v479_v25 }
  0x22   :  { %287 = vmatmul.mubr.bf16.vlgmr.msra.gmra.mxu0 %v476_v26 }
  0x23   :  { %294 = vmatprep.mubr.bf16.mxu0 %v482_v27 }
  0x24   :  { %450 = vmatmul.mubr.bf16.vlgmr.msra.gmra.mxu1 %v481_v28 }
  0x2a   :  { %295 = vmatmul.mubr.bf16.gmra.mxu0 %v484_v29 }
  0xe2   :  { %v411_v30 = vpop.f32.mrf.mxu0 }
  0xe4   :  { %v412_v31 = vpop.f32.mrf.mxu0  ;;  %v451_v34 = vpop.f32.mrf.mxu1 }
  0xe5   :  { %v413_v33 = vadd.f32 %v412_v31, %v411_v30 }
  0xe6   :  { %v414_v35 = vpop.f32.mrf.mxu0  ;;  %v337_v37 = vpop.f32.mrf.mxu1 }
  0xe7   :  { %v289_v36 = vadd.f32 %v413_v33, %v364_v32 }
  0xe8   :  { %v415_v38 = vpop.f32.mrf.mxu0  ;;  %v452_v41 = vpop.f32.mrf.mxu1 }
  0xe9   :  { %v416_v39 = vadd.f32 %v415_v38, %v414_v35  ;;  %v338_v40 = vadd.f32 %v337_v37, %v289_v36 }
  0xea   :  { %v417_v42 = vpop.f32.mrf.mxu0  ;;  %v340_v45 = vpop.f32.mrf.mxu1 }
  0xeb   :  { %v352_v43 = vmax.f32 %v338_v40, 0.0  ;;  %v292_v44 = vadd.f32 %v416_v39, %v364_v32 }
  0xec   :  { %v418_v46 = vpop.f32.mrf.mxu0 }
  0xed   :  { %356 = vst [vmem:[%s613_s3] sm:$0xff] %v352_v43  ;;  %v419_v47 = vadd.f32 %v418_v46, %v417_v42  ;;  %v341_v48 = vadd.f32 %v340_v45, %v292_v44 }
  0xee   :  { %v420_v49 = vpop.f32.mrf.mxu0 }
  0xef   :  { %v297_v50 = vadd.f32 %v419_v47, %v364_v32  ;;  %v353_v51 = vmax.f32 %v341_v48, 0.0 }
  0xf0   :  { %v421_v52 = vpop.f32.mrf.mxu0 }
  0xf1   :  { %v346_v53 = vadd.f32 %v451_v34, %v297_v50  ;;  %357 = vst [vmem:[%s613_s3 + $0x8] sm:$0xff] %v353_v51  ;;  %v422_v54 = vadd.f32 %v421_v52, %v420_v49 }
  0xf3   :  { %v354_v55 = vmax.f32 %v346_v53, 0.0  ;;  %v300_v56 = vadd.f32 %v422_v54, %v364_v32 }
  0xf5   :  { %358 = vst [vmem:[%s613_s3 + $0x10] sm:$0xff] %v354_v55  ;;  %v349_v57 = vadd.f32 %v452_v41, %v300_v56 }
  0xf7   :  { %v355_v58 = vmax.f32 %v349_v57, 0.0 }
  0xf9   :  { %359 = vst [vmem:[%s613_s3 + $0x18] sm:$0xff] %v355_v58 }

// kernel: vae_forward.13
= control target key start
LH: loop header
LB: loop body
LE: loop exit
PB: predicated region body
PF: predicated region fallthrough
CT: control target
= control target key end

     0   :  { %s1194_s1 = inlined_call_operand.vmem [shape: bf16[1024,128], index: 1, kind: input, shape index: {}]   ;;  %s1195_s0 = inlined_call_operand.vmem [shape: bf16[8,1024], index: 0, kind: input, shape index: {}]   ;;  %s1196_s2 = inlined_call_operand.vmem [shape: f32[1,128], index: 2, kind: input, shape index: {}]   ;;  %s1197_s3 = inlined_call_operand.vmem [shape: f32[8,128], index: 3, kind: output, shape index: {}]  }
   0x1   :  { %v892_v0 = vld [vmem:[%s1194_s1 + $0x78] sm:$0xff]   ;;  %v896_v4 = vld [vmem:[%s1194_s1 + $0x70] sm:$0xff]   ;;  %v900_v8 = vld [vmem:[%s1194_s1 + $0x68] sm:$0xff]  }
   0x2   :  { %v893_v1 = vld [vmem:[%s1194_s1 + $0xf8] sm:$0xff]   ;;  %804 = vmatprep.subr.bf16.mxu0 %v892_v0  ;;  %v897_v5 = vld [vmem:[%s1194_s1 + $0xf0] sm:$0xff]   ;;  %v901_v9 = vld [vmem:[%s1194_s1 + $0xe8] sm:$0xff]  }
   0x3   :  { %v894_v2 = vld [vmem:[%s1194_s1 + $0x38] sm:$0xff]   ;;  %826 = vmatprep.subr.bf16.mxu1 %v893_v1  ;;  %v898_v6 = vld [vmem:[%s1194_s1 + $0x30] sm:$0xff]   ;;  %v902_v10 = vld [vmem:[%s1194_s1 + $0x28] sm:$0xff]  }
   0x4   :  { %v895_v3 = vld [vmem:[%s1194_s1 + $0xb8] sm:$0xff]   ;;  %805 = vmatpush3.bf16.msra.mxu0 %v894_v2  ;;  %v899_v7 = vld [vmem:[%s1194_s1 + $0xb0] sm:$0xff]   ;;  %v903_v11 = vld [vmem:[%s1194_s1 + $0xa8] sm:$0xff]  }
   0x5   :  { %827 = vmatpush3.bf16.msra.mxu1 %v895_v3  ;;  %806 = vmatprep.subr.bf16.mxu0 %v896_v4  ;;  %v904_v12 = vld [vmem:[%s1194_s1 + $0x60] sm:$0xff]   ;;  %v908_v16 = vld [vmem:[%s1194_s1 + $0x58] sm:$0xff]   ;;  %v912_v20 = vld [vmem:[%s1194_s1 + $0x50] sm:$0xff]  }
   0x6   :  { %828 = vmatprep.subr.bf16.mxu1 %v897_v5  ;;  %v905_v13 = vld [vmem:[%s1194_s1 + $0xe0] sm:$0xff]   ;;  %v909_v17 = vld [vmem:[%s1194_s1 + $0xd8] sm:$0xff]   ;;  %v913_v21 = vld [vmem:[%s1194_s1 + $0xd0] sm:$0xff]  }
   0x7   :  { %v906_v14 = vld [vmem:[%s1194_s1 + $0x20] sm:$0xff]   ;;  %v910_v18 = vld [vmem:[%s1194_s1 + $0x18] sm:$0xff]   ;;  %v914_v22 = vld [vmem:[%s1194_s1 + $0x10] sm:$0xff]  }
   0x8   :  { %807 = vmatpush3.bf16.msra.mxu0 %v898_v6  ;;  %v907_v15 = vld [vmem:[%s1194_s1 + $0xa0] sm:$0xff]   ;;  %v911_v19 = vld [vmem:[%s1194_s1 + $0x98] sm:$0xff]   ;;  %v915_v23 = vld [vmem:[%s1194_s1 + $0x90] sm:$0xff]  }
   0x9   :  { %829 = vmatpush3.bf16.msra.mxu1 %v899_v7  ;;  %808 = vmatprep.subr.bf16.mxu0 %v900_v8  ;;  %v916_v24 = vld [vmem:[%s1194_s1 + $0x48] sm:$0xff]   ;;  %v920_v28 = vld [vmem:[%s1194_s1 + $0x40] sm:$0xff]   ;;  %v928_v38 = vld [vmem:[%s1194_s1 + $0x178] sm:$0xff]  }
   0xa   :  { %830 = vmatprep.subr.bf16.mxu1 %v901_v9  ;;  %v917_v25 = vld [vmem:[%s1194_s1 + $0xc8] sm:$0xff]   ;;  %v921_v29 = vld [vmem:[%s1194_s1 + $0xc0] sm:$0xff]   ;;  %v929_v39 = vld [vmem:[%s1194_s1 + $0x1f8] sm:$0xff]  }
   0xb   :  { %v918_v26 = vld [vmem:[%s1194_s1 + $0x8] sm:$0xff]   ;;  %v922_v30 = vld [vmem:[%s1194_s1] sm:$0xff]   ;;  %v930_v40 = vld [vmem:[%s1194_s1 + $0x138] sm:$0xff]  }
   0xc   :  { %809 = vmatpush3.bf16.msra.mxu0 %v902_v10  ;;  %v919_v27 = vld [vmem:[%s1194_s1 + $0x88] sm:$0xff]   ;;  %v923_v31 = vld [vmem:[%s1194_s1 + $0x80] sm:$0xff]   ;;  %v931_v41 = vld [vmem:[%s1194_s1 + $0x1b8] sm:$0xff]  }
   0xd   :  { %831 = vmatpush3.bf16.msra.mxu1 %v903_v11  ;;  %810 = vmatprep.subr.bf16.mxu0 %v904_v12  ;;  %v15_v32 = vld [vmem:[%s1195_s0] sm:$0xff]  ;;  %v16_v33 = vld [vmem:[%s1195_s0 + $0x8] sm:$0xff]  ;;  %v932_v42 = vld [vmem:[%s1194_s1 + $0x170] sm:$0xff]  }
   0xe   :  { %832 = vmatprep.subr.bf16.mxu1 %v905_v13  ;;  %v732_v34 = vcombine.low %v15_v32, %v15_v32  ;;  %v733_v35 = vcombine.high %v15_v32, %v15_v32  ;;  %v734_v36 = vcombine.low %v16_v33, %v16_v33  ;;  %v735_v37 = vcombine.high %v16_v33, %v16_v33  ;;  %v933_v43 = vld [vmem:[%s1194_s1 + $0x1f0] sm:$0xff]   ;;  %v936_v46 = vld [vmem:[%s1194_s1 + $0x168] sm:$0xff]   ;;  %v940_v50 = vld [vmem:[%s1194_s1 + $0x160] sm:$0xff]  }
   0xf   :  { %v934_v44 = vld [vmem:[%s1194_s1 + $0x130] sm:$0xff]   ;;  %v937_v47 = vld [vmem:[%s1194_s1 + $0x1e8] sm:$0xff]   ;;  %v941_v51 = vld [vmem:[%s1194_s1 + $0x1e0] sm:$0xff]  }
  0x10   :  { %811 = vmatpush3.bf16.msra.mxu0 %v906_v14  ;;  %598 = vmatprep.mubr.bf16.mxu0 %v733_v35  ;;  %v935_v45 = vld [vmem:[%s1194_s1 + $0x1b0] sm:$0xff]   ;;  %v938_v48 = vld [vmem:[%s1194_s1 + $0x128] sm:$0xff]   ;;  %v942_v52 = vld [vmem:[%s1194_s1 + $0x120] sm:$0xff]  }
  0x11   :  { %833 = vmatpush3.bf16.msra.mxu1 %v907_v15  ;;  %812 = vmatprep.subr.bf16.mxu0 %v908_v16  ;;  %v939_v49 = vld [vmem:[%s1194_s1 + $0x1a8] sm:$0xff]   ;;  %v943_v53 = vld [vmem:[%s1194_s1 + $0x1a0] sm:$0xff]   ;;  %v944_v54 = vld [vmem:[%s1194_s1 + $0x158] sm:$0xff]  }
  0x12   :  { %834 = vmatprep.subr.bf16.mxu1 %v909_v17  ;;  %638 = vmatprep.mubr.bf16.mxu1 %v735_v37  ;;  %v945_v55 = vld [vmem:[%s1194_s1 + $0x1d8] sm:$0xff]   ;;  %v948_v58 = vld [vmem:[%s1194_s1 + $0x150] sm:$0xff]   ;;  %v952_v62 = vld [vmem:[%s1194_s1 + $0x148] sm:$0xff]  }
  0x13   :  { %v946_v56 = vld [vmem:[%s1194_s1 + $0x118] sm:$0xff]   ;;  %v949_v59 = vld [vmem:[%s1194_s1 + $0x1d0] sm:$0xff]   ;;  %v953_v63 = vld [vmem:[%s1194_s1 + $0x1c8] sm:$0xff]  }
  0x14   :  { %813 = vmatpush3.bf16.msra.mxu0 %v910_v18  ;;  %v947_v57 = vld [vmem:[%s1194_s1 + $0x198] sm:$0xff]   ;;  %v950_v60 = vld [vmem:[%s1194_s1 + $0x110] sm:$0xff]   ;;  %v954_v0 = vld [vmem:[%s1194_s1 + $0x108] sm:$0xff]  }
  0x15   :  { %835 = vmatpush3.bf16.msra.mxu1 %v911_v19  ;;  %814 = vmatprep.subr.bf16.mxu0 %v912_v20  ;;  %v951_v61 = vld [vmem:[%s1194_s1 + $0x190] sm:$0xff]   ;;  %v955_v1 = vld [vmem:[%s1194_s1 + $0x188] sm:$0xff]   ;;  %v956_v2 = vld [vmem:[%s1194_s1 + $0x140] sm:$0xff]  }
  0x16   :  { %836 = vmatprep.subr.bf16.mxu1 %v913_v21  ;;  %v957_v3 = vld [vmem:[%s1194_s1 + $0x1c0] sm:$0xff]   ;;  %v17_v6 = vld [vmem:[%s1195_s0 + $0x10] sm:$0xff]  ;;  %v18_v9 = vld [vmem:[%s1195_s0 + $0x18] sm:$0xff] }
  0x17   :  { %v958_v4 = vld [vmem:[%s1194_s1 + $0x100] sm:$0xff]   ;;  %v736_v7 = vcombine.low %v17_v6, %v17_v6  ;;  %v737_v8 = vcombine.high %v17_v6, %v17_v6  ;;  %v738_v10 = vcombine.low %v18_v9, %v18_v9  ;;  %v739_v11 = vcombine.high %v18_v9, %v18_v9 }
  0x18   :  { %815 = vmatpush3.bf16.msra.mxu0 %v914_v22  ;;  %v959_v5 = vld [vmem:[%s1194_s1 + $0x180] sm:$0xff]  }
  0x19   :  { %837 = vmatpush3.bf16.msra.mxu1 %v915_v23  ;;  %816 = vmatprep.subr.bf16.mxu0 %v916_v24  ;;  %v731_v21 = vld [vmem:[%s1196_s2] ss:$0 sm:$0xff] }
  0x1a   :  { %838 = vmatprep.subr.bf16.mxu1 %v917_v25 }
  0x1c   :  { %817 = vmatpush3.bf16.msra.mxu0 %v918_v26 }
  0x1d   :  { %839 = vmatpush3.bf16.msra.mxu1 %v919_v27  ;;  %818 = vmatprep.subr.bf16.mxu0 %v920_v28 }
  0x1e   :  { %840 = vmatprep.subr.bf16.mxu1 %v921_v29 }
  0x20   :  { %819 = vmatpush3.bf16.msra.mxu0 %v922_v30 }
  0x21   :  { %841 = vmatpush3.bf16.msra.mxu1 %v923_v31  ;;  %848 = vmatprep.subr.bf16.mxu0 %v928_v38 }
  0x22   :  { %870 = vmatprep.subr.bf16.mxu1 %v929_v39 }
  0x23   :  { %599 = vmatmul.mubr.bf16.vlgmr.msra.gmra.mxu0 %v732_v34 }
  0x24   :  { %639 = vmatmul.mubr.bf16.vlgmr.msra.gmra.mxu1 %v734_v36  ;;  %849 = vmatpush3.bf16.msra.mxu0 %v930_v40 }
  0x25   :  { %871 = vmatpush3.bf16.msra.mxu1 %v931_v41  ;;  %850 = vmatprep.subr.bf16.mxu0 %v932_v42 }
  0x26   :  { %872 = vmatprep.subr.bf16.mxu1 %v933_v43  ;;  %678 = vmatprep.mubr.bf16.mxu0 %v737_v8 }
  0x27   :  { %718 = vmatprep.mubr.bf16.mxu1 %v739_v11 }
  0x28   :  { %851 = vmatpush3.bf16.msra.mxu0 %v934_v44 }
  0x29   :  { %873 = vmatpush3.bf16.msra.mxu1 %v935_v45  ;;  %852 = vmatprep.subr.bf16.mxu0 %v936_v46 }
  0x2a   :  { %874 = vmatprep.subr.bf16.mxu1 %v937_v47 }
  0x2c   :  { %853 = vmatpush3.bf16.msra.mxu0 %v938_v48 }
  0x2d   :  { %875 = vmatpush3.bf16.msra.mxu1 %v939_v49  ;;  %854 = vmatprep.subr.bf16.mxu0 %v940_v50 }
  0x2e   :  { %876 = vmatprep.subr.bf16.mxu1 %v941_v51 }
  0x30   :  { %855 = vmatpush3.bf16.msra.mxu0 %v942_v52 }
  0x31   :  { %877 = vmatpush3.bf16.msra.mxu1 %v943_v53  ;;  %856 = vmatprep.subr.bf16.mxu0 %v944_v54 }
  0x32   :  { %878 = vmatprep.subr.bf16.mxu1 %v945_v55 }
  0x34   :  { %857 = vmatpush3.bf16.msra.mxu0 %v946_v56 }
  0x35   :  { %879 = vmatpush3.bf16.msra.mxu1 %v947_v57  ;;  %858 = vmatprep.subr.bf16.mxu0 %v948_v58 }
  0x36   :  { %880 = vmatprep.subr.bf16.mxu1 %v949_v59 }
  0x38   :  { %859 = vmatpush3.bf16.msra.mxu0 %v950_v60 }
  0x39   :  { %881 = vmatpush3.bf16.msra.mxu1 %v951_v61  ;;  %860 = vmatprep.subr.bf16.mxu0 %v952_v62 }
  0x3a   :  { %882 = vmatprep.subr.bf16.mxu1 %v953_v63 }
  0x3c   :  { %861 = vmatpush3.bf16.msra.mxu0 %v954_v0 }
  0x3d   :  { %883 = vmatpush3.bf16.msra.mxu1 %v955_v1  ;;  %862 = vmatprep.subr.bf16.mxu0 %v956_v2 }
  0x3e   :  { %884 = vmatprep.subr.bf16.mxu1 %v957_v3 }
  0x40   :  { %863 = vmatpush3.bf16.msra.mxu0 %v958_v4 }
  0x41   :  { %885 = vmatpush3.bf16.msra.mxu1 %v959_v5 }
  0x43   :  { %679 = vmatmul.mubr.bf16.vlgmr.msra.gmra.mxu0 %v736_v7 }
  0x44   :  { %719 = vmatmul.mubr.bf16.vlgmr.msra.gmra.mxu1 %v738_v10 }
  0xe3   :  { %v820_v12 = vpop.f32.mrf.mxu0 }
  0xe4   :  { %v842_v13 = vpop.f32.mrf.mxu1 }
  0xe5   :  { %v821_v14 = vpop.f32.mrf.mxu0 }
  0xe6   :  { %v843_v15 = vpop.f32.mrf.mxu1  ;;  %v822_v20 = vadd.f32 %v821_v14, %v820_v12 }
  0xe7   :  { %v823_v16 = vpop.f32.mrf.mxu0  ;;  %v844_v23 = vadd.f32 %v843_v15, %v842_v13 }
  0xe8   :  { %v845_v17 = vpop.f32.mrf.mxu1  ;;  %v601_v22 = vadd.f32 %v822_v20, %v731_v21 }
  0xe9   :  { %v824_v18 = vpop.f32.mrf.mxu0 }
  0xea   :  { %v846_v19 = vpop.f32.mrf.mxu1  ;;  %v641_v28 = vadd.f32 %v844_v23, %v601_v22 }
 0x103   :  { %v864_v24 = vpop.f32.mrf.mxu0 }
 0x104   :  { %v886_v25 = vpop.f32.mrf.mxu1 }
 0x105   :  { %v865_v26 = vpop.f32.mrf.mxu0 }
 0x106   :  { %v887_v27 = vpop.f32.mrf.mxu1  ;;  %v866_v29 = vadd.f32 %v865_v26, %v864_v24 }
 0x107   :  { %v867_v30 = vpop.f32.mrf.mxu0  ;;  %v888_v33 = vadd.f32 %v887_v27, %v886_v25 }
 0x108   :  { %v889_v31 = vpop.f32.mrf.mxu1  ;;  %v681_v32 = vadd.f32 %v866_v29, %v641_v28 }
 0x109   :  { %v868_v34 = vpop.f32.mrf.mxu0 }
 0x10a   :  { %v890_v35 = vpop.f32.mrf.mxu1  ;;  %v721_v36 = vadd.f32 %v888_v33, %v681_v32 }
 0x10c   :  { %726 = vst [vmem:[%s1197_s3] sm:$0xff] %v721_v36 }

// kernel: mul.44
= control target key start
LH: loop header
LB: loop body
LE: loop exit
PB: predicated region body
PF: predicated region fallthrough
CT: control target
= control target key end

     0   :  { %s20_s0 = inlined_call_operand.<no memory space> [shape: f32[], index: 0, kind: input, shape index: {}]   ;;  %s21_s1 = inlined_call_operand.vmem [shape: f32[64], index: 1, kind: output, shape index: {}]  }
   0x1   :  { %v2_v0 = vstv %s20_s0 }
   0x2   :  { %3 = vst [vmem:[%s21_s1] sm:$0x1] %v2_v0 }

// kernel: mul.42
= control target key start
LH: loop header
LB: loop body
LE: loop exit
PB: predicated region body
PF: predicated region fallthrough
CT: control target
= control target key end

     0   :  { %s20_s0 = inlined_call_operand.<no memory space> [shape: f32[], index: 0, kind: input, shape index: {}]   ;;  %s21_s1 = inlined_call_operand.vmem [shape: f32[32], index: 1, kind: output, shape index: {}]  }
   0x1   :  { %v2_v0 = vstv %s20_s0 }
   0x2   :  { %3 = vst [vmem:[%s21_s1] sm:$0x1] %v2_v0 }

// kernel: vae_forward.15
= control target key start
LH: loop header
LB: loop body
LE: loop exit
PB: predicated region body
PF: predicated region fallthrough
CT: control target
= control target key end

     0   :  { %s2444_s1 = inlined_call_operand.vmem [shape: bf16[1024,128], index: 1, kind: input, shape index: {}]   ;;  %s2445_s0 = inlined_call_operand.vmem [shape: bf16[128,1024], index: 0, kind: input, shape index: {}]   ;;  %s2446_s2 = inlined_call_operand.vmem [shape: f32[1,128], index: 2, kind: input, shape index: {}]   ;;  %s2447_s3 = inlined_call_operand.vmem [shape: f32[128,128], index: 3, kind: output, shape index: {}]  }
   0x1   :  { %v1727_v0 = vld [vmem:[%s2444_s1 + $0x78] sm:$0xff]   ;;  %v1731_v4 = vld [vmem:[%s2444_s1 + $0x70] sm:$0xff]   ;;  %v1735_v8 = vld [vmem:[%s2444_s1 + $0x68] sm:$0xff]  }
   0x2   :  { %v1728_v1 = vld [vmem:[%s2444_s1 + $0xf8] sm:$0xff]   ;;  %1471 = vmatprep.subr.bf16.mxu0 %v1727_v0  ;;  %v1732_v5 = vld [vmem:[%s2444_s1 + $0xf0] sm:$0xff]   ;;  %v1736_v9 = vld [vmem:[%s2444_s1 + $0xe8] sm:$0xff]  }
   0x3   :  { %v1729_v2 = vld [vmem:[%s2444_s1 + $0x38] sm:$0xff]   ;;  %1535 = vmatprep.subr.bf16.mxu1 %v1728_v1  ;;  %v1733_v6 = vld [vmem:[%s2444_s1 + $0x30] sm:$0xff]   ;;  %v1737_v10 = vld [vmem:[%s2444_s1 + $0x28] sm:$0xff]  }
   0x4   :  { %v1730_v3 = vld [vmem:[%s2444_s1 + $0xb8] sm:$0xff]   ;;  %1472 = vmatpush3.bf16.msra.mxu0 %v1729_v2  ;;  %v1734_v7 = vld [vmem:[%s2444_s1 + $0xb0] sm:$0xff]   ;;  %v1738_v11 = vld [vmem:[%s2444_s1 + $0xa8] sm:$0xff]  }
   0x5   :  { %1536 = vmatpush3.bf16.msra.mxu1 %v1730_v3  ;;  %1473 = vmatprep.subr.bf16.mxu0 %v1731_v4  ;;  %v1739_v12 = vld [vmem:[%s2444_s1 + $0x60] sm:$0xff]   ;;  %v1743_v16 = vld [vmem:[%s2444_s1 + $0x58] sm:$0xff]   ;;  %v1747_v20 = vld [vmem:[%s2444_s1 + $0x50] sm:$0xff]  }
   0x6   :  { %1537 = vmatprep.subr.bf16.mxu1 %v1732_v5  ;;  %v1740_v13 = vld [vmem:[%s2444_s1 + $0xe0] sm:$0xff]   ;;  %v1744_v17 = vld [vmem:[%s2444_s1 + $0xd8] sm:$0xff]   ;;  %v1748_v21 = vld [vmem:[%s2444_s1 + $0xd0] sm:$0xff]  }
   0x7   :  { %v1741_v14 = vld [vmem:[%s2444_s1 + $0x20] sm:$0xff]   ;;  %v1745_v18 = vld [vmem:[%s2444_s1 + $0x18] sm:$0xff]   ;;  %v1749_v22 = vld [vmem:[%s2444_s1 + $0x10] sm:$0xff]  }
   0x8   :  { %1474 = vmatpush3.bf16.msra.mxu0 %v1733_v6  ;;  %v1742_v15 = vld [vmem:[%s2444_s1 + $0xa0] sm:$0xff]   ;;  %v1746_v19 = vld [vmem:[%s2444_s1 + $0x98] sm:$0xff]   ;;  %v1750_v23 = vld [vmem:[%s2444_s1 + $0x90] sm:$0xff]  }
   0x9   :  { %1538 = vmatpush3.bf16.msra.mxu1 %v1734_v7  ;;  %1475 = vmatprep.subr.bf16.mxu0 %v1735_v8  ;;  %v1751_v24 = vld [vmem:[%s2444_s1 + $0x48] sm:$0xff]   ;;  %v1755_v28 = vld [vmem:[%s2444_s1 + $0x40] sm:$0xff]   ;;  %v1759_v40 = vld [vmem:[%s2444_s1 + $0x178] sm:$0xff]  }
   0xa   :  { %1539 = vmatprep.subr.bf16.mxu1 %v1736_v9  ;;  %v1752_v25 = vld [vmem:[%s2444_s1 + $0xc8] sm:$0xff]   ;;  %v1756_v29 = vld [vmem:[%s2444_s1 + $0xc0] sm:$0xff]   ;;  %v1760_v41 = vld [vmem:[%s2444_s1 + $0x138] sm:$0xff]  }
   0xb   :  { %v1753_v26 = vld [vmem:[%s2444_s1 + $0x8] sm:$0xff]   ;;  %v1757_v30 = vld [vmem:[%s2444_s1] sm:$0xff]   ;;  %v1761_v42 = vld [vmem:[%s2444_s1 + $0x1f8] sm:$0xff]  }
   0xc   :  { %1476 = vmatpush3.bf16.msra.mxu0 %v1737_v10  ;;  %v1754_v27 = vld [vmem:[%s2444_s1 + $0x88] sm:$0xff]   ;;  %v1758_v31 = vld [vmem:[%s2444_s1 + $0x80] sm:$0xff]   ;;  %v1762_v43 = vld [vmem:[%s2444_s1 + $0x1b8] sm:$0xff]  }
   0xd   :  { %1540 = vmatpush3.bf16.msra.mxu1 %v1738_v11  ;;  %1477 = vmatprep.subr.bf16.mxu0 %v1739_v12  ;;  %v15_v32 = vld [vmem:[%s2445_s0] sm:$0xff]  ;;  %v16_v34 = vld [vmem:[%s2445_s0 + $0x8] sm:$0xff]  ;;  %v1763_v50 = vld [vmem:[%s2444_s1 + $0x170] sm:$0xff]  }
   0xe   :  { %1541 = vmatprep.subr.bf16.mxu1 %v1740_v13  ;;  %v19_v33 = vld [vmem:[%s2445_s0 + $0x20] sm:$0xff]  ;;  %v20_v37 = vld [vmem:[%s2445_s0 + $0x28] sm:$0xff]  ;;  %v1764_v52 = vld [vmem:[%s2444_s1 + $0x130] sm:$0xff]  }
   0xf   :  { %v1343_v35 = vcombine.low %v15_v32, %v19_v33  ;;  %v1344_v36 = vcombine.high %v15_v32, %v19_v33  ;;  %v1345_v38 = vcombine.low %v16_v34, %v20_v37  ;;  %v1346_v39 = vcombine.high %v16_v34, %v20_v37  ;;  %v23_v44 = vld [vmem:[%s2445_s0 + $0x40] sm:$0xff]  ;;  %v24_v47 = vld [vmem:[%s2445_s0 + $0x48] sm:$0xff]  ;;  %v1765_v54 = vld [vmem:[%s2444_s1 + $0x1f0] sm:$0xff]  }
  0x10   :  { %1478 = vmatpush3.bf16.msra.mxu0 %v1741_v14  ;;  %v27_v45 = vld [vmem:[%s2445_s0 + $0x60] sm:$0xff]  ;;  %v28_v48 = vld [vmem:[%s2445_s0 + $0x68] sm:$0xff]  ;;  %v1766_v55 = vld [vmem:[%s2444_s1 + $0x1b0] sm:$0xff]  }
  0x11   :  { %1542 = vmatpush3.bf16.msra.mxu1 %v1742_v15  ;;  %1479 = vmatprep.subr.bf16.mxu0 %v1743_v16  ;;  %v1352_v46 = vcombine.high %v23_v44, %v27_v45  ;;  %v1354_v49 = vcombine.high %v24_v47, %v28_v48  ;;  %v1351_v51 = vcombine.low %v23_v44, %v27_v45  ;;  %v31_v56 = vld [vmem:[%s2445_s0 + $0x80] sm:$0xff]  ;;  %v32_v58 = vld [vmem:[%s2445_s0 + $0x88] sm:$0xff]  ;;  %v1781_v32 = vld [vmem:[%s2444_s1 + $0x1d0] sm:$0xff]  }
  0x12   :  { %1543 = vmatprep.subr.bf16.mxu1 %v1744_v17  ;;  %950 = vmatprep.mubr.bf16.mxu0 %v1344_v36  ;;  %v1353_v53 = vcombine.low %v24_v47, %v28_v48  ;;  %v35_v57 = vld [vmem:[%s2445_s0 + $0xa0] sm:$0xff]  ;;  %v36_v59 = vld [vmem:[%s2445_s0 + $0xa8] sm:$0xff]  ;;  %v1782_v33 = vld [vmem:[%s2444_s1 + $0x190] sm:$0xff]  }
  0x13   :  { %1047 = vmatprep.mubr.bf16.mxu1 %v1346_v39  ;;  %v1360_v60 = vcombine.high %v31_v56, %v35_v57  ;;  %v1362_v61 = vcombine.high %v32_v58, %v36_v59  ;;  %v1767_v62 = vld [vmem:[%s2444_s1 + $0x168] sm:$0xff]   ;;  %v1359_v2 = vcombine.low %v31_v56, %v35_v57  ;;  %v39_v3 = vld [vmem:[%s2445_s0 + $0xc0] sm:$0xff]  ;;  %v1361_v6 = vcombine.low %v32_v58, %v36_v59 }
  0x14   :  { %1480 = vmatpush3.bf16.msra.mxu0 %v1745_v18  ;;  %v1768_v63 = vld [vmem:[%s2444_s1 + $0x128] sm:$0xff]   ;;  %v43_v4 = vld [vmem:[%s2445_s0 + $0xe0] sm:$0xff]  ;;  %v1775_v18 = vld [vmem:[%s2444_s1 + $0x158] sm:$0xff]  }
  0x15   :  { %1544 = vmatpush3.bf16.msra.mxu1 %v1746_v19  ;;  %1481 = vmatprep.subr.bf16.mxu0 %v1747_v20  ;;  %v1769_v0 = vld [vmem:[%s2444_s1 + $0x1e8] sm:$0xff]   ;;  %v1368_v7 = vcombine.high %v39_v3, %v43_v4  ;;  %v1771_v10 = vld [vmem:[%s2444_s1 + $0x160] sm:$0xff]   ;;  %v1367_v19 = vcombine.low %v39_v3, %v43_v4  ;;  %v1776_v20 = vld [vmem:[%s2444_s1 + $0x118] sm:$0xff]  }
  0x16   :  { %1545 = vmatprep.subr.bf16.mxu1 %v1748_v21  ;;  %v1770_v1 = vld [vmem:[%s2444_s1 + $0x1a8] sm:$0xff]   ;;  %v1772_v11 = vld [vmem:[%s2444_s1 + $0x120] sm:$0xff]  }
  0x17   :  { %v40_v5 = vld [vmem:[%s2445_s0 + $0xc8] sm:$0xff]  ;;  %v1773_v12 = vld [vmem:[%s2444_s1 + $0x1e0] sm:$0xff]  }
  0x18   :  { %1482 = vmatpush3.bf16.msra.mxu0 %v1749_v22  ;;  %v44_v8 = vld [vmem:[%s2445_s0 + $0xe8] sm:$0xff]  ;;  %v1774_v13 = vld [vmem:[%s2444_s1 + $0x1a0] sm:$0xff]  }
  0x19   :  { %1546 = vmatpush3.bf16.msra.mxu1 %v1750_v23  ;;  %1483 = vmatprep.subr.bf16.mxu0 %v1751_v24  ;;  %v1370_v9 = vcombine.high %v40_v5, %v44_v8  ;;  %v47_v14 = vld [vmem:[%s2445_s0 + $0x100] sm:$0xff]  ;;  %v48_v16 = vld [vmem:[%s2445_s0 + $0x108] sm:$0xff]  ;;  %v1369_v21 = vcombine.low %v40_v5, %v44_v8  ;;  %v1777_v23 = vld [vmem:[%s2444_s1 + $0x1d8] sm:$0xff]  }
  0x1a   :  { %1547 = vmatprep.subr.bf16.mxu1 %v1752_v25  ;;  %v51_v15 = vld [vmem:[%s2445_s0 + $0x120] sm:$0xff]  ;;  %v52_v17 = vld [vmem:[%s2445_s0 + $0x128] sm:$0xff]  ;;  %v1778_v25 = vld [vmem:[%s2444_s1 + $0x198] sm:$0xff]  }
  0x1b   :  { %v1376_v22 = vcombine.high %v47_v14, %v51_v15  ;;  %v1378_v24 = vcombine.high %v48_v16, %v52_v17  ;;  %v1375_v34 = vcombine.low %v47_v14, %v51_v15  ;;  %v1784_v39 = vld [vmem:[%s2444_s1 + $0x108] sm:$0xff]   ;;  %v1788_v48 = vld [vmem:[%s2444_s1 + $0x100] sm:$0xff]   ;;  %v26_v8 = vld [vmem:[%s2445_s0 + $0x58] sm:$0xff] }
  0x1c   :  { %1484 = vmatpush3.bf16.msra.mxu0 %v1753_v26  ;;  %v55_v26 = vld [vmem:[%s2445_s0 + $0x140] sm:$0xff]  ;;  %v64_v44 = vld [vmem:[%s2445_s0 + $0x188] sm:$0xff]  ;;  %v33_v14 = vld [vmem:[%s2445_s0 + $0x90] sm:$0xff] }
  0x1d   :  { %1548 = vmatpush3.bf16.msra.mxu1 %v1754_v27  ;;  %1485 = vmatprep.subr.bf16.mxu0 %v1755_v28  ;;  %v59_v27 = vld [vmem:[%s2445_s0 + $0x160] sm:$0xff]  ;;  %v1779_v28 = vld [vmem:[%s2444_s1 + $0x150] sm:$0xff]   ;;  %v68_v45 = vld [vmem:[%s2445_s0 + $0x1a8] sm:$0xff] }
  0x1e   :  { %1549 = vmatprep.subr.bf16.mxu1 %v1756_v29  ;;  %v56_v29 = vld [vmem:[%s2445_s0 + $0x148] sm:$0xff]  ;;  %v1384_v36 = vcombine.high %v55_v26, %v59_v27  ;;  %v1383_v47 = vcombine.low %v55_v26, %v59_v27  ;;  %v1393_v59 = vcombine.low %v64_v44, %v68_v45  ;;  %v37_v15 = vld [vmem:[%s2445_s0 + $0xb0] sm:$0xff] }
  0x1f   :  { %v72_v56 = vld [vmem:[%s2445_s0 + $0x1c8] sm:$0xff]  ;;  %v1363_v26 = vcombine.low %v33_v14, %v37_v15 }
  0x20   :  { %1486 = vmatpush3.bf16.msra.mxu0 %v1757_v30  ;;  %v60_v30 = vld [vmem:[%s2445_s0 + $0x168] sm:$0xff] }
  0x21   :  { %1550 = vmatpush3.bf16.msra.mxu1 %v1758_v31  ;;  %1599 = vmatprep.subr.bf16.mxu0 %v1759_v40  ;;  %v1780_v31 = vld [vmem:[%s2444_s1 + $0x110] sm:$0xff]   ;;  %v1386_v37 = vcombine.high %v56_v29, %v60_v30  ;;  %v1785_v40 = vld [vmem:[%s2444_s1 + $0x1c8] sm:$0xff]  }
  0x22   :  { %1663 = vmatprep.subr.bf16.mxu1 %v1761_v42  ;;  %v67_v42 = vld [vmem:[%s2445_s0 + $0x1a0] sm:$0xff]  ;;  %v76_v57 = vld [vmem:[%s2445_s0 + $0x1e8] sm:$0xff] }
  0x23   :  { %951 = vmatmul.mubr.bf16.vlgmr.msra.gmra.mxu0 %v1343_v35  ;;  %v1377_v35 = vcombine.low %v48_v16, %v52_v17  ;;  %v1401_v3 = vcombine.low %v72_v56, %v76_v57  ;;  %v34_v16 = vld [vmem:[%s2445_s0 + $0x98] sm:$0xff] }
  0x24   :  { %1048 = vmatmul.mubr.bf16.vlgmr.msra.gmra.mxu1 %v1345_v38  ;;  %1600 = vmatpush3.bf16.msra.mxu0 %v1760_v41  ;;  %v1783_v38 = vld [vmem:[%s2444_s1 + $0x148] sm:$0xff]   ;;  %v63_v41 = vld [vmem:[%s2445_s0 + $0x180] sm:$0xff]  ;;  %v38_v17 = vld [vmem:[%s2445_s0 + $0xb8] sm:$0xff] }
  0x25   :  { %1664 = vmatpush3.bf16.msra.mxu1 %v1762_v43  ;;  %958 = vmatprep.mubr.bf16.mxu0 %v1352_v46  ;;  %v1786_v43 = vld [vmem:[%s2444_s1 + $0x188] sm:$0xff]   ;;  %v1787_v46 = vld [vmem:[%s2444_s1 + $0x140] sm:$0xff]   ;;  %v1391_v58 = vcombine.low %v63_v41, %v67_v42  ;;  %v1365_v27 = vcombine.low %v34_v16, %v38_v17 }
  0x26   :  { %1055 = vmatprep.mubr.bf16.mxu1 %v1354_v49  ;;  %1601 = vmatprep.subr.bf16.mxu0 %v1763_v50  ;;  %v1385_v49 = vcombine.low %v56_v29, %v60_v30  ;;  %v1392_v50 = vcombine.high %v63_v41, %v67_v42  ;;  %v49_v30 = vld [vmem:[%s2445_s0 + $0x110] sm:$0xff]  ;;  %v62_v41 = vld [vmem:[%s2445_s0 + $0x178] sm:$0xff] }
  0x27   :  { %1665 = vmatprep.subr.bf16.mxu1 %v1765_v54  ;;  %v71_v54 = vld [vmem:[%s2445_s0 + $0x1c0] sm:$0xff] }
  0x28   :  { %1602 = vmatpush3.bf16.msra.mxu0 %v1764_v52  ;;  %v1394_v52 = vcombine.high %v64_v44, %v68_v45 }
  0x29   :  { %1666 = vmatpush3.bf16.msra.mxu1 %v1766_v55  ;;  %1603 = vmatprep.subr.bf16.mxu0 %v1767_v62  ;;  %v75_v55 = vld [vmem:[%s2445_s0 + $0x1e0] sm:$0xff]  ;;  %v17_v62 = vld [vmem:[%s2445_s0 + $0x10] sm:$0xff] }
  0x2a   :  { %1667 = vmatprep.subr.bf16.mxu1 %v1769_v0  ;;  %v18_v0 = vld [vmem:[%s2445_s0 + $0x18] sm:$0xff] }
  0x2b   :  { %959 = vmatmul.mubr.bf16.gmra.mxu0 %v1351_v51  ;;  %v1789_v51 = vld [vmem:[%s2444_s1 + $0x1c0] sm:$0xff]  }
  0x2c   :  { %1056 = vmatmul.mubr.bf16.gmra.mxu1 %v1353_v53  ;;  %966 = vmatprep.mubr.bf16.mxu0 %v1360_v60  ;;  %v1790_v53 = vld [vmem:[%s2444_s1 + $0x180] sm:$0xff]   ;;  %v1400_v60 = vcombine.high %v71_v54, %v75_v55 }
  0x2d   :  { %1063 = vmatprep.mubr.bf16.mxu1 %v1362_v61  ;;  %1604 = vmatpush3.bf16.msra.mxu0 %v1768_v63  ;;  %v1402_v61 = vcombine.high %v72_v56, %v76_v57  ;;  %v21_v63 = vld [vmem:[%s2445_s0 + $0x30] sm:$0xff]  ;;  %v74_v56 = vld [vmem:[%s2445_s0 + $0x1d8] sm:$0xff] }
  0x2e   :  { %1668 = vmatpush3.bf16.msra.mxu1 %v1770_v1  ;;  %1605 = vmatprep.subr.bf16.mxu0 %v1771_v10  ;;  %v22_v1 = vld [vmem:[%s2445_s0 + $0x38] sm:$0xff]  ;;  %v1348_v4 = vcombine.high %v17_v62, %v21_v63  ;;  %v1347_v10 = vcombine.low %v17_v62, %v21_v63 }
  0x2f   :  { %1669 = vmatprep.subr.bf16.mxu1 %v1773_v12  ;;  %v1350_v5 = vcombine.high %v18_v0, %v22_v1  ;;  %v78_v57 = vld [vmem:[%s2445_s0 + $0x1f8] sm:$0xff] }
  0x30   :  { %v1405_v63 = vcombine.low %v74_v56, %v78_v57 }
  0x31   :  { %1606 = vmatpush3.bf16.msra.mxu0 %v1772_v11  ;;  %v1349_v11 = vcombine.low %v18_v0, %v22_v1 }
  0x32   :  { %1670 = vmatpush3.bf16.msra.mxu1 %v1774_v13  ;;  %1607 = vmatprep.subr.bf16.mxu0 %v1775_v18 }
  0x33   :  { %967 = vmatmul.mubr.bf16.gmra.mxu0 %v1359_v2  ;;  %1671 = vmatprep.subr.bf16.mxu1 %v1777_v23  ;;  %v1399_v2 = vcombine.low %v71_v54, %v75_v55  ;;  %v45_v23 = vld [vmem:[%s2445_s0 + $0xf0] sm:$0xff] }
  0x34   :  { %1064 = vmatmul.mubr.bf16.gmra.mxu1 %v1361_v6  ;;  %974 = vmatprep.mubr.bf16.mxu0 %v1368_v7  ;;  %v25_v6 = vld [vmem:[%s2445_s0 + $0x50] sm:$0xff] }
  0x35   :  { %1071 = vmatprep.mubr.bf16.mxu1 %v1370_v9  ;;  %1608 = vmatpush3.bf16.msra.mxu0 %v1776_v20  ;;  %v29_v7 = vld [vmem:[%s2445_s0 + $0x70] sm:$0xff]  ;;  %v30_v9 = vld [vmem:[%s2445_s0 + $0x78] sm:$0xff]  ;;  %v1364_v20 = vcombine.high %v33_v14, %v37_v15 }
  0x36   :  { %1672 = vmatpush3.bf16.msra.mxu1 %v1778_v25  ;;  %1609 = vmatprep.subr.bf16.mxu0 %v1779_v28  ;;  %v1356_v12 = vcombine.high %v25_v6, %v29_v7  ;;  %v1358_v13 = vcombine.high %v26_v8, %v30_v9  ;;  %v1355_v18 = vcombine.low %v25_v6, %v29_v7  ;;  %v46_v25 = vld [vmem:[%s2445_s0 + $0xf8] sm:$0xff]  ;;  %v73_v54 = vld [vmem:[%s2445_s0 + $0x1d0] sm:$0xff] }
  0x37   :  { %1673 = vmatprep.subr.bf16.mxu1 %v1781_v32  ;;  %v50_v32 = vld [vmem:[%s2445_s0 + $0x118] sm:$0xff]  ;;  %v77_v55 = vld [vmem:[%s2445_s0 + $0x1f0] sm:$0xff] }
  0x38   :  { %v1403_v62 = vcombine.low %v73_v54, %v77_v55 }
  0x39   :  { %1610 = vmatpush3.bf16.msra.mxu0 %v1780_v31  ;;  %v53_v31 = vld [vmem:[%s2445_s0 + $0x130] sm:$0xff] }
  0x3a   :  { %1674 = vmatpush3.bf16.msra.mxu1 %v1782_v33  ;;  %1611 = vmatprep.subr.bf16.mxu0 %v1783_v38  ;;  %v54_v33 = vld [vmem:[%s2445_s0 + $0x138] sm:$0xff]  ;;  %v57_v38 = vld [vmem:[%s2445_s0 + $0x150] sm:$0xff]  ;;  %v1379_v42 = vcombine.low %v49_v30, %v53_v31 }
  0x3b   :  { %975 = vmatmul.mubr.bf16.gmra.mxu0 %v1367_v19  ;;  %1675 = vmatprep.subr.bf16.mxu1 %v1785_v40  ;;  %v1357_v19 = vcombine.low %v26_v8, %v30_v9  ;;  %v58_v40 = vld [vmem:[%s2445_s0 + $0x158] sm:$0xff] }
  0x3c   :  { %1072 = vmatmul.mubr.bf16.gmra.mxu1 %v1369_v21  ;;  %982 = vmatprep.mubr.bf16.mxu0 %v1376_v22  ;;  %v1366_v21 = vcombine.high %v34_v16, %v38_v17  ;;  %v41_v22 = vld [vmem:[%s2445_s0 + $0xd0] sm:$0xff]  ;;  %v1390_v45 = vcombine.high %v58_v40, %v62_v41 }
  0x3d   :  { %1079 = vmatprep.mubr.bf16.mxu1 %v1378_v24  ;;  %1612 = vmatpush3.bf16.msra.mxu0 %v1784_v39  ;;  %v42_v24 = vld [vmem:[%s2445_s0 + $0xd8] sm:$0xff]  ;;  %v1372_v28 = vcombine.high %v41_v22, %v45_v23  ;;  %v61_v39 = vld [vmem:[%s2445_s0 + $0x170] sm:$0xff] }
  0x3e   :  { %1676 = vmatpush3.bf16.msra.mxu1 %v1786_v43  ;;  %1613 = vmatprep.subr.bf16.mxu0 %v1787_v46  ;;  %v1374_v29 = vcombine.high %v42_v24, %v46_v25  ;;  %v1381_v43 = vcombine.low %v50_v32, %v54_v33  ;;  %v1388_v44 = vcombine.high %v57_v38, %v61_v39  ;;  %v65_v46 = vld [vmem:[%s2445_s0 + $0x190] sm:$0xff] }
  0x3f   :  { %1677 = vmatprep.subr.bf16.mxu1 %v1789_v51  ;;  %v1389_v51 = vcombine.low %v58_v40, %v62_v41 }
  0x41   :  { %1614 = vmatpush3.bf16.msra.mxu0 %v1788_v48  ;;  %v66_v48 = vld [vmem:[%s2445_s0 + $0x198] sm:$0xff] }
  0x42   :  { %1678 = vmatpush3.bf16.msra.mxu1 %v1790_v53 }
  0x43   :  { %983 = vmatmul.mubr.bf16.gmra.mxu0 %v1375_v34  ;;  %v1371_v34 = vcombine.low %v41_v22, %v45_v23 }
  0x44   :  { %1080 = vmatmul.mubr.bf16.gmra.mxu1 %v1377_v35  ;;  %990 = vmatprep.mubr.bf16.mxu0 %v1384_v36  ;;  %v1373_v35 = vcombine.low %v42_v24, %v46_v25  ;;  %v1380_v36 = vcombine.high %v49_v30, %v53_v31 }
  0x45   :  { %1087 = vmatprep.mubr.bf16.mxu1 %v1386_v37  ;;  %v1382_v37 = vcombine.high %v50_v32, %v54_v33 }
  0x4b   :  { %991 = vmatmul.mubr.bf16.gmra.mxu0 %v1383_v47  ;;  %v69_v47 = vld [vmem:[%s2445_s0 + $0x1b0] sm:$0xff] }
  0x4c   :  { %1088 = vmatmul.mubr.bf16.gmra.mxu1 %v1385_v49  ;;  %998 = vmatprep.mubr.bf16.mxu0 %v1392_v50  ;;  %v70_v49 = vld [vmem:[%s2445_s0 + $0x1b8] sm:$0xff]  ;;  %v1387_v50 = vcombine.low %v57_v38, %v61_v39 }
  0x4d   :  { %1095 = vmatprep.mubr.bf16.mxu1 %v1394_v52  ;;  %v1396_v52 = vcombine.high %v65_v46, %v69_v47  ;;  %v1398_v53 = vcombine.high %v66_v48, %v70_v49 }
  0x53   :  { %999 = vmatmul.mubr.bf16.gmra.mxu0 %v1391_v58  ;;  %v1395_v58 = vcombine.low %v65_v46, %v69_v47 }
  0x54   :  { %1096 = vmatmul.mubr.bf16.gmra.mxu1 %v1393_v59  ;;  %1006 = vmatprep.mubr.bf16.mxu0 %v1400_v60  ;;  %v1397_v59 = vcombine.low %v66_v48, %v70_v49  ;;  %v1404_v60 = vcombine.high %v73_v54, %v77_v55 }
  0x55   :  { %1103 = vmatprep.mubr.bf16.mxu1 %v1402_v61  ;;  %v1406_v61 = vcombine.high %v74_v56, %v78_v57 }
  0x5b   :  { %1007 = vmatmul.mubr.bf16.gmra.mxu0 %v1399_v2 }
  0x5c   :  { %1104 = vmatmul.mubr.bf16.gmra.mxu1 %v1401_v3  ;;  %1144 = vmatprep.mubr.bf16.mxu0 %v1348_v4 }
  0x5d   :  { %1241 = vmatprep.mubr.bf16.mxu1 %v1350_v5 }
  0x63   :  { %1145 = vmatmul.mubr.bf16.vlgmr.msra.gmra.mxu0 %v1347_v10 }
  0x64   :  { %1242 = vmatmul.mubr.bf16.vlgmr.msra.gmra.mxu1 %v1349_v11  ;;  %1152 = vmatprep.mubr.bf16.mxu0 %v1356_v12 }
  0x65   :  { %1249 = vmatprep.mubr.bf16.mxu1 %v1358_v13 }
  0x6b   :  { %1153 = vmatmul.mubr.bf16.gmra.mxu0 %v1355_v18 }
  0x6c   :  { %1250 = vmatmul.mubr.bf16.gmra.mxu1 %v1357_v19  ;;  %1160 = vmatprep.mubr.bf16.mxu0 %v1364_v20 }
  0x6d   :  { %1257 = vmatprep.mubr.bf16.mxu1 %v1366_v21 }
  0x73   :  { %1161 = vmatmul.mubr.bf16.gmra.mxu0 %v1363_v26 }
  0x74   :  { %1258 = vmatmul.mubr.bf16.gmra.mxu1 %v1365_v27  ;;  %1168 = vmatprep.mubr.bf16.mxu0 %v1372_v28 }
  0x75   :  { %1265 = vmatprep.mubr.bf16.mxu1 %v1374_v29 }
  0x7b   :  { %1169 = vmatmul.mubr.bf16.gmra.mxu0 %v1371_v34 }
  0x7c   :  { %1266 = vmatmul.mubr.bf16.gmra.mxu1 %v1373_v35  ;;  %1176 = vmatprep.mubr.bf16.mxu0 %v1380_v36 }
  0x7d   :  { %1273 = vmatprep.mubr.bf16.mxu1 %v1382_v37 }
  0x83   :  { %1177 = vmatmul.mubr.bf16.gmra.mxu0 %v1379_v42 }
  0x84   :  { %1274 = vmatmul.mubr.bf16.gmra.mxu1 %v1381_v43  ;;  %1184 = vmatprep.mubr.bf16.mxu0 %v1388_v44 }
  0x85   :  { %1281 = vmatprep.mubr.bf16.mxu1 %v1390_v45 }
  0x8b   :  { %1185 = vmatmul.mubr.bf16.gmra.mxu0 %v1387_v50 }
  0x8c   :  { %1282 = vmatmul.mubr.bf16.gmra.mxu1 %v1389_v51  ;;  %1192 = vmatprep.mubr.bf16.mxu0 %v1396_v52 }
  0x8d   :  { %1289 = vmatprep.mubr.bf16.mxu1 %v1398_v53 }
  0x93   :  { %1193 = vmatmul.mubr.bf16.gmra.mxu0 %v1395_v58 }
  0x94   :  { %1290 = vmatmul.mubr.bf16.gmra.mxu1 %v1397_v59  ;;  %1200 = vmatprep.mubr.bf16.mxu0 %v1404_v60 }
  0x95   :  { %1297 = vmatprep.mubr.bf16.mxu1 %v1406_v61  ;;  %v2310_v61 = vld [vmem:[%s2446_s2] ss:$0 sm:$0xff] }
  0x9b   :  { %1201 = vmatmul.mubr.bf16.gmra.mxu0 %v1403_v62 }
  0x9c   :  { %1298 = vmatmul.mubr.bf16.gmra.mxu1 %v1405_v63 }
  0xe3   :  { %v1487_v0 = vpop.f32.mrf.mxu0 }
  0xe4   :  { %v2195_v1 = vpop.f32.mrf.mxu1 }
  0xe5   :  { %v1488_v2 = vpop.f32.mrf.mxu0 }
  0xe6   :  { %v2197_v3 = vpop.f32.mrf.mxu1  ;;  %v1489_v59 = vadd.f32 %v1488_v2, %v1487_v0 }
  0xe7   :  { %v1490_v4 = vpop.f32.mrf.mxu0  ;;  %v1553_v0 = vadd.f32 %v2197_v3, %v2195_v1 }
  0xe8   :  { %v2199_v5 = vpop.f32.mrf.mxu1 }
  0xe9   :  { %v1491_v6 = vpop.f32.mrf.mxu0 }
  0xea   :  { %v2201_v7 = vpop.f32.mrf.mxu1 }
  0xeb   :  { %v2203_v8 = vpop.f32.mrf.mxu0 }
  0xec   :  { %v2205_v9 = vpop.f32.mrf.mxu1 }
  0xed   :  { %v2207_v10 = vpop.f32.mrf.mxu0 }
  0xee   :  { %v2209_v11 = vpop.f32.mrf.mxu1 }
  0xef   :  { %v2211_v12 = vpop.f32.mrf.mxu0 }
  0xf0   :  { %v2213_v13 = vpop.f32.mrf.mxu1 }
  0xf1   :  { %v2215_v14 = vpop.f32.mrf.mxu0 }
  0xf2   :  { %v2217_v15 = vpop.f32.mrf.mxu1  ;;  %v1498_v3 = vadd.f32 %v2215_v14, %v2211_v12 }
  0xf3   :  { %v2219_v16 = vpop.f32.mrf.mxu0 }
  0xf4   :  { %v2221_v17 = vpop.f32.mrf.mxu1 }
  0xf5   :  { %v2223_v18 = vpop.f32.mrf.mxu0 }
  0xf6   :  { %v2225_v19 = vpop.f32.mrf.mxu1 }
  0xf7   :  { %v2227_v20 = vpop.f32.mrf.mxu0 }
  0xf8   :  { %v2229_v21 = vpop.f32.mrf.mxu1 }
  0xf9   :  { %v2231_v22 = vpop.f32.mrf.mxu0 }
  0xfa   :  { %v2233_v23 = vpop.f32.mrf.mxu1 }
  0xfb   :  { %v2235_v24 = vpop.f32.mrf.mxu0 }
  0xfc   :  { %v2237_v25 = vpop.f32.mrf.mxu1 }
  0xfd   :  { %v2239_v26 = vpop.f32.mrf.mxu0 }
  0xfe   :  { %v2241_v27 = vpop.f32.mrf.mxu1 }
  0xff   :  { %v2243_v28 = vpop.f32.mrf.mxu0 }
 0x100   :  { %v2245_v29 = vpop.f32.mrf.mxu1 }
 0x101   :  { %v2247_v30 = vpop.f32.mrf.mxu0 }
 0x102   :  { %v2249_v31 = vpop.f32.mrf.mxu1 }
 0x103   :  { %v2251_v32 = vpop.f32.mrf.mxu0 }
 0x104   :  { %v2253_v33 = vpop.f32.mrf.mxu1 }
 0x105   :  { %v2255_v34 = vpop.f32.mrf.mxu0 }
 0x106   :  { %v2257_v35 = vpop.f32.mrf.mxu1 }
 0x107   :  { %v2259_v36 = vpop.f32.mrf.mxu0 }
 0x108   :  { %v2261_v37 = vpop.f32.mrf.mxu1 }
 0x109   :  { %v2263_v38 = vpop.f32.mrf.mxu0 }
 0x10a   :  { %v2265_v39 = vpop.f32.mrf.mxu1 }
 0x10b   :  { %v2267_v40 = vpop.f32.mrf.mxu0 }
 0x10c   :  { %v2269_v41 = vpop.f32.mrf.mxu1 }
 0x10d   :  { %v2271_v42 = vpop.f32.mrf.mxu0 }
 0x10e   :  { %v2273_v43 = vpop.f32.mrf.mxu1 }
 0x10f   :  { %v2275_v44 = vpop.f32.mrf.mxu0 }
 0x110   :  { %v2277_v45 = vpop.f32.mrf.mxu1 }
 0x111   :  { %v2279_v46 = vpop.f32.mrf.mxu0 }
 0x112   :  { %v2281_v47 = vpop.f32.mrf.mxu1 }
 0x113   :  { %2448 = vst [vmem:[#allocation2_spill] sm:$0xff] %v2281_v47  ;;  %v2283_v48 = vpop.f32.mrf.mxu0 }
 0x114   :  { %v2285_v49 = vpop.f32.mrf.mxu1 }
 0x115   :  { %2449 = vst [vmem:[#allocation3_spill] sm:$0xff] %v2285_v49  ;;  %v2287_v50 = vpop.f32.mrf.mxu0 }
 0x116   :  { %v2289_v51 = vpop.f32.mrf.mxu1 }
 0x117   :  { %2450 = vst [vmem:[#allocation4_spill] sm:$0xff] %v2289_v51  ;;  %v2291_v52 = vpop.f32.mrf.mxu0 }
 0x118   :  { %2451 = vst [vmem:[#allocation5_spill] sm:$0xff] %v2291_v52  ;;  %v2293_v53 = vpop.f32.mrf.mxu1 }
 0x119   :  { %2452 = vst [vmem:[#allocation6_spill] sm:$0xff] %v2293_v53  ;;  %v2295_v54 = vpop.f32.mrf.mxu0  ;;  %v1492_v53 = vadd.f32 %v1491_v6, %v1490_v4  ;;  %v1556_v6 = vadd.f32 %v2201_v7, %v2199_v5 }
 0x11a   :  { %2453 = vst [vmem:[#allocation7_spill] sm:$0xff] %v2295_v54  ;;  %v2297_v55 = vpop.f32.mrf.mxu1 }
 0x11b   :  { %2454 = vst [vmem:[#allocation8_spill] sm:$0xff] %v2297_v55  ;;  %v2299_v56 = vpop.f32.mrf.mxu0 }
 0x11c   :  { %2455 = vst [vmem:[#allocation9_spill] sm:$0xff] %v2299_v56  ;;  %v2301_v57 = vpop.f32.mrf.mxu1  ;;  %v953_v56 = vadd.f32 %v1489_v59, %v2310_v61 }
 0x11d   :  { %2456 = vst [vmem:[#allocation10_spill] sm:$0xff] %v2301_v57  ;;  %v2303_v58 = vpop.f32.mrf.mxu0 }
 0x11e   :  { %2457 = vst [vmem:[#allocation11_spill] sm:$0xff] %v2303_v58  ;;  %v2305_v60 = vpop.f32.mrf.mxu1  ;;  %v1050_v49 = vadd.f32 %v1553_v0, %v953_v56 }
 0x11f   :  { %2458 = vst [vmem:[#allocation12_spill] sm:$0xff] %v2305_v60  ;;  %v2312_v62 = vpop.f32.mrf.mxu0  ;;  %v956_v60 = vadd.f32 %v1492_v53, %v2310_v61 }
 0x120   :  { %2459 = vst [vmem:[#allocation13_spill] sm:$0xff] %v2312_v62  ;;  %v2314_v63 = vpop.f32.mrf.mxu1  ;;  %v1495_v62 = vadd.f32 %v2207_v10, %v2203_v8  ;;  %v1559_v10 = vadd.f32 %v2209_v11, %v2205_v9  ;;  %v1562_v9 = vadd.f32 %v2217_v15, %v2213_v13  ;;  %v1565_v13 = vadd.f32 %v2225_v19, %v2221_v17 }
 0x121   :  { %2460 = vst [vmem:[#allocation14_spill] sm:$0xff] %v2314_v63  ;;  %v2316_v55 = vpop.f32.mrf.mxu0  ;;  %v1053_v52 = vadd.f32 %v1556_v6, %v956_v60  ;;  %v1568_v19 = vadd.f32 %v2233_v23, %v2229_v21  ;;  %v1571_v21 = vadd.f32 %v2241_v27, %v2237_v25  ;;  %v1574_v25 = vadd.f32 %v2249_v31, %v2245_v29 }
 0x122   :  { %2461 = vst [vmem:[#allocation15_spill] sm:$0xff] %v2316_v55  ;;  %v2319_v57 = vpop.f32.mrf.mxu1  ;;  %v961_v1 = vadd.f32 %v1495_v62, %v2310_v61  ;;  %v964_v62 = vadd.f32 %v1498_v3, %v2310_v61  ;;  %v1577_v31 = vadd.f32 %v2257_v35, %v2253_v33  ;;  %v1580_v33 = vadd.f32 %v2265_v39, %v2261_v37 }
 0x123   :  { %2462 = vst [vmem:[#allocation16_spill] sm:$0xff] %v2319_v57  ;;  %v1615_v58 = vpop.f32.mrf.mxu0  ;;  %v1583_v37 = vadd.f32 %v2273_v43, %v2269_v41  ;;  %v2463_v43 = vld [vmem:[#allocation2_spill] sm:$0xff] }
 0x124   :  { %v1679_v2 = vpop.f32.mrf.mxu1 }
 0x125   :  { %v1616_v51 = vpop.f32.mrf.mxu0 }
 0x126   :  { %v1617_v63 = vadd.f32 %v1616_v51, %v1615_v58  ;;  %v1680_v4 = vpop.f32.mrf.mxu1  ;;  %v1501_v58 = vadd.f32 %v2223_v18, %v2219_v16 }
 0x127   :  { %v1618_v59 = vpop.f32.mrf.mxu0  ;;  %v1681_v57 = vadd.f32 %v1680_v4, %v1679_v2  ;;  %v1061_v2 = vadd.f32 %v1562_v9, %v964_v62  ;;  %v1504_v4 = vadd.f32 %v2231_v22, %v2227_v20  ;;  %v1507_v20 = vadd.f32 %v2239_v26, %v2235_v24 }
 0x128   :  { %v1147_v55 = vadd.f32 %v1617_v63, %v1050_v49  ;;  %v1682_v54 = vpop.f32.mrf.mxu1  ;;  %v1058_v63 = vadd.f32 %v1559_v10, %v961_v1  ;;  %v969_v16 = vadd.f32 %v1501_v58, %v2310_v61  ;;  %v1510_v62 = vadd.f32 %v2247_v30, %v2243_v28 }
 0x129   :  { %v1619_v47 = vpop.f32.mrf.mxu0  ;;  %v977_v26 = vadd.f32 %v1507_v20, %v2310_v61 }
 0x12a   :  { %v1244_v53 = vadd.f32 %v1681_v57, %v1147_v55  ;;  %v1620_v56 = vadd.f32 %v1619_v47, %v1618_v59  ;;  %v1683_v0 = vpop.f32.mrf.mxu1  ;;  %v980_v28 = vadd.f32 %v1510_v62, %v2310_v61 }
 0x12b   :  { %v1621_v8 = vpop.f32.mrf.mxu0  ;;  %v1684_v7 = vadd.f32 %v1683_v0, %v1682_v54 }
 0x12c   :  { %v1306_v51 = vmax.f32 %v1244_v53, 0.0  ;;  %v1150_v5 = vadd.f32 %v1620_v56, %v1053_v52  ;;  %v1685_v49 = vpop.f32.mrf.mxu1 }
 0x12d   :  { %v1622_v60 = vpop.f32.mrf.mxu0 }
 0x12e   :  { %1322 = vst [vmem:[%s2447_s3] sm:$0xff] %v1306_v51  ;;  %v1247_v12 = vadd.f32 %v1684_v7, %v1150_v5  ;;  %v1623_v14 = vadd.f32 %v1622_v60, %v1621_v8  ;;  %v1686_v47 = vpop.f32.mrf.mxu1  ;;  %v1066_v8 = vadd.f32 %v1565_v13, %v969_v16  ;;  %v972_v51 = vadd.f32 %v1504_v4, %v2310_v61 }
 0x12f   :  { %v1624_v55 = vpop.f32.mrf.mxu0  ;;  %v1687_v54 = vadd.f32 %v1686_v47, %v1685_v49  ;;  %v1513_v16 = vadd.f32 %v2255_v34, %v2251_v32  ;;  %v1516_v32 = vadd.f32 %v2263_v38, %v2259_v36 }
 0x130   :  { %v1307_v11 = vmax.f32 %v1247_v12, 0.0  ;;  %v1155_v52 = vadd.f32 %v1623_v14, %v1058_v63  ;;  %v1688_v57 = vpop.f32.mrf.mxu1  ;;  %v1069_v24 = vadd.f32 %v1568_v19, %v972_v51 }
 0x131   :  { %v1625_v18 = vpop.f32.mrf.mxu0  ;;  %v988_v38 = vadd.f32 %v1516_v32, %v2310_v61 }
 0x132   :  { %1323 = vst [vmem:[%s2447_s3 + $0x8] sm:$0xff] %v1307_v11  ;;  %v1252_v6 = vadd.f32 %v1687_v54, %v1155_v52  ;;  %v1626_v59 = vadd.f32 %v1625_v18, %v1624_v55  ;;  %v1689_v1 = vpop.f32.mrf.mxu1 }
 0x133   :  { %v1627_v15 = vpop.f32.mrf.mxu0  ;;  %v1690_v56 = vadd.f32 %v1689_v1, %v1688_v57  ;;  %v1074_v57 = vadd.f32 %v1571_v21, %v977_v26  ;;  %v1085_v62 = vadd.f32 %v1580_v33, %v988_v38  ;;  %v2470_v38 = vld [vmem:[#allocation6_spill] sm:$0xff] }
 0x134   :  { %v1308_v3 = vmax.f32 %v1252_v6, 0.0  ;;  %v1158_v53 = vadd.f32 %v1626_v59, %v1061_v2  ;;  %v1691_v0 = vpop.f32.mrf.mxu1 }
 0x135   :  { %v1628_v10 = vpop.f32.mrf.mxu0 }
 0x136   :  { %1324 = vst [vmem:[%s2447_s3 + $0x10] sm:$0xff] %v1308_v3  ;;  %v1255_v22 = vadd.f32 %v1690_v56, %v1158_v53  ;;  %v1629_v5 = vadd.f32 %v1628_v10, %v1627_v15  ;;  %v1692_v7 = vpop.f32.mrf.mxu1  ;;  %v1077_v15 = vadd.f32 %v1574_v25, %v980_v28  ;;  %v985_v53 = vadd.f32 %v1513_v16, %v2310_v61  ;;  %v2465_v25 = vld [vmem:[#allocation7_spill] sm:$0xff] }
 0x137   :  { %v1630_v17 = vpop.f32.mrf.mxu0  ;;  %v1693_v60 = vadd.f32 %v1692_v7, %v1691_v0 }
 0x138   :  { %v1309_v49 = vmax.f32 %v1255_v22, 0.0  ;;  %v1163_v58 = vadd.f32 %v1629_v5, %v1066_v8  ;;  %v1694_v63 = vpop.f32.mrf.mxu1  ;;  %v1519_v22 = vadd.f32 %v2271_v42, %v2267_v40  ;;  %v1082_v36 = vadd.f32 %v1577_v31, %v985_v53 }
 0x139   :  { %v1631_v12 = vpop.f32.mrf.mxu0 }
 0x13a   :  { %1325 = vst [vmem:[%s2447_s3 + $0x18] sm:$0xff] %v1309_v49  ;;  %v1260_v14 = vadd.f32 %v1693_v60, %v1163_v58  ;;  %v1632_v47 = vadd.f32 %v1631_v12, %v1630_v17  ;;  %v1695_v55 = vpop.f32.mrf.mxu1  ;;  %v993_v40 = vadd.f32 %v1519_v22, %v2310_v61  ;;  %v1522_v12 = vadd.f32 %v2279_v46, %v2275_v44 }
 0x13b   :  { %v1633_v9 = vpop.f32.mrf.mxu0  ;;  %v1696_v52 = vadd.f32 %v1695_v55, %v1694_v63  ;;  %v1525_v44 = vadd.f32 %v2287_v50, %v2283_v48 }
 0x13c   :  { %v1310_v23 = vmax.f32 %v1260_v14, 0.0  ;;  %v1166_v11 = vadd.f32 %v1632_v47, %v1069_v24  ;;  %v1697_v54 = vpop.f32.mrf.mxu1 }
 0x13d   :  { %v1634_v30 = vpop.f32.mrf.mxu0  ;;  %v1001_v50 = vadd.f32 %v1525_v44, %v2310_v61 }
 0x13e   :  { %1326 = vst [vmem:[%s2447_s3 + $0x20] sm:$0xff] %v1310_v23  ;;  %v1263_v18 = vadd.f32 %v1696_v52, %v1166_v11  ;;  %v1635_v2 = vadd.f32 %v1634_v30, %v1633_v9  ;;  %v1698_v4 = vpop.f32.mrf.mxu1  ;;  %v1090_v23 = vadd.f32 %v1583_v37, %v993_v40  ;;  %v996_v52 = vadd.f32 %v1522_v12, %v2310_v61 }
 0x13f   :  { %v1636_v27 = vpop.f32.mrf.mxu0  ;;  %v1699_v1 = vadd.f32 %v1698_v4, %v1697_v54  ;;  %v1586_v30 = vadd.f32 %v2463_v43, %v2277_v45  ;;  %v2464_v4 = vld [vmem:[#allocation5_spill] sm:$0xff]  ;;  %v2466_v45 = vld [vmem:[#allocation3_spill] sm:$0xff] }
 0x140   :  { %v1311_v6 = vmax.f32 %v1263_v18, 0.0  ;;  %v1171_v59 = vadd.f32 %v1635_v2, %v1074_v57  ;;  %v1700_v13 = vpop.f32.mrf.mxu1 }
 0x141   :  { %v1637_v3 = vpop.f32.mrf.mxu0  ;;  %v1093_v48 = vadd.f32 %v1586_v30, %v996_v52  ;;  %v2476_v30 = vld [vmem:[#allocation14_spill] sm:$0xff] }
 0x142   :  { %1327 = vst [vmem:[%s2447_s3 + $0x28] sm:$0xff] %v1311_v6  ;;  %v1268_v34 = vadd.f32 %v1699_v1, %v1171_v59  ;;  %v1638_v56 = vadd.f32 %v1637_v3, %v1636_v27  ;;  %v1701_v0 = vpop.f32.mrf.mxu1  ;;  %v1528_v27 = vadd.f32 %v2465_v25, %v2464_v4  ;;  %v2467_v3 = vld [vmem:[#allocation4_spill] sm:$0xff] }
 0x143   :  { %v1639_v29 = vpop.f32.mrf.mxu0  ;;  %v1702_v51 = vadd.f32 %v1701_v0, %v1700_v13  ;;  %v1589_v53 = vadd.f32 %v2467_v3, %v2466_v45 }
 0x144   :  { %v1312_v8 = vmax.f32 %v1268_v34, 0.0  ;;  %v1174_v10 = vadd.f32 %v1638_v56, %v1077_v15  ;;  %v1703_v20 = vpop.f32.mrf.mxu1 }
 0x145   :  { %v1640_v5 = vpop.f32.mrf.mxu0 }
 0x146   :  { %1328 = vst [vmem:[%s2447_s3 + $0x30] sm:$0xff] %v1312_v8  ;;  %v1271_v7 = vadd.f32 %v1702_v51, %v1174_v10  ;;  %v1641_v17 = vadd.f32 %v1640_v5, %v1639_v29  ;;  %v1704_v19 = vpop.f32.mrf.mxu1  ;;  %v1004_v29 = vadd.f32 %v1528_v27, %v2310_v61  ;;  %v1098_v8 = vadd.f32 %v1589_v53, %v1001_v50  ;;  %v2468_v10 = vld [vmem:[#allocation9_spill] sm:$0xff]  ;;  %v2469_v51 = vld [vmem:[#allocation11_spill] sm:$0xff] }
 0x147   :  { %v1642_v49 = vpop.f32.mrf.mxu0  ;;  %v1705_v60 = vadd.f32 %v1704_v19, %v1703_v20  ;;  %v1531_v20 = vadd.f32 %v2469_v51, %v2468_v10 }
 0x148   :  { %v1313_v35 = vmax.f32 %v1271_v7, 0.0  ;;  %v1179_v58 = vadd.f32 %v1641_v17, %v1082_v36  ;;  %v1706_v63 = vpop.f32.mrf.mxu1  ;;  %v2471_v7 = vld [vmem:[#allocation8_spill] sm:$0xff] }
 0x149   :  { %v1643_v42 = vpop.f32.mrf.mxu0  ;;  %v1592_v17 = vadd.f32 %v2471_v7, %v2470_v38  ;;  %v1009_v40 = vadd.f32 %v1531_v20, %v2310_v61 }
 0x14a   :  { %1329 = vst [vmem:[%s2447_s3 + $0x38] sm:$0xff] %v1313_v35  ;;  %v1276_v24 = vadd.f32 %v1705_v60, %v1179_v58  ;;  %v1644_v26 = vadd.f32 %v1643_v42, %v1642_v49  ;;  %v1707_v14 = vpop.f32.mrf.mxu1  ;;  %v2472_v42 = vld [vmem:[#allocation13_spill] sm:$0xff] }
 0x14b   :  { %v1645_v39 = vpop.f32.mrf.mxu0  ;;  %v1708_v9 = vadd.f32 %v1707_v14, %v1706_v63  ;;  %v1101_v60 = vadd.f32 %v1592_v17, %v1004_v29 }
 0x14c   :  { %v1314_v47 = vmax.f32 %v1276_v24, 0.0  ;;  %v1182_v55 = vadd.f32 %v1644_v26, %v1085_v62  ;;  %v1709_v21 = vpop.f32.mrf.mxu1  ;;  %v2473_v62 = vld [vmem:[#allocation15_spill] sm:$0xff] }
 0x14d   :  { %v1646_v11 = vpop.f32.mrf.mxu0  ;;  %v1534_v12 = vadd.f32 %v2473_v62, %v2472_v42 }
 0x14e   :  { %1330 = vst [vmem:[%s2447_s3 + $0x40] sm:$0xff] %v1314_v47  ;;  %v1279_v46 = vadd.f32 %v1708_v9, %v1182_v55  ;;  %v1647_v54 = vadd.f32 %v1646_v11, %v1645_v39  ;;  %v1710_v28 = vpop.f32.mrf.mxu1  ;;  %v2474_v39 = vld [vmem:[#allocation10_spill] sm:$0xff]  ;;  %v2475_v47 = vld [vmem:[#allocation12_spill] sm:$0xff] }
 0x14f   :  { %v1648_v41 = vpop.f32.mrf.mxu0  ;;  %v1711_v18 = vadd.f32 %v1710_v28, %v1709_v21  ;;  %v1595_v55 = vadd.f32 %v2475_v47, %v2474_v39 }
 0x150   :  { %v1315_v57 = vmax.f32 %v1279_v46, 0.0  ;;  %v1187_v16 = vadd.f32 %v1647_v54, %v1090_v23  ;;  %v1712_v2 = vpop.f32.mrf.mxu1  ;;  %v1012_v46 = vadd.f32 %v1534_v12, %v2310_v61 }
 0x151   :  { %v1649_v6 = vpop.f32.mrf.mxu0  ;;  %v1106_v44 = vadd.f32 %v1595_v55, %v1009_v40 }
 0x152   :  { %1331 = vst [vmem:[%s2447_s3 + $0x48] sm:$0xff] %v1315_v57  ;;  %v1284_v59 = vadd.f32 %v1711_v18, %v1187_v16  ;;  %v1650_v1 = vadd.f32 %v1649_v6, %v1648_v41  ;;  %v1713_v13 = vpop.f32.mrf.mxu1  ;;  %v2477_v57 = vld [vmem:[#allocation16_spill] sm:$0xff] }
 0x153   :  { %v1651_v15 = vpop.f32.mrf.mxu0  ;;  %v1714_v56 = vadd.f32 %v1713_v13, %v1712_v2  ;;  %v1598_v16 = vadd.f32 %v2477_v57, %v2476_v30 }
 0x154   :  { %v1316_v32 = vmax.f32 %v1284_v59, 0.0  ;;  %v1190_v34 = vadd.f32 %v1650_v1, %v1093_v48  ;;  %v1715_v0 = vpop.f32.mrf.mxu1 }
 0x155   :  { %v1652_v31 = vpop.f32.mrf.mxu0  ;;  %v1109_v6 = vadd.f32 %v1598_v16, %v1012_v46 }
 0x156   :  { %1332 = vst [vmem:[%s2447_s3 + $0x50] sm:$0xff] %v1316_v32  ;;  %v1287_v22 = vadd.f32 %v1714_v56, %v1190_v34  ;;  %v1653_v5 = vadd.f32 %v1652_v31, %v1651_v15  ;;  %v1716_v36 = vpop.f32.mrf.mxu1 }
 0x157   :  { %v1654_v19 = vpop.f32.mrf.mxu0  ;;  %v1717_v35 = vadd.f32 %v1716_v36, %v1715_v0 }
 0x158   :  { %v1317_v49 = vmax.f32 %v1287_v22, 0.0  ;;  %v1195_v33 = vadd.f32 %v1653_v5, %v1098_v8  ;;  %v1718_v58 = vpop.f32.mrf.mxu1 }
 0x159   :  { %v1655_v63 = vpop.f32.mrf.mxu0 }
 0x15a   :  { %1333 = vst [vmem:[%s2447_s3 + $0x58] sm:$0xff] %v1317_v49  ;;  %v1292_v24 = vadd.f32 %v1717_v35, %v1195_v33  ;;  %v1656_v26 = vadd.f32 %v1655_v63, %v1654_v19  ;;  %v1719_v14 = vpop.f32.mrf.mxu1 }
 0x15b   :  { %v1657_v37 = vpop.f32.mrf.mxu0  ;;  %v1720_v23 = vadd.f32 %v1719_v14, %v1718_v58 }
 0x15c   :  { %v1318_v9 = vmax.f32 %v1292_v24, 0.0  ;;  %v1198_v21 = vadd.f32 %v1656_v26, %v1101_v60  ;;  %v1721_v11 = vpop.f32.mrf.mxu1 }
 0x15d   :  { %v1658_v52 = vpop.f32.mrf.mxu0 }
 0x15e   :  { %1334 = vst [vmem:[%s2447_s3 + $0x60] sm:$0xff] %v1318_v9  ;;  %v1295_v54 = vadd.f32 %v1720_v23, %v1198_v21  ;;  %v1659_v28 = vadd.f32 %v1658_v52, %v1657_v37  ;;  %v1722_v41 = vpop.f32.mrf.mxu1 }
 0x15f   :  { %v1660_v43 = vpop.f32.mrf.mxu0  ;;  %v1723_v4 = vadd.f32 %v1722_v41, %v1721_v11 }
 0x160   :  { %v1319_v18 = vmax.f32 %v1295_v54, 0.0  ;;  %v1203_v2 = vadd.f32 %v1659_v28, %v1106_v44  ;;  %v1724_v25 = vpop.f32.mrf.mxu1 }
 0x161   :  { %v1661_v27 = vpop.f32.mrf.mxu0 }
 0x162   :  { %1335 = vst [vmem:[%s2447_s3 + $0x68] sm:$0xff] %v1319_v18  ;;  %v1300_v61 = vadd.f32 %v1723_v4, %v1203_v2  ;;  %v1662_v48 = vadd.f32 %v1661_v27, %v1660_v43  ;;  %v1725_v50 = vpop.f32.mrf.mxu1 }
 0x163   :  { %v1726_v13 = vadd.f32 %v1725_v50, %v1724_v25 }
 0x164   :  { %v1320_v59 = vmax.f32 %v1300_v61, 0.0  ;;  %v1206_v1 = vadd.f32 %v1662_v48, %v1109_v6 }
 0x166   :  { %1336 = vst [vmem:[%s2447_s3 + $0x70] sm:$0xff] %v1320_v59  ;;  %v1303_v15 = vadd.f32 %v1726_v13, %v1206_v1 }
 0x168   :  { %v1321_v45 = vmax.f32 %v1303_v15, 0.0 }
 0x16a   :  { %1337 = vst [vmem:[%s2447_s3 + $0x78] sm:$0xff] %v1321_v45 }

// kernel: vae_forward.16
= control target key start
LH: loop header
LB: loop body
LE: loop exit
PB: predicated region body
PF: predicated region fallthrough
CT: control target
= control target key end

     0   :  { %s1896_s12 = smov 0   ;;  %s1898_s13 = smov 0   ;;  %s2169_s0 = inlined_call_operand.vmem [shape: bf16[512,512], index: 0, kind: input, shape index: {}]   ;;  %s2170_s1 = inlined_call_operand.vmem [shape: bf16[512,128], index: 1, kind: input, shape index: {}]   ;;  %s2171_s2 = inlined_call_operand.vmem [shape: f32[1,128], index: 2, kind: input, shape index: {}]   ;;  %s2172_s3 = inlined_call_operand.vmem [shape: f32[512,128], index: 3, kind: output, shape index: {}]  }
   0x1   :  { %s1900_s14 = smov 0  }
   0x2 LB: > { %s25_s15 = sadd.s32 1, %s1870_s13  ;;  %p1370_p0 = scmp.ge.s32.totalorder %s1874_s14, 1  ;;  %s1874_s14 = sphi %s1900_s14, %s13_s14   ;;  %s1870_s13 = sphi %s1898_s13, %s2174_s13   ;;  %s1866_s12 = sphi %s1896_s12, %s2173_s12  }
   0x3   : > { %p27_p1 = scmp.ge.s32.totalorder %s25_s15, 2  ;;  %p170_p2 = scmp.lt.s32.totalorder %s1874_s14, 3 }
   0x5   : > { %s2176_s15 = smov (%p27_p1, %s25_s15), 0  ;;  %p171_p3 = pnand %p1370_p0, %p170_p2 }
   0x6   : > { %s1371_s25 = sshll.u32 (!%p171_p3), %s1866_s12, 5 }
   0x7   : > { %174 = sbr.rel (%p171_p3) target bundleno = 374 (0x176), region = 32  ;;  %p206_p4 = scmp.lt.s32.totalorder (!%p171_p3), %s1371_s25, 63 }
   0xc   : > { %v1724_v0 = vld [vmem:[%s2170_s1 + $0x78] sm:$0xff]   ;;  %v1728_v4 = vld [vmem:[%s2170_s1 + $0x70] sm:$0xff]   ;;  %v1732_v8 = vld [vmem:[%s2170_s1 + $0x68] sm:$0xff]   ;;  %s2178_s25 = smov (!%p206_p4, %s1371_s25), 63 }
   0xd   : > { %v1725_v1 = vld [vmem:[%s2170_s1 + $0xf8] sm:$0xff]   ;;  %1476 = vmatprep.subr.bf16.mxu0 %v1724_v0  ;;  %v1729_v5 = vld [vmem:[%s2170_s1 + $0xf0] sm:$0xff]   ;;  %v1733_v9 = vld [vmem:[%s2170_s1 + $0xe8] sm:$0xff]   ;;  %s1475_s24 = sshll.u32 %s2178_s25, 4  ;;  %s1375_s17 = sshll.u32 %s2178_s25, 3 }
   0xe   : > { %v1726_v2 = vld [vmem:[%s2170_s1 + $0x38] sm:$0xff]   ;;  %1588 = vmatprep.subr.bf16.mxu1 %v1725_v1  ;;  %v1730_v6 = vld [vmem:[%s2170_s1 + $0x30] sm:$0xff]   ;;  %v1734_v10 = vld [vmem:[%s2170_s1 + $0x28] sm:$0xff]   ;;  %s2013_s12 = scalar_lea.vmem %s2169_s0, %s1475_s24  ;;  %s2095_s20 = scalar_lea.vmem %s2172_s3, %s1375_s17 }
   0xf   : > { %v1727_v3 = vld [vmem:[%s2170_s1 + $0xb8] sm:$0xff]   ;;  %1477 = vmatpush3.bf16.msra.mxu0 %v1726_v2  ;;  %v1731_v7 = vld [vmem:[%s2170_s1 + $0xb0] sm:$0xff]   ;;  %v1735_v11 = vld [vmem:[%s2170_s1 + $0xa8] sm:$0xff]  }
  0x10   : > { %1589 = vmatpush3.bf16.msra.mxu1 %v1727_v3  ;;  %1478 = vmatprep.subr.bf16.mxu0 %v1728_v4  ;;  %v1736_v12 = vld [vmem:[%s2170_s1 + $0x60] sm:$0xff]   ;;  %v1740_v16 = vld [vmem:[%s2170_s1 + $0x58] sm:$0xff]   ;;  %v1744_v20 = vld [vmem:[%s2170_s1 + $0x50] sm:$0xff]  }
  0x11   : > { %1590 = vmatprep.subr.bf16.mxu1 %v1729_v5  ;;  %v1737_v13 = vld [vmem:[%s2170_s1 + $0xe0] sm:$0xff]   ;;  %v1741_v17 = vld [vmem:[%s2170_s1 + $0xd8] sm:$0xff]   ;;  %v1745_v21 = vld [vmem:[%s2170_s1 + $0xd0] sm:$0xff]  }
  0x12   : > { %v1738_v14 = vld [vmem:[%s2170_s1 + $0x20] sm:$0xff]   ;;  %v1742_v18 = vld [vmem:[%s2170_s1 + $0x18] sm:$0xff]   ;;  %v1746_v22 = vld [vmem:[%s2170_s1 + $0x10] sm:$0xff]  }
  0x13   : > { %1479 = vmatpush3.bf16.msra.mxu0 %v1730_v6  ;;  %v1739_v15 = vld [vmem:[%s2170_s1 + $0xa0] sm:$0xff]   ;;  %v1743_v19 = vld [vmem:[%s2170_s1 + $0x98] sm:$0xff]   ;;  %v1747_v23 = vld [vmem:[%s2170_s1 + $0x90] sm:$0xff]  }
  0x14   : > { %1591 = vmatpush3.bf16.msra.mxu1 %v1731_v7  ;;  %1480 = vmatprep.subr.bf16.mxu0 %v1732_v8  ;;  %v1748_v24 = vld [vmem:[%s2170_s1 + $0x48] sm:$0xff]   ;;  %v1752_v28 = vld [vmem:[%s2170_s1 + $0x40] sm:$0xff]  }
  0x15   : > { %1592 = vmatprep.subr.bf16.mxu1 %v1733_v9  ;;  %v1749_v25 = vld [vmem:[%s2170_s1 + $0xc8] sm:$0xff]   ;;  %v1753_v29 = vld [vmem:[%s2170_s1 + $0xc0] sm:$0xff]  }
  0x16   : > { %v1750_v26 = vld [vmem:[%s2170_s1 + $0x8] sm:$0xff]   ;;  %v1754_v30 = vld [vmem:[%s2170_s1] sm:$0xff]  }
  0x17   : > { %1481 = vmatpush3.bf16.msra.mxu0 %v1734_v10  ;;  %v1751_v27 = vld [vmem:[%s2170_s1 + $0x88] sm:$0xff]   ;;  %v1755_v31 = vld [vmem:[%s2170_s1 + $0x80] sm:$0xff]  }
  0x18   : > { %1593 = vmatpush3.bf16.msra.mxu1 %v1735_v11  ;;  %1482 = vmatprep.subr.bf16.mxu0 %v1736_v12  ;;  %v1756_v32 = vld [vmem:[%s2013_s12] ss:$16 sps:$4 sm:$0xff]   ;;  %v1758_v33 = vld [vmem:[%s2013_s12 + $0x4] ss:$16 sps:$4 sm:$0xff]   ;;  %v1759_v34 = vld [vmem:[%s2013_s12 + $0x8] ss:$16 sps:$4 sm:$0xff]  }
  0x19   : > { %1594 = vmatprep.subr.bf16.mxu1 %v1737_v13  ;;  %v1761_v35 = vld [vmem:[%s2013_s12 + $0xc] ss:$16 sps:$4 sm:$0xff]   ;;  %908 = vmatprep.mubr.bf16.mxu0 %v1758_v33  ;;  %v1762_v36 = vld [vmem:[%s2013_s12 + $0x24] ss:$16 sps:$4 sm:$0xff]   ;;  %v1766_v38 = vld [vmem:[%s2013_s12 + $0x20] ss:$16 sps:$4 sm:$0xff]  }
  0x1a   : > { %1069 = vmatprep.mubr.bf16.mxu1 %v1761_v35  ;;  %v1764_v37 = vld [vmem:[%s2013_s12 + $0x2c] ss:$16 sps:$4 sm:$0xff]   ;;  %v1767_v39 = vld [vmem:[%s2013_s12 + $0x28] ss:$16 sps:$4 sm:$0xff]   ;;  %v1768_v40 = vld [vmem:[%s2013_s12 + $0x44] ss:$16 sps:$4 sm:$0xff]  }
  0x1b   : > { %1483 = vmatpush3.bf16.msra.mxu0 %v1738_v14  ;;  %v1770_v41 = vld [vmem:[%s2013_s12 + $0x4c] ss:$16 sps:$4 sm:$0xff]   ;;  %v1772_v42 = vld [vmem:[%s2013_s12 + $0x40] ss:$16 sps:$4 sm:$0xff]   ;;  %v1773_v43 = vld [vmem:[%s2013_s12 + $0x48] ss:$16 sps:$4 sm:$0xff]  }
  0x1c   : > { %1595 = vmatpush3.bf16.msra.mxu1 %v1739_v15  ;;  %1484 = vmatprep.subr.bf16.mxu0 %v1740_v16  ;;  %v1774_v44 = vld [vmem:[%s2013_s12 + $0x64] ss:$16 sps:$4 sm:$0xff]   ;;  %v1776_v45 = vld [vmem:[%s2013_s12 + $0x6c] ss:$16 sps:$4 sm:$0xff]   ;;  %v1778_v46 = vld [vmem:[%s2013_s12 + $0x60] ss:$16 sps:$4 sm:$0xff]  }
  0x1d   : > { %1596 = vmatprep.subr.bf16.mxu1 %v1741_v17  ;;  %v1779_v47 = vld [vmem:[%s2013_s12 + $0x68] ss:$16 sps:$4 sm:$0xff]   ;;  %v1780_v48 = vld [vmem:[%s2013_s12 + $0x84] ss:$16 sps:$4 sm:$0xff]   ;;  %v1782_v49 = vld [vmem:[%s2013_s12 + $0x8c] ss:$16 sps:$4 sm:$0xff]  }
  0x1e   : > { %v1784_v50 = vld [vmem:[%s2013_s12 + $0x80] ss:$16 sps:$4 sm:$0xff]   ;;  %v1785_v51 = vld [vmem:[%s2013_s12 + $0x88] ss:$16 sps:$4 sm:$0xff]   ;;  %v1786_v52 = vld [vmem:[%s2013_s12 + $0xa4] ss:$16 sps:$4 sm:$0xff]  }
  0x1f   : > { %1485 = vmatpush3.bf16.msra.mxu0 %v1742_v18  ;;  %v1788_v53 = vld [vmem:[%s2013_s12 + $0xac] ss:$16 sps:$4 sm:$0xff]   ;;  %v1790_v54 = vld [vmem:[%s2013_s12 + $0xa0] ss:$16 sps:$4 sm:$0xff]   ;;  %v1791_v55 = vld [vmem:[%s2013_s12 + $0xa8] ss:$16 sps:$4 sm:$0xff]  }
  0x20   : > { %1597 = vmatpush3.bf16.msra.mxu1 %v1743_v19  ;;  %1486 = vmatprep.subr.bf16.mxu0 %v1744_v20  ;;  %v1792_v56 = vld [vmem:[%s2013_s12 + $0xc4] ss:$16 sps:$4 sm:$0xff]   ;;  %v1794_v57 = vld [vmem:[%s2013_s12 + $0xcc] ss:$16 sps:$4 sm:$0xff]   ;;  %v1796_v58 = vld [vmem:[%s2013_s12 + $0xc0] ss:$16 sps:$4 sm:$0xff]  }
  0x21   : > { %1598 = vmatprep.subr.bf16.mxu1 %v1745_v21  ;;  %v1797_v59 = vld [vmem:[%s2013_s12 + $0xc8] ss:$16 sps:$4 sm:$0xff]   ;;  %v1798_v60 = vld [vmem:[%s2013_s12 + $0xe4] ss:$16 sps:$4 sm:$0xff]   ;;  %v1800_v61 = vld [vmem:[%s2013_s12 + $0xec] ss:$16 sps:$4 sm:$0xff]  }
  0x22   : > { %v1802_v62 = vld [vmem:[%s2013_s12 + $0xe0] ss:$16 sps:$4 sm:$0xff]   ;;  %v1803_v63 = vld [vmem:[%s2013_s12 + $0xe8] ss:$16 sps:$4 sm:$0xff]   ;;  %v1804_v0 = vld [vmem:[%s2013_s12 + $0x104] ss:$16 sps:$4 sm:$0xff]  }
  0x23   : > { %1487 = vmatpush3.bf16.msra.mxu0 %v1746_v22  ;;  %v1806_v1 = vld [vmem:[%s2013_s12 + $0x10c] ss:$16 sps:$4 sm:$0xff]   ;;  %v1808_v2 = vld [vmem:[%s2013_s12 + $0x100] ss:$16 sps:$4 sm:$0xff]   ;;  %v1809_v3 = vld [vmem:[%s2013_s12 + $0x108] ss:$16 sps:$4 sm:$0xff]  }
  0x24   : > { %1599 = vmatpush3.bf16.msra.mxu1 %v1747_v23  ;;  %1488 = vmatprep.subr.bf16.mxu0 %v1748_v24  ;;  %v1810_v4 = vld [vmem:[%s2013_s12 + $0x124] ss:$16 sps:$4 sm:$0xff]   ;;  %v1812_v5 = vld [vmem:[%s2013_s12 + $0x12c] ss:$16 sps:$4 sm:$0xff]   ;;  %v1814_v6 = vld [vmem:[%s2013_s12 + $0x120] ss:$16 sps:$4 sm:$0xff]  }
  0x25   : > { %1600 = vmatprep.subr.bf16.mxu1 %v1749_v25  ;;  %v1815_v7 = vld [vmem:[%s2013_s12 + $0x128] ss:$16 sps:$4 sm:$0xff]   ;;  %v1816_v8 = vld [vmem:[%s2013_s12 + $0x144] ss:$16 sps:$4 sm:$0xff]   ;;  %v1818_v9 = vld [vmem:[%s2013_s12 + $0x14c] ss:$16 sps:$4 sm:$0xff]  }
  0x26   : > { %v1820_v10 = vld [vmem:[%s2013_s12 + $0x140] ss:$16 sps:$4 sm:$0xff]   ;;  %v1821_v11 = vld [vmem:[%s2013_s12 + $0x148] ss:$16 sps:$4 sm:$0xff]   ;;  %v1822_v12 = vld [vmem:[%s2013_s12 + $0x164] ss:$16 sps:$4 sm:$0xff]  }
  0x27   : > { %1489 = vmatpush3.bf16.msra.mxu0 %v1750_v26  ;;  %v1824_v13 = vld [vmem:[%s2013_s12 + $0x16c] ss:$16 sps:$4 sm:$0xff]   ;;  %v1826_v14 = vld [vmem:[%s2013_s12 + $0x160] ss:$16 sps:$4 sm:$0xff]   ;;  %v1827_v15 = vld [vmem:[%s2013_s12 + $0x168] ss:$16 sps:$4 sm:$0xff]  }
  0x28   : > { %1601 = vmatpush3.bf16.msra.mxu1 %v1751_v27  ;;  %1490 = vmatprep.subr.bf16.mxu0 %v1752_v28  ;;  %v1828_v16 = vld [vmem:[%s2013_s12 + $0x184] ss:$16 sps:$4 sm:$0xff]   ;;  %v1830_v17 = vld [vmem:[%s2013_s12 + $0x18c] ss:$16 sps:$4 sm:$0xff]   ;;  %v1832_v18 = vld [vmem:[%s2013_s12 + $0x180] ss:$16 sps:$4 sm:$0xff]  }
  0x29   : > { %1602 = vmatprep.subr.bf16.mxu1 %v1753_v29  ;;  %v1833_v19 = vld [vmem:[%s2013_s12 + $0x188] ss:$16 sps:$4 sm:$0xff]   ;;  %v1834_v20 = vld [vmem:[%s2013_s12 + $0x1a4] ss:$16 sps:$4 sm:$0xff]   ;;  %v1836_v21 = vld [vmem:[%s2013_s12 + $0x1ac] ss:$16 sps:$4 sm:$0xff]  }
  0x2a   : > { %v1838_v22 = vld [vmem:[%s2013_s12 + $0x1a0] ss:$16 sps:$4 sm:$0xff]   ;;  %v1839_v23 = vld [vmem:[%s2013_s12 + $0x1a8] ss:$16 sps:$4 sm:$0xff]   ;;  %v1840_v24 = vld [vmem:[%s2013_s12 + $0x1c4] ss:$16 sps:$4 sm:$0xff]  }
  0x2b   : > { %1491 = vmatpush3.bf16.msra.mxu0 %v1754_v30  ;;  %v1842_v25 = vld [vmem:[%s2013_s12 + $0x1cc] ss:$16 sps:$4 sm:$0xff]   ;;  %v1844_v26 = vld [vmem:[%s2013_s12 + $0x1c0] ss:$16 sps:$4 sm:$0xff]   ;;  %v1845_v27 = vld [vmem:[%s2013_s12 + $0x1c8] ss:$16 sps:$4 sm:$0xff]  }
  0x2c   : > { %1603 = vmatpush3.bf16.msra.mxu1 %v1755_v31  ;;  %v1846_v28 = vld [vmem:[%s2013_s12 + $0x1e4] ss:$16 sps:$4 sm:$0xff]   ;;  %v1848_v29 = vld [vmem:[%s2013_s12 + $0x1ec] ss:$16 sps:$4 sm:$0xff]   ;;  %v1850_v30 = vld [vmem:[%s2013_s12 + $0x1e0] ss:$16 sps:$4 sm:$0xff]  }
  0x2d   : > { %v1851_v31 = vld [vmem:[%s2013_s12 + $0x1e8] ss:$16 sps:$4 sm:$0xff]  }
  0x2e   : > { %909 = vmatmul.mubr.bf16.vlgmr.msra.gmra.mxu0 %v1756_v32 }
  0x2f   : > { %1070 = vmatmul.mubr.bf16.vlgmr.msra.gmra.mxu1 %v1759_v34  ;;  %916 = vmatprep.mubr.bf16.mxu0 %v1762_v36  ;;  %v2088_v34 = vld [vmem:[%s2171_s2] ss:$0 sm:$0xff] }
  0x30   : > { %1077 = vmatprep.mubr.bf16.mxu1 %v1764_v37 }
  0x36   : > { %917 = vmatmul.mubr.bf16.gmra.mxu0 %v1766_v38 }
  0x37   : > { %1078 = vmatmul.mubr.bf16.gmra.mxu1 %v1767_v39  ;;  %924 = vmatprep.mubr.bf16.mxu0 %v1768_v40 }
  0x38   : > { %1085 = vmatprep.mubr.bf16.mxu1 %v1770_v41 }
  0x3e   : > { %925 = vmatmul.mubr.bf16.gmra.mxu0 %v1772_v42 }
  0x3f   : > { %1086 = vmatmul.mubr.bf16.gmra.mxu1 %v1773_v43  ;;  %932 = vmatprep.mubr.bf16.mxu0 %v1774_v44 }
  0x40   : > { %1093 = vmatprep.mubr.bf16.mxu1 %v1776_v45 }
  0x46   : > { %933 = vmatmul.mubr.bf16.gmra.mxu0 %v1778_v46 }
  0x47   : > { %1094 = vmatmul.mubr.bf16.gmra.mxu1 %v1779_v47  ;;  %940 = vmatprep.mubr.bf16.mxu0 %v1780_v48 }
  0x48   : > { %1101 = vmatprep.mubr.bf16.mxu1 %v1782_v49 }
  0x4e   : > { %941 = vmatmul.mubr.bf16.gmra.mxu0 %v1784_v50 }
  0x4f   : > { %1102 = vmatmul.mubr.bf16.gmra.mxu1 %v1785_v51  ;;  %948 = vmatprep.mubr.bf16.mxu0 %v1786_v52 }
  0x50   : > { %1109 = vmatprep.mubr.bf16.mxu1 %v1788_v53 }
  0x56   : > { %949 = vmatmul.mubr.bf16.gmra.mxu0 %v1790_v54 }
  0x57   : > { %1110 = vmatmul.mubr.bf16.gmra.mxu1 %v1791_v55  ;;  %956 = vmatprep.mubr.bf16.mxu0 %v1792_v56 }
  0x58   : > { %1117 = vmatprep.mubr.bf16.mxu1 %v1794_v57 }
  0x5e   : > { %957 = vmatmul.mubr.bf16.gmra.mxu0 %v1796_v58 }
  0x5f   : > { %1118 = vmatmul.mubr.bf16.gmra.mxu1 %v1797_v59  ;;  %964 = vmatprep.mubr.bf16.mxu0 %v1798_v60 }
  0x60   : > { %1125 = vmatprep.mubr.bf16.mxu1 %v1800_v61 }
  0x66   : > { %965 = vmatmul.mubr.bf16.gmra.mxu0 %v1802_v62 }
  0x67   : > { %1126 = vmatmul.mubr.bf16.gmra.mxu1 %v1803_v63  ;;  %972 = vmatprep.mubr.bf16.mxu0 %v1804_v0 }
  0x68   : > { %1133 = vmatprep.mubr.bf16.mxu1 %v1806_v1 }
  0x6e   : > { %973 = vmatmul.mubr.bf16.gmra.mxu0 %v1808_v2 }
  0x6f   : > { %1134 = vmatmul.mubr.bf16.gmra.mxu1 %v1809_v3  ;;  %980 = vmatprep.mubr.bf16.mxu0 %v1810_v4 }
  0x70   : > { %1141 = vmatprep.mubr.bf16.mxu1 %v1812_v5 }
  0x76   : > { %981 = vmatmul.mubr.bf16.gmra.mxu0 %v1814_v6 }
  0x77   : > { %1142 = vmatmul.mubr.bf16.gmra.mxu1 %v1815_v7  ;;  %988 = vmatprep.mubr.bf16.mxu0 %v1816_v8 }
  0x78   : > { %1149 = vmatprep.mubr.bf16.mxu1 %v1818_v9 }
  0x7e   : > { %989 = vmatmul.mubr.bf16.gmra.mxu0 %v1820_v10 }
  0x7f   : > { %1150 = vmatmul.mubr.bf16.gmra.mxu1 %v1821_v11  ;;  %996 = vmatprep.mubr.bf16.mxu0 %v1822_v12 }
  0x80   : > { %1157 = vmatprep.mubr.bf16.mxu1 %v1824_v13 }
  0x86   : > { %997 = vmatmul.mubr.bf16.gmra.mxu0 %v1826_v14 }
  0x87   : > { %1158 = vmatmul.mubr.bf16.gmra.mxu1 %v1827_v15  ;;  %1004 = vmatprep.mubr.bf16.mxu0 %v1828_v16 }
  0x88   : > { %1165 = vmatprep.mubr.bf16.mxu1 %v1830_v17 }
  0x8e   : > { %1005 = vmatmul.mubr.bf16.gmra.mxu0 %v1832_v18 }
  0x8f   : > { %1166 = vmatmul.mubr.bf16.gmra.mxu1 %v1833_v19  ;;  %1012 = vmatprep.mubr.bf16.mxu0 %v1834_v20 }
  0x90   : > { %1173 = vmatprep.mubr.bf16.mxu1 %v1836_v21 }
  0x96   : > { %1013 = vmatmul.mubr.bf16.gmra.mxu0 %v1838_v22 }
  0x97   : > { %1174 = vmatmul.mubr.bf16.gmra.mxu1 %v1839_v23  ;;  %1020 = vmatprep.mubr.bf16.mxu0 %v1840_v24 }
  0x98   : > { %1181 = vmatprep.mubr.bf16.mxu1 %v1842_v25 }
  0x9e   : > { %1021 = vmatmul.mubr.bf16.gmra.mxu0 %v1844_v26 }
  0x9f   : > { %1182 = vmatmul.mubr.bf16.gmra.mxu1 %v1845_v27  ;;  %1028 = vmatprep.mubr.bf16.mxu0 %v1846_v28 }
  0xa0   : > { %1189 = vmatprep.mubr.bf16.mxu1 %v1848_v29 }
  0xa6   : > { %1029 = vmatmul.mubr.bf16.gmra.mxu0 %v1850_v30 }
  0xa7   : > { %1190 = vmatmul.mubr.bf16.gmra.mxu1 %v1851_v31 }
  0xee   : > { %v1492_v32 = vpop.f32.mrf.mxu0 }
  0xef   : > { %v1604_v33 = vpop.f32.mrf.mxu1 }
  0xf0   : > { %v1493_v35 = vpop.f32.mrf.mxu0 }
  0xf1   : > { %v1494_v36 = vadd.f32 %v1493_v35, %v1492_v32  ;;  %v1605_v37 = vpop.f32.mrf.mxu1 }
  0xf2   : > { %v1495_v38 = vpop.f32.mrf.mxu0  ;;  %v1606_v40 = vadd.f32 %v1605_v37, %v1604_v33 }
  0xf3   : > { %v911_v39 = vadd.f32 %v1494_v36, %v2088_v34  ;;  %v1607_v41 = vpop.f32.mrf.mxu1 }
  0xf4   : > { %v1496_v42 = vpop.f32.mrf.mxu0 }
  0xf5   : > { %v1072_v43 = vadd.f32 %v1606_v40, %v911_v39  ;;  %v1497_v44 = vadd.f32 %v1496_v42, %v1495_v38  ;;  %v1608_v45 = vpop.f32.mrf.mxu1 }
  0xf6   : > { %v1498_v46 = vpop.f32.mrf.mxu0  ;;  %v1609_v49 = vadd.f32 %v1608_v45, %v1607_v41 }
  0xf7   : > { %v1198_v47 = vmax.f32 %v1072_v43, 0.0  ;;  %v914_v48 = vadd.f32 %v1497_v44, %v2088_v34  ;;  %v1610_v50 = vpop.f32.mrf.mxu1 }
  0xf8   : > { %v1499_v51 = vpop.f32.mrf.mxu0 }
  0xf9   : > { %1230 = vst [vmem:[%s2095_s20] sm:$0xff] %v1198_v47  ;;  %v1075_v52 = vadd.f32 %v1609_v49, %v914_v48  ;;  %v1500_v53 = vadd.f32 %v1499_v51, %v1498_v46  ;;  %v1611_v54 = vpop.f32.mrf.mxu1 }
  0xfa   : > { %v1501_v55 = vpop.f32.mrf.mxu0  ;;  %v1612_v58 = vadd.f32 %v1611_v54, %v1610_v50 }
  0xfb   : > { %v1199_v56 = vmax.f32 %v1075_v52, 0.0  ;;  %v919_v57 = vadd.f32 %v1500_v53, %v2088_v34  ;;  %v1613_v59 = vpop.f32.mrf.mxu1 }
  0xfc   : > { %v1502_v60 = vpop.f32.mrf.mxu0 }
  0xfd   : > { %1231 = vst [vmem:[%s2095_s20 + $0x8] sm:$0xff] %v1199_v56  ;;  %v1080_v61 = vadd.f32 %v1612_v58, %v919_v57  ;;  %v1503_v62 = vadd.f32 %v1502_v60, %v1501_v55  ;;  %v1614_v63 = vpop.f32.mrf.mxu1 }
  0xfe   : > { %v1504_v0 = vpop.f32.mrf.mxu0  ;;  %v1615_v3 = vadd.f32 %v1614_v63, %v1613_v59 }
  0xff   : > { %v1200_v1 = vmax.f32 %v1080_v61, 0.0  ;;  %v922_v2 = vadd.f32 %v1503_v62, %v2088_v34  ;;  %v1616_v4 = vpop.f32.mrf.mxu1 }
 0x100   : > { %v1505_v5 = vpop.f32.mrf.mxu0 }
 0x101   : > { %1232 = vst [vmem:[%s2095_s20 + $0x10] sm:$0xff] %v1200_v1  ;;  %v1083_v6 = vadd.f32 %v1615_v3, %v922_v2  ;;  %v1506_v7 = vadd.f32 %v1505_v5, %v1504_v0  ;;  %v1617_v8 = vpop.f32.mrf.mxu1 }
 0x102   : > { %v1507_v9 = vpop.f32.mrf.mxu0  ;;  %v1618_v12 = vadd.f32 %v1617_v8, %v1616_v4 }
 0x103   : > { %v1201_v10 = vmax.f32 %v1083_v6, 0.0  ;;  %v927_v11 = vadd.f32 %v1506_v7, %v2088_v34  ;;  %v1619_v13 = vpop.f32.mrf.mxu1 }
 0x104   : > { %v1508_v14 = vpop.f32.mrf.mxu0 }
 0x105   : > { %1233 = vst [vmem:[%s2095_s20 + $0x18] sm:$0xff] %v1201_v10  ;;  %v1088_v15 = vadd.f32 %v1618_v12, %v927_v11  ;;  %v1509_v16 = vadd.f32 %v1508_v14, %v1507_v9  ;;  %v1620_v17 = vpop.f32.mrf.mxu1 }
 0x106   : > { %v1510_v18 = vpop.f32.mrf.mxu0  ;;  %v1621_v21 = vadd.f32 %v1620_v17, %v1619_v13 }
 0x107   : > { %v1202_v19 = vmax.f32 %v1088_v15, 0.0  ;;  %v930_v20 = vadd.f32 %v1509_v16, %v2088_v34  ;;  %v1622_v22 = vpop.f32.mrf.mxu1 }
 0x108   : > { %v1511_v23 = vpop.f32.mrf.mxu0 }
 0x109   : > { %1234 = vst [vmem:[%s2095_s20 + $0x20] sm:$0xff] %v1202_v19  ;;  %v1091_v24 = vadd.f32 %v1621_v21, %v930_v20  ;;  %v1512_v25 = vadd.f32 %v1511_v23, %v1510_v18  ;;  %v1623_v26 = vpop.f32.mrf.mxu1 }
 0x10a   : > { %v1513_v27 = vpop.f32.mrf.mxu0  ;;  %v1624_v30 = vadd.f32 %v1623_v26, %v1622_v22 }
 0x10b   : > { %v1203_v28 = vmax.f32 %v1091_v24, 0.0  ;;  %v935_v29 = vadd.f32 %v1512_v25, %v2088_v34  ;;  %v1625_v31 = vpop.f32.mrf.mxu1 }
 0x10c   : > { %v1514_v32 = vpop.f32.mrf.mxu0 }
 0x10d   : > { %1235 = vst [vmem:[%s2095_s20 + $0x28] sm:$0xff] %v1203_v28  ;;  %v1096_v33 = vadd.f32 %v1624_v30, %v935_v29  ;;  %v1515_v35 = vadd.f32 %v1514_v32, %v1513_v27  ;;  %v1626_v36 = vpop.f32.mrf.mxu1 }
 0x10e   : > { %v1516_v37 = vpop.f32.mrf.mxu0  ;;  %v1627_v40 = vadd.f32 %v1626_v36, %v1625_v31 }
 0x10f   : > { %v1204_v38 = vmax.f32 %v1096_v33, 0.0  ;;  %v938_v39 = vadd.f32 %v1515_v35, %v2088_v34  ;;  %v1628_v41 = vpop.f32.mrf.mxu1 }
 0x110   : > { %v1517_v42 = vpop.f32.mrf.mxu0 }
 0x111   : > { %1236 = vst [vmem:[%s2095_s20 + $0x30] sm:$0xff] %v1204_v38  ;;  %v1099_v43 = vadd.f32 %v1627_v40, %v938_v39  ;;  %v1518_v44 = vadd.f32 %v1517_v42, %v1516_v37  ;;  %v1629_v45 = vpop.f32.mrf.mxu1 }
 0x112   : > { %v1519_v46 = vpop.f32.mrf.mxu0  ;;  %v1630_v49 = vadd.f32 %v1629_v45, %v1628_v41 }
 0x113   : > { %v1205_v47 = vmax.f32 %v1099_v43, 0.0  ;;  %v943_v48 = vadd.f32 %v1518_v44, %v2088_v34  ;;  %v1631_v50 = vpop.f32.mrf.mxu1 }
 0x114   : > { %v1520_v51 = vpop.f32.mrf.mxu0 }
 0x115   : > { %1237 = vst [vmem:[%s2095_s20 + $0x38] sm:$0xff] %v1205_v47  ;;  %v1104_v52 = vadd.f32 %v1630_v49, %v943_v48  ;;  %v1521_v53 = vadd.f32 %v1520_v51, %v1519_v46  ;;  %v1632_v54 = vpop.f32.mrf.mxu1 }
 0x116   : > { %v1522_v55 = vpop.f32.mrf.mxu0  ;;  %v1633_v58 = vadd.f32 %v1632_v54, %v1631_v50 }
 0x117   : > { %v1206_v56 = vmax.f32 %v1104_v52, 0.0  ;;  %v946_v57 = vadd.f32 %v1521_v53, %v2088_v34  ;;  %v1634_v59 = vpop.f32.mrf.mxu1 }
 0x118   : > { %v1523_v60 = vpop.f32.mrf.mxu0 }
 0x119   : > { %1238 = vst [vmem:[%s2095_s20 + $0x40] sm:$0xff] %v1206_v56  ;;  %v1107_v61 = vadd.f32 %v1633_v58, %v946_v57  ;;  %v1524_v62 = vadd.f32 %v1523_v60, %v1522_v55  ;;  %v1635_v63 = vpop.f32.mrf.mxu1 }
 0x11a   : > { %v1525_v0 = vpop.f32.mrf.mxu0  ;;  %v1636_v3 = vadd.f32 %v1635_v63, %v1634_v59 }
 0x11b   : > { %v1207_v1 = vmax.f32 %v1107_v61, 0.0  ;;  %v951_v2 = vadd.f32 %v1524_v62, %v2088_v34  ;;  %v1637_v4 = vpop.f32.mrf.mxu1 }
 0x11c   : > { %v1526_v5 = vpop.f32.mrf.mxu0 }
 0x11d   : > { %1239 = vst [vmem:[%s2095_s20 + $0x48] sm:$0xff] %v1207_v1  ;;  %v1112_v6 = vadd.f32 %v1636_v3, %v951_v2  ;;  %v1527_v7 = vadd.f32 %v1526_v5, %v1525_v0  ;;  %v1638_v8 = vpop.f32.mrf.mxu1 }
 0x11e   : > { %v1528_v9 = vpop.f32.mrf.mxu0  ;;  %v1639_v12 = vadd.f32 %v1638_v8, %v1637_v4 }
 0x11f   : > { %v1208_v10 = vmax.f32 %v1112_v6, 0.0  ;;  %v954_v11 = vadd.f32 %v1527_v7, %v2088_v34  ;;  %v1640_v13 = vpop.f32.mrf.mxu1 }
 0x120   : > { %v1529_v14 = vpop.f32.mrf.mxu0 }
 0x121   : > { %1240 = vst [vmem:[%s2095_s20 + $0x50] sm:$0xff] %v1208_v10  ;;  %v1115_v15 = vadd.f32 %v1639_v12, %v954_v11  ;;  %v1530_v16 = vadd.f32 %v1529_v14, %v1528_v9  ;;  %v1641_v17 = vpop.f32.mrf.mxu1 }
 0x122   : > { %v1531_v18 = vpop.f32.mrf.mxu0  ;;  %v1642_v21 = vadd.f32 %v1641_v17, %v1640_v13 }
 0x123   : > { %v1209_v19 = vmax.f32 %v1115_v15, 0.0  ;;  %v959_v20 = vadd.f32 %v1530_v16, %v2088_v34  ;;  %v1643_v22 = vpop.f32.mrf.mxu1 }
 0x124   : > { %v1532_v23 = vpop.f32.mrf.mxu0 }
 0x125   : > { %1241 = vst [vmem:[%s2095_s20 + $0x58] sm:$0xff] %v1209_v19  ;;  %v1120_v24 = vadd.f32 %v1642_v21, %v959_v20  ;;  %v1533_v25 = vadd.f32 %v1532_v23, %v1531_v18  ;;  %v1644_v26 = vpop.f32.mrf.mxu1 }
 0x126   : > { %v1534_v27 = vpop.f32.mrf.mxu0  ;;  %v1645_v30 = vadd.f32 %v1644_v26, %v1643_v22 }
 0x127   : > { %v1210_v28 = vmax.f32 %v1120_v24, 0.0  ;;  %v962_v29 = vadd.f32 %v1533_v25, %v2088_v34  ;;  %v1646_v31 = vpop.f32.mrf.mxu1 }
 0x128   : > { %v1535_v32 = vpop.f32.mrf.mxu0 }
 0x129   : > { %1242 = vst [vmem:[%s2095_s20 + $0x60] sm:$0xff] %v1210_v28  ;;  %v1123_v33 = vadd.f32 %v1645_v30, %v962_v29  ;;  %v1536_v35 = vadd.f32 %v1535_v32, %v1534_v27  ;;  %v1647_v36 = vpop.f32.mrf.mxu1 }
 0x12a   : > { %v1537_v37 = vpop.f32.mrf.mxu0  ;;  %v1648_v40 = vadd.f32 %v1647_v36, %v1646_v31 }
 0x12b   : > { %v1211_v38 = vmax.f32 %v1123_v33, 0.0  ;;  %v967_v39 = vadd.f32 %v1536_v35, %v2088_v34  ;;  %v1649_v41 = vpop.f32.mrf.mxu1 }
 0x12c   : > { %v1538_v42 = vpop.f32.mrf.mxu0 }
 0x12d   : > { %1243 = vst [vmem:[%s2095_s20 + $0x68] sm:$0xff] %v1211_v38  ;;  %v1128_v43 = vadd.f32 %v1648_v40, %v967_v39  ;;  %v1539_v44 = vadd.f32 %v1538_v42, %v1537_v37  ;;  %v1650_v45 = vpop.f32.mrf.mxu1 }
 0x12e   : > { %v1540_v46 = vpop.f32.mrf.mxu0  ;;  %v1651_v49 = vadd.f32 %v1650_v45, %v1649_v41 }
 0x12f   : > { %v1212_v47 = vmax.f32 %v1128_v43, 0.0  ;;  %v970_v48 = vadd.f32 %v1539_v44, %v2088_v34  ;;  %v1652_v50 = vpop.f32.mrf.mxu1 }
 0x130   : > { %v1541_v51 = vpop.f32.mrf.mxu0 }
 0x131   : > { %1244 = vst [vmem:[%s2095_s20 + $0x70] sm:$0xff] %v1212_v47  ;;  %v1131_v52 = vadd.f32 %v1651_v49, %v970_v48  ;;  %v1542_v53 = vadd.f32 %v1541_v51, %v1540_v46  ;;  %v1653_v54 = vpop.f32.mrf.mxu1 }
 0x132   : > { %v1543_v55 = vpop.f32.mrf.mxu0  ;;  %v1654_v58 = vadd.f32 %v1653_v54, %v1652_v50 }
 0x133   : > { %v1213_v56 = vmax.f32 %v1131_v52, 0.0  ;;  %v975_v57 = vadd.f32 %v1542_v53, %v2088_v34  ;;  %v1655_v59 = vpop.f32.mrf.mxu1 }
 0x134   : > { %v1544_v60 = vpop.f32.mrf.mxu0 }
 0x135   : > { %1245 = vst [vmem:[%s2095_s20 + $0x78] sm:$0xff] %v1213_v56  ;;  %v1136_v61 = vadd.f32 %v1654_v58, %v975_v57  ;;  %v1545_v62 = vadd.f32 %v1544_v60, %v1543_v55  ;;  %v1656_v63 = vpop.f32.mrf.mxu1 }
 0x136   : > { %v1546_v0 = vpop.f32.mrf.mxu0  ;;  %v1657_v3 = vadd.f32 %v1656_v63, %v1655_v59 }
 0x137   : > { %v1214_v1 = vmax.f32 %v1136_v61, 0.0  ;;  %v978_v2 = vadd.f32 %v1545_v62, %v2088_v34  ;;  %v1658_v4 = vpop.f32.mrf.mxu1 }
 0x138   : > { %v1547_v5 = vpop.f32.mrf.mxu0 }
 0x139   : > { %1246 = vst [vmem:[%s2095_s20 + $0x80] sm:$0xff] %v1214_v1  ;;  %v1139_v6 = vadd.f32 %v1657_v3, %v978_v2  ;;  %v1548_v7 = vadd.f32 %v1547_v5, %v1546_v0  ;;  %v1659_v8 = vpop.f32.mrf.mxu1 }
 0x13a   : > { %v1549_v9 = vpop.f32.mrf.mxu0  ;;  %v1660_v12 = vadd.f32 %v1659_v8, %v1658_v4 }
 0x13b   : > { %v1215_v10 = vmax.f32 %v1139_v6, 0.0  ;;  %v983_v11 = vadd.f32 %v1548_v7, %v2088_v34  ;;  %v1661_v13 = vpop.f32.mrf.mxu1 }
 0x13c   : > { %v1550_v14 = vpop.f32.mrf.mxu0 }
 0x13d   : > { %1247 = vst [vmem:[%s2095_s20 + $0x88] sm:$0xff] %v1215_v10  ;;  %v1144_v15 = vadd.f32 %v1660_v12, %v983_v11  ;;  %v1551_v16 = vadd.f32 %v1550_v14, %v1549_v9  ;;  %v1662_v17 = vpop.f32.mrf.mxu1 }
 0x13e   : > { %v1552_v18 = vpop.f32.mrf.mxu0  ;;  %v1663_v21 = vadd.f32 %v1662_v17, %v1661_v13 }
 0x13f   : > { %v1216_v19 = vmax.f32 %v1144_v15, 0.0  ;;  %v986_v20 = vadd.f32 %v1551_v16, %v2088_v34  ;;  %v1664_v22 = vpop.f32.mrf.mxu1 }
 0x140   : > { %v1553_v23 = vpop.f32.mrf.mxu0 }
 0x141   : > { %1248 = vst [vmem:[%s2095_s20 + $0x90] sm:$0xff] %v1216_v19  ;;  %v1147_v24 = vadd.f32 %v1663_v21, %v986_v20  ;;  %v1554_v25 = vadd.f32 %v1553_v23, %v1552_v18  ;;  %v1665_v26 = vpop.f32.mrf.mxu1 }
 0x142   : > { %v1555_v27 = vpop.f32.mrf.mxu0  ;;  %v1666_v30 = vadd.f32 %v1665_v26, %v1664_v22 }
 0x143   : > { %v1217_v28 = vmax.f32 %v1147_v24, 0.0  ;;  %v991_v29 = vadd.f32 %v1554_v25, %v2088_v34  ;;  %v1667_v31 = vpop.f32.mrf.mxu1 }
 0x144   : > { %v1556_v32 = vpop.f32.mrf.mxu0 }
 0x145   : > { %1249 = vst [vmem:[%s2095_s20 + $0x98] sm:$0xff] %v1217_v28  ;;  %v1152_v33 = vadd.f32 %v1666_v30, %v991_v29  ;;  %v1557_v35 = vadd.f32 %v1556_v32, %v1555_v27  ;;  %v1668_v36 = vpop.f32.mrf.mxu1 }
 0x146   : > { %v1558_v37 = vpop.f32.mrf.mxu0  ;;  %v1669_v40 = vadd.f32 %v1668_v36, %v1667_v31 }
 0x147   : > { %v1218_v38 = vmax.f32 %v1152_v33, 0.0  ;;  %v994_v39 = vadd.f32 %v1557_v35, %v2088_v34  ;;  %v1670_v41 = vpop.f32.mrf.mxu1 }
 0x148   : > { %v1559_v42 = vpop.f32.mrf.mxu0 }
 0x149   : > { %1250 = vst [vmem:[%s2095_s20 + $0xa0] sm:$0xff] %v1218_v38  ;;  %v1155_v43 = vadd.f32 %v1669_v40, %v994_v39  ;;  %v1560_v44 = vadd.f32 %v1559_v42, %v1558_v37  ;;  %v1671_v45 = vpop.f32.mrf.mxu1 }
 0x14a   : > { %v1561_v46 = vpop.f32.mrf.mxu0  ;;  %v1672_v49 = vadd.f32 %v1671_v45, %v1670_v41 }
 0x14b   : > { %v1219_v47 = vmax.f32 %v1155_v43, 0.0  ;;  %v999_v48 = vadd.f32 %v1560_v44, %v2088_v34  ;;  %v1673_v50 = vpop.f32.mrf.mxu1 }
 0x14c   : > { %v1562_v51 = vpop.f32.mrf.mxu0 }
 0x14d   : > { %1251 = vst [vmem:[%s2095_s20 + $0xa8] sm:$0xff] %v1219_v47  ;;  %v1160_v52 = vadd.f32 %v1672_v49, %v999_v48  ;;  %v1563_v53 = vadd.f32 %v1562_v51, %v1561_v46  ;;  %v1674_v54 = vpop.f32.mrf.mxu1 }
 0x14e   : > { %v1564_v55 = vpop.f32.mrf.mxu0  ;;  %v1675_v58 = vadd.f32 %v1674_v54, %v1673_v50 }
 0x14f   : > { %v1220_v56 = vmax.f32 %v1160_v52, 0.0  ;;  %v1002_v57 = vadd.f32 %v1563_v53, %v2088_v34  ;;  %v1676_v59 = vpop.f32.mrf.mxu1 }
 0x150   : > { %v1565_v60 = vpop.f32.mrf.mxu0 }
 0x151   : > { %1252 = vst [vmem:[%s2095_s20 + $0xb0] sm:$0xff] %v1220_v56  ;;  %v1163_v61 = vadd.f32 %v1675_v58, %v1002_v57  ;;  %v1566_v62 = vadd.f32 %v1565_v60, %v1564_v55  ;;  %v1677_v63 = vpop.f32.mrf.mxu1 }
 0x152   : > { %v1567_v0 = vpop.f32.mrf.mxu0  ;;  %v1678_v3 = vadd.f32 %v1677_v63, %v1676_v59 }
 0x153   : > { %v1221_v1 = vmax.f32 %v1163_v61, 0.0  ;;  %v1007_v2 = vadd.f32 %v1566_v62, %v2088_v34  ;;  %v1679_v4 = vpop.f32.mrf.mxu1 }
 0x154   : > { %v1568_v5 = vpop.f32.mrf.mxu0 }
 0x155   : > { %1253 = vst [vmem:[%s2095_s20 + $0xb8] sm:$0xff] %v1221_v1  ;;  %v1168_v6 = vadd.f32 %v1678_v3, %v1007_v2  ;;  %v1569_v7 = vadd.f32 %v1568_v5, %v1567_v0  ;;  %v1680_v8 = vpop.f32.mrf.mxu1 }
 0x156   : > { %v1570_v9 = vpop.f32.mrf.mxu0  ;;  %v1681_v12 = vadd.f32 %v1680_v8, %v1679_v4 }
 0x157   : > { %v1222_v10 = vmax.f32 %v1168_v6, 0.0  ;;  %v1010_v11 = vadd.f32 %v1569_v7, %v2088_v34  ;;  %v1682_v13 = vpop.f32.mrf.mxu1 }
 0x158   : > { %v1571_v14 = vpop.f32.mrf.mxu0 }
 0x159   : > { %1254 = vst [vmem:[%s2095_s20 + $0xc0] sm:$0xff] %v1222_v10  ;;  %v1171_v15 = vadd.f32 %v1681_v12, %v1010_v11  ;;  %v1572_v16 = vadd.f32 %v1571_v14, %v1570_v9  ;;  %v1683_v17 = vpop.f32.mrf.mxu1 }
 0x15a   : > { %v1573_v18 = vpop.f32.mrf.mxu0  ;;  %v1684_v21 = vadd.f32 %v1683_v17, %v1682_v13 }
 0x15b   : > { %v1223_v19 = vmax.f32 %v1171_v15, 0.0  ;;  %v1015_v20 = vadd.f32 %v1572_v16, %v2088_v34  ;;  %v1685_v22 = vpop.f32.mrf.mxu1 }
 0x15c   : > { %v1574_v23 = vpop.f32.mrf.mxu0 }
 0x15d   : > { %1255 = vst [vmem:[%s2095_s20 + $0xc8] sm:$0xff] %v1223_v19  ;;  %v1176_v24 = vadd.f32 %v1684_v21, %v1015_v20  ;;  %v1575_v25 = vadd.f32 %v1574_v23, %v1573_v18  ;;  %v1686_v26 = vpop.f32.mrf.mxu1 }
 0x15e   : > { %v1576_v27 = vpop.f32.mrf.mxu0  ;;  %v1687_v30 = vadd.f32 %v1686_v26, %v1685_v22 }
 0x15f   : > { %v1224_v28 = vmax.f32 %v1176_v24, 0.0  ;;  %v1018_v29 = vadd.f32 %v1575_v25, %v2088_v34  ;;  %v1688_v31 = vpop.f32.mrf.mxu1 }
 0x160   : > { %v1577_v32 = vpop.f32.mrf.mxu0 }
 0x161   : > { %1256 = vst [vmem:[%s2095_s20 + $0xd0] sm:$0xff] %v1224_v28  ;;  %v1179_v33 = vadd.f32 %v1687_v30, %v1018_v29  ;;  %v1578_v35 = vadd.f32 %v1577_v32, %v1576_v27  ;;  %v1689_v36 = vpop.f32.mrf.mxu1 }
 0x162   : > { %v1579_v37 = vpop.f32.mrf.mxu0  ;;  %v1690_v40 = vadd.f32 %v1689_v36, %v1688_v31 }
 0x163   : > { %v1225_v38 = vmax.f32 %v1179_v33, 0.0  ;;  %v1023_v39 = vadd.f32 %v1578_v35, %v2088_v34  ;;  %v1691_v41 = vpop.f32.mrf.mxu1 }
 0x164   : > { %v1580_v42 = vpop.f32.mrf.mxu0 }
 0x165   : > { %1257 = vst [vmem:[%s2095_s20 + $0xd8] sm:$0xff] %v1225_v38  ;;  %v1184_v43 = vadd.f32 %v1690_v40, %v1023_v39  ;;  %v1581_v44 = vadd.f32 %v1580_v42, %v1579_v37  ;;  %v1692_v45 = vpop.f32.mrf.mxu1 }
 0x166   : > { %v1582_v46 = vpop.f32.mrf.mxu0  ;;  %v1693_v49 = vadd.f32 %v1692_v45, %v1691_v41 }
 0x167   : > { %v1226_v47 = vmax.f32 %v1184_v43, 0.0  ;;  %v1026_v48 = vadd.f32 %v1581_v44, %v2088_v34  ;;  %v1694_v50 = vpop.f32.mrf.mxu1 }
 0x168   : > { %v1583_v51 = vpop.f32.mrf.mxu0 }
 0x169   : > { %1258 = vst [vmem:[%s2095_s20 + $0xe0] sm:$0xff] %v1226_v47  ;;  %v1187_v52 = vadd.f32 %v1693_v49, %v1026_v48  ;;  %v1584_v53 = vadd.f32 %v1583_v51, %v1582_v46  ;;  %v1695_v54 = vpop.f32.mrf.mxu1 }
 0x16a   : > { %v1585_v55 = vpop.f32.mrf.mxu0  ;;  %v1696_v58 = vadd.f32 %v1695_v54, %v1694_v50 }
 0x16b   : > { %v1227_v56 = vmax.f32 %v1187_v52, 0.0  ;;  %v1031_v57 = vadd.f32 %v1584_v53, %v2088_v34  ;;  %v1697_v59 = vpop.f32.mrf.mxu1 }
 0x16c   : > { %v1586_v60 = vpop.f32.mrf.mxu0 }
 0x16d   : > { %1259 = vst [vmem:[%s2095_s20 + $0xe8] sm:$0xff] %v1227_v56  ;;  %v1192_v61 = vadd.f32 %v1696_v58, %v1031_v57  ;;  %v1587_v62 = vadd.f32 %v1586_v60, %v1585_v55  ;;  %v1698_v63 = vpop.f32.mrf.mxu1 }
 0x16e   : > { %v1699_v2 = vadd.f32 %v1698_v63, %v1697_v59 }
 0x16f   : > { %v1228_v0 = vmax.f32 %v1192_v61, 0.0  ;;  %v1034_v1 = vadd.f32 %v1587_v62, %v2088_v34 }
 0x171   : > { %1260 = vst [vmem:[%s2095_s20 + $0xf0] sm:$0xff] %v1228_v0  ;;  %v1195_v3 = vadd.f32 %v1699_v2, %v1034_v1 }
 0x173   : > { %v1229_v4 = vmax.f32 %v1195_v3, 0.0 }
 0x175   : > { %1261 = vst [vmem:[%s2095_s20 + $0xf8] sm:$0xff] %v1229_v4 }
 0x176 PF: > { %s13_s14 = sadd.s32 1, %s1874_s14   ;;  %s2173_s12 = smov %s1870_s13 }
 0x177   : > { %p10_p5 = scmp.ge.s32.totalorder %s13_s14, 4   ;;  %s2174_s13 = smov %s2176_s15 }
 0x179   :  { %12 = sbr.rel (!%p10_p5) target bundleno = 2 (0x2), region = 68 }

// kernel: vae_forward.17
= control target key start
LH: loop header
LB: loop body
LE: loop exit
PB: predicated region body
PF: predicated region fallthrough
CT: control target
= control target key end

     0   :  { %s1271_s12 = smov 0   ;;  %s1273_s13 = smov 0   ;;  %s1464_s0 = inlined_call_operand.vmem [shape: bf16[2048,256], index: 0, kind: input, shape index: {}]   ;;  %s1465_s1 = inlined_call_operand.vmem [shape: bf16[256,128], index: 1, kind: input, shape index: {}]   ;;  %s1466_s2 = inlined_call_operand.vmem [shape: f32[1,128], index: 2, kind: input, shape index: {}]   ;;  %s1467_s3 = inlined_call_operand.vmem [shape: f32[2048,128], index: 3, kind: output, shape index: {}]  }
   0x1   :  { %s1275_s14 = smov 0  }
   0x2 LB: > { %s25_s15 = sadd.s32 1, %s1245_s13  ;;  %p889_p0 = scmp.ge.s32.totalorder %s1249_s14, 1  ;;  %s1249_s14 = sphi %s1275_s14, %s13_s14   ;;  %s1245_s13 = sphi %s1273_s13, %s1469_s13   ;;  %s1241_s12 = sphi %s1271_s12, %s1468_s12  }
   0x3   : > { %p27_p1 = scmp.ge.s32.totalorder %s25_s15, 8  ;;  %p170_p2 = scmp.lt.s32.totalorder %s1249_s14, 9 }
   0x5   : > { %s1471_s15 = smov (%p27_p1, %s25_s15), 0  ;;  %p171_p3 = pnand %p889_p0, %p170_p2 }
   0x6   : > { %s890_s18 = sshll.u32 (!%p171_p3), %s1241_s12, 5 }
   0x7   : > { %174 = sbr.rel (%p171_p3) target bundleno = 320 (0x140), region = 32  ;;  %p206_p4 = scmp.lt.s32.totalorder (!%p171_p3), %s890_s18, 255 }
   0xc   : > { %v1099_v0 = vld [vmem:[%s1465_s1 + $0x78] sm:$0xff]   ;;  %v1101_v2 = vld [vmem:[%s1465_s1 + $0x70] sm:$0xff]   ;;  %v1103_v4 = vld [vmem:[%s1465_s1 + $0x68] sm:$0xff]   ;;  %s1473_s18 = smov (!%p206_p4, %s890_s18), 255 }
   0xd   : > { %v1100_v1 = vld [vmem:[%s1465_s1 + $0x38] sm:$0xff]   ;;  %947 = vmatprep.subr.bf16.mxu0 %v1099_v0  ;;  %1059 = vmatprep.subr.bf16.mxu1 %v1099_v0  ;;  %v1102_v3 = vld [vmem:[%s1465_s1 + $0x30] sm:$0xff]   ;;  %v1104_v5 = vld [vmem:[%s1465_s1 + $0x28] sm:$0xff]   ;;  %s946_s6 = sshll.u32 %s1473_s18, 3 }
   0xe   : > { %948 = vmatpush3.bf16.msra.mxu0 %v1100_v1  ;;  %1067 = vmatpush3.bf16.msra.mxu1 %v1100_v1  ;;  %v1105_v6 = vld [vmem:[%s1465_s1 + $0x60] sm:$0xff]   ;;  %v1107_v8 = vld [vmem:[%s1465_s1 + $0x58] sm:$0xff]   ;;  %s1324_s11 = scalar_lea.vmem %s1464_s0, %s946_s6  ;;  %v1109_v10 = vld [vmem:[%s1465_s1 + $0x50] sm:$0xff]   ;;  %s1397_s8 = scalar_lea.vmem %s1467_s3, %s946_s6 }
   0xf   : > { %949 = vmatprep.subr.bf16.mxu0 %v1101_v2  ;;  %1060 = vmatprep.subr.bf16.mxu1 %v1101_v2  ;;  %v1106_v7 = vld [vmem:[%s1465_s1 + $0x20] sm:$0xff]   ;;  %v1108_v9 = vld [vmem:[%s1465_s1 + $0x18] sm:$0xff]   ;;  %v1110_v13 = vld [vmem:[%s1465_s1 + $0x10] sm:$0xff]  }
  0x10   : > { %v1117_v11 = vld [vmem:[%s1324_s11 + $0x4] ss:$8 sps:$4 sm:$0xff]   ;;  %v1115_v18 = vld [vmem:[%s1324_s11] ss:$8 sps:$4 sm:$0xff]   ;;  %v1121_v20 = vld [vmem:[%s1324_s11 + $0x14] ss:$8 sps:$4 sm:$0xff]  }
  0x11   : > { %v1120_v12 = vld [vmem:[%s1324_s11 + $0x84] ss:$8 sps:$4 sm:$0xff]   ;;  %588 = vmatprep.mubr.bf16.mxu0 %v1117_v11  ;;  %v1118_v19 = vld [vmem:[%s1324_s11 + $0x80] ss:$8 sps:$4 sm:$0xff]   ;;  %v1123_v21 = vld [vmem:[%s1324_s11 + $0x94] ss:$8 sps:$4 sm:$0xff]  }
  0x12   : > { %950 = vmatpush3.bf16.msra.mxu0 %v1102_v3  ;;  %1068 = vmatpush3.bf16.msra.mxu1 %v1102_v3  ;;  %v1111_v14 = vld [vmem:[%s1465_s1 + $0x48] sm:$0xff]   ;;  %v1113_v16 = vld [vmem:[%s1465_s1 + $0x40] sm:$0xff]   ;;  %v1125_v22 = vld [vmem:[%s1324_s11 + $0x10] ss:$8 sps:$4 sm:$0xff]  }
  0x13   : > { %951 = vmatprep.subr.bf16.mxu0 %v1103_v4  ;;  %1061 = vmatprep.subr.bf16.mxu1 %v1103_v4  ;;  %v1112_v15 = vld [vmem:[%s1465_s1 + $0x8] sm:$0xff]   ;;  %v1114_v17 = vld [vmem:[%s1465_s1] sm:$0xff]   ;;  %v1126_v23 = vld [vmem:[%s1324_s11 + $0x90] ss:$8 sps:$4 sm:$0xff]  }
  0x14   : > { %652 = vmatprep.mubr.bf16.mxu1 %v1120_v12  ;;  %v1127_v24 = vld [vmem:[%s1324_s11 + $0x24] ss:$8 sps:$4 sm:$0xff]   ;;  %v1131_v26 = vld [vmem:[%s1324_s11 + $0x20] ss:$8 sps:$4 sm:$0xff]   ;;  %v1133_v28 = vld [vmem:[%s1324_s11 + $0x34] ss:$8 sps:$4 sm:$0xff]  }
  0x15   : > { %v1129_v25 = vld [vmem:[%s1324_s11 + $0xa4] ss:$8 sps:$4 sm:$0xff]   ;;  %v1132_v27 = vld [vmem:[%s1324_s11 + $0xa0] ss:$8 sps:$4 sm:$0xff]   ;;  %v1135_v29 = vld [vmem:[%s1324_s11 + $0xb4] ss:$8 sps:$4 sm:$0xff]  }
  0x16   : > { %952 = vmatpush3.bf16.msra.mxu0 %v1104_v5  ;;  %1069 = vmatpush3.bf16.msra.mxu1 %v1104_v5  ;;  %v1137_v30 = vld [vmem:[%s1324_s11 + $0x30] ss:$8 sps:$4 sm:$0xff]   ;;  %v1139_v32 = vld [vmem:[%s1324_s11 + $0x44] ss:$8 sps:$4 sm:$0xff]   ;;  %v1143_v34 = vld [vmem:[%s1324_s11 + $0x40] ss:$8 sps:$4 sm:$0xff]  }
  0x17   : > { %953 = vmatprep.subr.bf16.mxu0 %v1105_v6  ;;  %1062 = vmatprep.subr.bf16.mxu1 %v1105_v6  ;;  %v1138_v31 = vld [vmem:[%s1324_s11 + $0xb0] ss:$8 sps:$4 sm:$0xff]   ;;  %v1141_v33 = vld [vmem:[%s1324_s11 + $0xc4] ss:$8 sps:$4 sm:$0xff]   ;;  %v1144_v35 = vld [vmem:[%s1324_s11 + $0xc0] ss:$8 sps:$4 sm:$0xff]  }
  0x18   : > { %v1145_v36 = vld [vmem:[%s1324_s11 + $0x54] ss:$8 sps:$4 sm:$0xff]   ;;  %v1149_v38 = vld [vmem:[%s1324_s11 + $0x50] ss:$8 sps:$4 sm:$0xff]   ;;  %v1151_v40 = vld [vmem:[%s1324_s11 + $0x64] ss:$8 sps:$4 sm:$0xff]  }
  0x19   : > { %v1147_v37 = vld [vmem:[%s1324_s11 + $0xd4] ss:$8 sps:$4 sm:$0xff]   ;;  %v1150_v39 = vld [vmem:[%s1324_s11 + $0xd0] ss:$8 sps:$4 sm:$0xff]   ;;  %v1153_v41 = vld [vmem:[%s1324_s11 + $0xe4] ss:$8 sps:$4 sm:$0xff]  }
  0x1a   : > { %954 = vmatpush3.bf16.msra.mxu0 %v1106_v7  ;;  %1070 = vmatpush3.bf16.msra.mxu1 %v1106_v7  ;;  %v1155_v42 = vld [vmem:[%s1324_s11 + $0x60] ss:$8 sps:$4 sm:$0xff]   ;;  %v1157_v44 = vld [vmem:[%s1324_s11 + $0x74] ss:$8 sps:$4 sm:$0xff]   ;;  %v1161_v46 = vld [vmem:[%s1324_s11 + $0x70] ss:$8 sps:$4 sm:$0xff]  }
  0x1b   : > { %955 = vmatprep.subr.bf16.mxu0 %v1107_v8  ;;  %1063 = vmatprep.subr.bf16.mxu1 %v1107_v8  ;;  %v1156_v43 = vld [vmem:[%s1324_s11 + $0xe0] ss:$8 sps:$4 sm:$0xff]   ;;  %v1159_v45 = vld [vmem:[%s1324_s11 + $0xf4] ss:$8 sps:$4 sm:$0xff]   ;;  %v1162_v47 = vld [vmem:[%s1324_s11 + $0xf0] ss:$8 sps:$4 sm:$0xff]  }
  0x1c   : > { %v1382_v50 = vld [vmem:[%s1466_s2] ss:$0 sm:$0xff] }
  0x1e   : > { %956 = vmatpush3.bf16.msra.mxu0 %v1108_v9  ;;  %1071 = vmatpush3.bf16.msra.mxu1 %v1108_v9 }
  0x1f   : > { %957 = vmatprep.subr.bf16.mxu0 %v1109_v10  ;;  %1064 = vmatprep.subr.bf16.mxu1 %v1109_v10 }
  0x22   : > { %958 = vmatpush3.bf16.msra.mxu0 %v1110_v13  ;;  %1072 = vmatpush3.bf16.msra.mxu1 %v1110_v13 }
  0x23   : > { %959 = vmatprep.subr.bf16.mxu0 %v1111_v14  ;;  %1065 = vmatprep.subr.bf16.mxu1 %v1111_v14 }
  0x26   : > { %960 = vmatpush3.bf16.msra.mxu0 %v1112_v15  ;;  %1073 = vmatpush3.bf16.msra.mxu1 %v1112_v15 }
  0x27   : > { %961 = vmatprep.subr.bf16.mxu0 %v1113_v16  ;;  %1066 = vmatprep.subr.bf16.mxu1 %v1113_v16 }
  0x2a   : > { %962 = vmatpush3.bf16.msra.mxu0 %v1114_v17  ;;  %1074 = vmatpush3.bf16.msra.mxu1 %v1114_v17 }
  0x2d   : > { %589 = vmatmul.mubr.bf16.vlgmr.msra.gmra.mxu0 %v1115_v18  ;;  %653 = vmatmul.mubr.bf16.vlgmr.msra.gmra.mxu1 %v1118_v19 }
  0x2e   : > { %596 = vmatprep.mubr.bf16.mxu0 %v1121_v20  ;;  %660 = vmatprep.mubr.bf16.mxu1 %v1123_v21 }
  0x35   : > { %597 = vmatmul.mubr.bf16.gmra.mxu0 %v1125_v22  ;;  %661 = vmatmul.mubr.bf16.gmra.mxu1 %v1126_v23 }
  0x36   : > { %604 = vmatprep.mubr.bf16.mxu0 %v1127_v24  ;;  %668 = vmatprep.mubr.bf16.mxu1 %v1129_v25 }
  0x3d   : > { %605 = vmatmul.mubr.bf16.gmra.mxu0 %v1131_v26  ;;  %669 = vmatmul.mubr.bf16.gmra.mxu1 %v1132_v27 }
  0x3e   : > { %612 = vmatprep.mubr.bf16.mxu0 %v1133_v28  ;;  %676 = vmatprep.mubr.bf16.mxu1 %v1135_v29 }
  0x45   : > { %613 = vmatmul.mubr.bf16.gmra.mxu0 %v1137_v30  ;;  %677 = vmatmul.mubr.bf16.gmra.mxu1 %v1138_v31 }
  0x46   : > { %620 = vmatprep.mubr.bf16.mxu0 %v1139_v32  ;;  %684 = vmatprep.mubr.bf16.mxu1 %v1141_v33 }
  0x4d   : > { %621 = vmatmul.mubr.bf16.gmra.mxu0 %v1143_v34  ;;  %685 = vmatmul.mubr.bf16.gmra.mxu1 %v1144_v35 }
  0x4e   : > { %628 = vmatprep.mubr.bf16.mxu0 %v1145_v36  ;;  %692 = vmatprep.mubr.bf16.mxu1 %v1147_v37 }
  0x55   : > { %629 = vmatmul.mubr.bf16.gmra.mxu0 %v1149_v38  ;;  %693 = vmatmul.mubr.bf16.gmra.mxu1 %v1150_v39 }
  0x56   : > { %636 = vmatprep.mubr.bf16.mxu0 %v1151_v40  ;;  %700 = vmatprep.mubr.bf16.mxu1 %v1153_v41 }
  0x5d   : > { %637 = vmatmul.mubr.bf16.gmra.mxu0 %v1155_v42  ;;  %701 = vmatmul.mubr.bf16.gmra.mxu1 %v1156_v43 }
  0x5e   : > { %644 = vmatprep.mubr.bf16.mxu0 %v1157_v44  ;;  %708 = vmatprep.mubr.bf16.mxu1 %v1159_v45 }
  0x65   : > { %645 = vmatmul.mubr.bf16.gmra.mxu0 %v1161_v46  ;;  %709 = vmatmul.mubr.bf16.gmra.mxu1 %v1162_v47 }
  0xed   : > { %v963_v48 = vpop.f32.mrf.mxu0  ;;  %v1011_v49 = vpop.f32.mrf.mxu1 }
  0xef   : > { %v964_v51 = vpop.f32.mrf.mxu0  ;;  %v1012_v52 = vpop.f32.mrf.mxu1 }
  0xf0   : > { %v965_v53 = vadd.f32 %v964_v51, %v963_v48  ;;  %v1013_v54 = vadd.f32 %v1012_v52, %v1011_v49 }
  0xf1   : > { %v966_v55 = vpop.f32.mrf.mxu0  ;;  %v1014_v56 = vpop.f32.mrf.mxu1 }
  0xf2   : > { %v591_v57 = vadd.f32 %v965_v53, %v1382_v50  ;;  %v655_v58 = vadd.f32 %v1013_v54, %v1382_v50 }
  0xf3   : > { %v967_v59 = vpop.f32.mrf.mxu0  ;;  %v1015_v60 = vpop.f32.mrf.mxu1 }
  0xf4   : > { %1163 = vtanh.f32 %v591_v57  ;;  %v968_v61 = vadd.f32 %v967_v59, %v966_v55  ;;  %v1016_v62 = vadd.f32 %v1015_v60, %v1014_v56 }
  0xf5   : > { %1165 = vtanh.f32 %v655_v58  ;;  %v969_v63 = vpop.f32.mrf.mxu0  ;;  %v1017_v0 = vpop.f32.mrf.mxu1 }
  0xf6   : > { %v594_v1 = vadd.f32 %v968_v61, %v1382_v50  ;;  %v658_v2 = vadd.f32 %v1016_v62, %v1382_v50 }
  0xf7   : > { %v970_v3 = vpop.f32.mrf.mxu0  ;;  %v1018_v4 = vpop.f32.mrf.mxu1 }
  0xf8   : > { %1167 = vtanh.f32 %v594_v1  ;;  %v971_v5 = vadd.f32 %v970_v3, %v969_v63  ;;  %v1019_v6 = vadd.f32 %v1018_v4, %v1017_v0 }
  0xf9   : > { %1169 = vtanh.f32 %v658_v2  ;;  %v972_v7 = vpop.f32.mrf.mxu0  ;;  %v1020_v8 = vpop.f32.mrf.mxu1 }
  0xfa   : > { %v599_v9 = vadd.f32 %v971_v5, %v1382_v50  ;;  %v663_v10 = vadd.f32 %v1019_v6, %v1382_v50 }
  0xfb   : > { %v973_v11 = vpop.f32.mrf.mxu0  ;;  %v1021_v12 = vpop.f32.mrf.mxu1 }
  0xfc   : > { %1171 = vtanh.f32 %v599_v9  ;;  %v974_v13 = vadd.f32 %v973_v11, %v972_v7  ;;  %v1022_v14 = vadd.f32 %v1021_v12, %v1020_v8 }
  0xfd   : > { %1173 = vtanh.f32 %v663_v10  ;;  %v975_v15 = vpop.f32.mrf.mxu0  ;;  %v1023_v16 = vpop.f32.mrf.mxu1 }
  0xfe   : > { %v602_v17 = vadd.f32 %v974_v13, %v1382_v50  ;;  %v666_v18 = vadd.f32 %v1022_v14, %v1382_v50 }
  0xff   : > { %v976_v19 = vpop.f32.mrf.mxu0  ;;  %v1024_v20 = vpop.f32.mrf.mxu1 }
 0x100   : > { %1175 = vtanh.f32 %v602_v17  ;;  %v977_v21 = vadd.f32 %v976_v19, %v975_v15  ;;  %v1025_v22 = vadd.f32 %v1024_v20, %v1023_v16 }
 0x101   : > { %v1164_v23 = vpop.eup %1163  ;;  %1177 = vtanh.f32 %v666_v18  ;;  %v978_v24 = vpop.f32.mrf.mxu0 }
 0x102   : > { %v1026_v25 = vpop.f32.mrf.mxu1  ;;  %v1166_v26 = vpop.eup %1165  ;;  %749 = vst [vmem:[%s1397_s8] sm:$0xff] %v1164_v23  ;;  %v607_v27 = vadd.f32 %v977_v21, %v1382_v50  ;;  %v671_v28 = vadd.f32 %v1025_v22, %v1382_v50 }
 0x103   : > { %765 = vst [vmem:[%s1397_s8 + $0x80] sm:$0xff] %v1166_v26  ;;  %v979_v29 = vpop.f32.mrf.mxu0 }
 0x104   : > { %v1027_v30 = vpop.f32.mrf.mxu1  ;;  %1179 = vtanh.f32 %v607_v27  ;;  %v980_v31 = vadd.f32 %v979_v29, %v978_v24 }
 0x105   : > { %v1028_v32 = vadd.f32 %v1027_v30, %v1026_v25  ;;  %v1168_v33 = vpop.eup %1167  ;;  %1181 = vtanh.f32 %v671_v28  ;;  %v981_v34 = vpop.f32.mrf.mxu0 }
 0x106   : > { %v1029_v35 = vpop.f32.mrf.mxu1  ;;  %v1170_v36 = vpop.eup %1169  ;;  %750 = vst [vmem:[%s1397_s8 + $0x8] sm:$0xff] %v1168_v33  ;;  %v610_v37 = vadd.f32 %v980_v31, %v1382_v50 }
 0x107   : > { %v674_v38 = vadd.f32 %v1028_v32, %v1382_v50  ;;  %766 = vst [vmem:[%s1397_s8 + $0x88] sm:$0xff] %v1170_v36  ;;  %v982_v39 = vpop.f32.mrf.mxu0 }
 0x108   : > { %v1030_v40 = vpop.f32.mrf.mxu1  ;;  %1183 = vtanh.f32 %v610_v37  ;;  %v983_v41 = vadd.f32 %v982_v39, %v981_v34 }
 0x109   : > { %v1031_v42 = vadd.f32 %v1030_v40, %v1029_v35  ;;  %v1172_v43 = vpop.eup %1171  ;;  %1185 = vtanh.f32 %v674_v38  ;;  %v984_v44 = vpop.f32.mrf.mxu0 }
 0x10a   : > { %v1032_v45 = vpop.f32.mrf.mxu1  ;;  %v1174_v46 = vpop.eup %1173  ;;  %751 = vst [vmem:[%s1397_s8 + $0x10] sm:$0xff] %v1172_v43  ;;  %v615_v47 = vadd.f32 %v983_v41, %v1382_v50 }
 0x10b   : > { %v679_v48 = vadd.f32 %v1031_v42, %v1382_v50  ;;  %767 = vst [vmem:[%s1397_s8 + $0x90] sm:$0xff] %v1174_v46  ;;  %v985_v49 = vpop.f32.mrf.mxu0 }
 0x10c   : > { %v1033_v51 = vpop.f32.mrf.mxu1  ;;  %1187 = vtanh.f32 %v615_v47  ;;  %v986_v52 = vadd.f32 %v985_v49, %v984_v44 }
 0x10d   : > { %v1034_v53 = vadd.f32 %v1033_v51, %v1032_v45  ;;  %v1176_v54 = vpop.eup %1175  ;;  %1189 = vtanh.f32 %v679_v48  ;;  %v987_v55 = vpop.f32.mrf.mxu0 }
 0x10e   : > { %v1035_v56 = vpop.f32.mrf.mxu1  ;;  %v1178_v57 = vpop.eup %1177  ;;  %752 = vst [vmem:[%s1397_s8 + $0x18] sm:$0xff] %v1176_v54  ;;  %v618_v58 = vadd.f32 %v986_v52, %v1382_v50 }
 0x10f   : > { %v682_v59 = vadd.f32 %v1034_v53, %v1382_v50  ;;  %768 = vst [vmem:[%s1397_s8 + $0x98] sm:$0xff] %v1178_v57  ;;  %v988_v60 = vpop.f32.mrf.mxu0 }
 0x110   : > { %v1036_v61 = vpop.f32.mrf.mxu1  ;;  %1191 = vtanh.f32 %v618_v58  ;;  %v989_v62 = vadd.f32 %v988_v60, %v987_v55 }
 0x111   : > { %v1037_v63 = vadd.f32 %v1036_v61, %v1035_v56  ;;  %v1180_v0 = vpop.eup %1179  ;;  %1193 = vtanh.f32 %v682_v59  ;;  %v990_v1 = vpop.f32.mrf.mxu0 }
 0x112   : > { %v1038_v2 = vpop.f32.mrf.mxu1  ;;  %v1182_v3 = vpop.eup %1181  ;;  %753 = vst [vmem:[%s1397_s8 + $0x20] sm:$0xff] %v1180_v0  ;;  %v623_v4 = vadd.f32 %v989_v62, %v1382_v50 }
 0x113   : > { %v687_v5 = vadd.f32 %v1037_v63, %v1382_v50  ;;  %769 = vst [vmem:[%s1397_s8 + $0xa0] sm:$0xff] %v1182_v3  ;;  %v991_v6 = vpop.f32.mrf.mxu0 }
 0x114   : > { %v1039_v7 = vpop.f32.mrf.mxu1  ;;  %1195 = vtanh.f32 %v623_v4  ;;  %v992_v8 = vadd.f32 %v991_v6, %v990_v1 }
 0x115   : > { %v1040_v9 = vadd.f32 %v1039_v7, %v1038_v2  ;;  %v1184_v10 = vpop.eup %1183  ;;  %1197 = vtanh.f32 %v687_v5  ;;  %v993_v11 = vpop.f32.mrf.mxu0 }
 0x116   : > { %v1041_v12 = vpop.f32.mrf.mxu1  ;;  %v1186_v13 = vpop.eup %1185  ;;  %754 = vst [vmem:[%s1397_s8 + $0x28] sm:$0xff] %v1184_v10  ;;  %v626_v14 = vadd.f32 %v992_v8, %v1382_v50 }
 0x117   : > { %v690_v15 = vadd.f32 %v1040_v9, %v1382_v50  ;;  %770 = vst [vmem:[%s1397_s8 + $0xa8] sm:$0xff] %v1186_v13  ;;  %v994_v16 = vpop.f32.mrf.mxu0 }
 0x118   : > { %v1042_v17 = vpop.f32.mrf.mxu1  ;;  %1199 = vtanh.f32 %v626_v14  ;;  %v995_v18 = vadd.f32 %v994_v16, %v993_v11 }
 0x119   : > { %v1043_v19 = vadd.f32 %v1042_v17, %v1041_v12  ;;  %v1188_v20 = vpop.eup %1187  ;;  %1201 = vtanh.f32 %v690_v15  ;;  %v996_v21 = vpop.f32.mrf.mxu0 }
 0x11a   : > { %v1044_v22 = vpop.f32.mrf.mxu1  ;;  %v1190_v23 = vpop.eup %1189  ;;  %755 = vst [vmem:[%s1397_s8 + $0x30] sm:$0xff] %v1188_v20  ;;  %v631_v24 = vadd.f32 %v995_v18, %v1382_v50 }
 0x11b   : > { %v695_v25 = vadd.f32 %v1043_v19, %v1382_v50  ;;  %771 = vst [vmem:[%s1397_s8 + $0xb0] sm:$0xff] %v1190_v23  ;;  %v997_v26 = vpop.f32.mrf.mxu0 }
 0x11c   : > { %v1045_v27 = vpop.f32.mrf.mxu1  ;;  %1203 = vtanh.f32 %v631_v24  ;;  %v998_v28 = vadd.f32 %v997_v26, %v996_v21 }
 0x11d   : > { %v1046_v29 = vadd.f32 %v1045_v27, %v1044_v22  ;;  %v1192_v30 = vpop.eup %1191  ;;  %1205 = vtanh.f32 %v695_v25  ;;  %v999_v31 = vpop.f32.mrf.mxu0 }
 0x11e   : > { %v1047_v32 = vpop.f32.mrf.mxu1  ;;  %v1194_v33 = vpop.eup %1193  ;;  %756 = vst [vmem:[%s1397_s8 + $0x38] sm:$0xff] %v1192_v30  ;;  %v634_v34 = vadd.f32 %v998_v28, %v1382_v50 }
 0x11f   : > { %v698_v35 = vadd.f32 %v1046_v29, %v1382_v50  ;;  %772 = vst [vmem:[%s1397_s8 + $0xb8] sm:$0xff] %v1194_v33  ;;  %v1000_v36 = vpop.f32.mrf.mxu0 }
 0x120   : > { %v1048_v37 = vpop.f32.mrf.mxu1  ;;  %1207 = vtanh.f32 %v634_v34  ;;  %v1001_v38 = vadd.f32 %v1000_v36, %v999_v31 }
 0x121   : > { %v1049_v39 = vadd.f32 %v1048_v37, %v1047_v32  ;;  %v1196_v40 = vpop.eup %1195  ;;  %1209 = vtanh.f32 %v698_v35  ;;  %v1002_v41 = vpop.f32.mrf.mxu0 }
 0x122   : > { %v1050_v42 = vpop.f32.mrf.mxu1  ;;  %v1198_v43 = vpop.eup %1197  ;;  %757 = vst [vmem:[%s1397_s8 + $0x40] sm:$0xff] %v1196_v40  ;;  %v639_v44 = vadd.f32 %v1001_v38, %v1382_v50 }
 0x123   : > { %v703_v45 = vadd.f32 %v1049_v39, %v1382_v50  ;;  %773 = vst [vmem:[%s1397_s8 + $0xc0] sm:$0xff] %v1198_v43  ;;  %v1003_v46 = vpop.f32.mrf.mxu0 }
 0x124   : > { %v1051_v47 = vpop.f32.mrf.mxu1  ;;  %1211 = vtanh.f32 %v639_v44  ;;  %v1004_v48 = vadd.f32 %v1003_v46, %v1002_v41 }
 0x125   : > { %v1052_v49 = vadd.f32 %v1051_v47, %v1050_v42  ;;  %v1200_v51 = vpop.eup %1199  ;;  %1213 = vtanh.f32 %v703_v45  ;;  %v1005_v52 = vpop.f32.mrf.mxu0 }
 0x126   : > { %v1053_v53 = vpop.f32.mrf.mxu1  ;;  %v1202_v54 = vpop.eup %1201  ;;  %758 = vst [vmem:[%s1397_s8 + $0x48] sm:$0xff] %v1200_v51  ;;  %v642_v55 = vadd.f32 %v1004_v48, %v1382_v50 }
 0x127   : > { %v706_v56 = vadd.f32 %v1052_v49, %v1382_v50  ;;  %774 = vst [vmem:[%s1397_s8 + $0xc8] sm:$0xff] %v1202_v54  ;;  %v1006_v57 = vpop.f32.mrf.mxu0 }
 0x128   : > { %v1054_v58 = vpop.f32.mrf.mxu1  ;;  %1215 = vtanh.f32 %v642_v55  ;;  %v1007_v59 = vadd.f32 %v1006_v57, %v1005_v52 }
 0x129   : > { %v1055_v60 = vadd.f32 %v1054_v58, %v1053_v53  ;;  %v1204_v61 = vpop.eup %1203  ;;  %1217 = vtanh.f32 %v706_v56  ;;  %v1008_v62 = vpop.f32.mrf.mxu0 }
 0x12a   : > { %v1056_v63 = vpop.f32.mrf.mxu1  ;;  %v1206_v0 = vpop.eup %1205  ;;  %759 = vst [vmem:[%s1397_s8 + $0x50] sm:$0xff] %v1204_v61  ;;  %v647_v1 = vadd.f32 %v1007_v59, %v1382_v50 }
 0x12b   : > { %v711_v2 = vadd.f32 %v1055_v60, %v1382_v50  ;;  %775 = vst [vmem:[%s1397_s8 + $0xd0] sm:$0xff] %v1206_v0  ;;  %v1009_v3 = vpop.f32.mrf.mxu0 }
 0x12c   : > { %v1057_v4 = vpop.f32.mrf.mxu1  ;;  %1219 = vtanh.f32 %v647_v1  ;;  %v1010_v5 = vadd.f32 %v1009_v3, %v1008_v62 }
 0x12d   : > { %v1058_v6 = vadd.f32 %v1057_v4, %v1056_v63  ;;  %v1208_v7 = vpop.eup %1207  ;;  %1221 = vtanh.f32 %v711_v2 }
 0x12e   : > { %v1210_v8 = vpop.eup %1209  ;;  %760 = vst [vmem:[%s1397_s8 + $0x58] sm:$0xff] %v1208_v7  ;;  %v650_v9 = vadd.f32 %v1010_v5, %v1382_v50 }
 0x12f   : > { %v714_v10 = vadd.f32 %v1058_v6, %v1382_v50  ;;  %776 = vst [vmem:[%s1397_s8 + $0xd8] sm:$0xff] %v1210_v8 }
 0x130   : > { %1223 = vtanh.f32 %v650_v9 }
 0x131   : > { %v1212_v11 = vpop.eup %1211  ;;  %1225 = vtanh.f32 %v714_v10 }
 0x132   : > { %v1214_v12 = vpop.eup %1213  ;;  %761 = vst [vmem:[%s1397_s8 + $0x60] sm:$0xff] %v1212_v11 }
 0x133   : > { %777 = vst [vmem:[%s1397_s8 + $0xe0] sm:$0xff] %v1214_v12 }
 0x135   : > { %v1216_v13 = vpop.eup %1215 }
 0x136   : > { %v1218_v14 = vpop.eup %1217  ;;  %762 = vst [vmem:[%s1397_s8 + $0x68] sm:$0xff] %v1216_v13 }
 0x137   : > { %778 = vst [vmem:[%s1397_s8 + $0xe8] sm:$0xff] %v1218_v14 }
 0x139   : > { %v1220_v15 = vpop.eup %1219 }
 0x13a   : > { %v1222_v16 = vpop.eup %1221  ;;  %763 = vst [vmem:[%s1397_s8 + $0x70] sm:$0xff] %v1220_v15 }
 0x13b   : > { %779 = vst [vmem:[%s1397_s8 + $0xf0] sm:$0xff] %v1222_v16 }
 0x13d   : > { %v1224_v17 = vpop.eup %1223 }
 0x13e   : > { %v1226_v18 = vpop.eup %1225  ;;  %764 = vst [vmem:[%s1397_s8 + $0x78] sm:$0xff] %v1224_v17 }
 0x13f   : > { %780 = vst [vmem:[%s1397_s8 + $0xf8] sm:$0xff] %v1226_v18 }
 0x140 PF: > { %s13_s14 = sadd.s32 1, %s1249_s14   ;;  %s1468_s12 = smov %s1245_s13 }
 0x141   : > { %p10_p5 = scmp.ge.s32.totalorder %s13_s14, 10   ;;  %s1469_s13 = smov %s1471_s15 }
 0x143   :  { %12 = sbr.rel (!%p10_p5) target bundleno = 2 (0x2), region = 68 }

</bundles_post_ra>
